<compile_context>
chip_gen: v5e
topology: v5e:2x2
jax: 0.10.0
libtpu: 0.0.40
codegen_flags: <defaults>
</compile_context>

<pallas_src>
import functools
import math

import jax
import jax.numpy as jnp
from jax import lax
from jax.experimental import pallas as pl
from jax.experimental.pallas import tpu as pltpu

EPS = 1e-5
COMPUTE_DTYPE = jnp.bfloat16        # MXU input dtype (f32 accumulation)
VMEM_LIMIT = 48 * 1024 * 1024       # fits v7x's 64 MiB/TC; generous on v5e/v6e


def _round_up(x, m):
    return (x + m - 1) // m * m


def _pick_tm(m, target=512):
    """M-tile that divides the padded M with minimal padding waste."""
    if m <= target:
        return _round_up(max(m, 8), 8)
    nblk = -(-m // target)
    return _round_up(-(-m // nblk), 8)


def _pick_tn(coutp):
    return 256 if coutp % 256 == 0 else 128


def _pick_band(ho):
    """Output-row band height: largest divisor of Ho that is <= 16."""
    if ho <= 16:
        return ho
    for d in range(16, 0, -1):
        if ho % d == 0:
            return d
    return ho


# -----------------------------------------------------------------------------
# Pallas kernels
# -----------------------------------------------------------------------------
def _matmul_heads_kernel(*refs, relu_flags, res_flags):
    # refs = [x, (w, b[, res]) per head ..., out per head ...]
    # x: (tm, K)  w: (K, Coutp) resident  b: (1, Coutp) resident  o: (tm, Coutp)
    n = len(relu_flags)
    x = refs[0][...]
    out_refs = refs[len(refs) - n:]
    idx = 1
    for h in range(n):
        w_ref, b_ref = refs[idx], refs[idx + 1]
        idx += 2
        acc = jnp.dot(x, w_ref[...], preferred_element_type=jnp.float32)
        acc = acc + b_ref[...].astype(jnp.float32)
        if res_flags[h]:
            acc = acc + refs[idx][...].astype(jnp.float32)
            idx += 1
        if relu_flags[h]:
            acc = jnp.maximum(acc, 0.0)
        out_refs[h][...] = acc.astype(out_refs[h].dtype)


def _conv3x3_kernel(ph_ref, w_ref, b_ref, o_ref, patch_ref, *, kh, kw, stride,
                    band_h, wo_pad, apply_relu):
    # ph_ref:    (nph, Hph, Wph, Cinp)  whole-image stride-phase grids (resident)
    # w_ref:     (kh*kw*Cinp, tn)       BN-folded weight, taps flattened along K
    # b_ref:     (1, tn)
    # o_ref:     (1, band_h, wo_pad, tn)
    # patch_ref: (band_h*wo_pad, kh*kw*Cinp) VMEM scratch (im2col patch)
    cin = ph_ref.shape[-1]
    tn = o_ref.shape[-1]
    m = band_h * wo_pad
    row0 = pl.program_id(2) * band_h
    for di in range(kh):
        for dj in range(kw):
            t = di * kw + dj
            p = (di % stride) * stride + (dj % stride)     # phase sub-grid index
            oi, oj = di // stride, dj // stride            # offset inside the phase
            win = ph_ref[p, pl.ds(row0 + oi, band_h), pl.ds(oj, wo_pad), :]
            # wo_pad % 8 == 0 -> the merge below is a free relabel (no relayout)
            patch_ref[:, t * cin:(t + 1) * cin] = win.reshape(m, cin)
    acc = jnp.dot(patch_ref[...], w_ref[...], preferred_element_type=jnp.float32)
    out = acc + b_ref[...].astype(jnp.float32)
    if apply_relu:
        out = jnp.maximum(out, 0.0)
    o_ref[...] = out.reshape(1, band_h, wo_pad, tn).astype(o_ref.dtype)


# -----------------------------------------------------------------------------
# pallas_call wrappers
# -----------------------------------------------------------------------------
def conv1x1_heads(x_nhwc, heads, *, stride=1):
    """One or more fused 1x1 conv + BN bias [+ residual] [+ ReLU] sharing one input.

    heads: list of dicts {w: (K, Coutp) bf16, b: (1, Coutp) f32, relu: bool,
                          residual: optional NHWC, out_dtype: optional}.
    Returns a list of NHWC outputs, one per head.
    """
    if stride != 1:
        # TODO(synk): fold the spatial subsample into the kernel index_map.
        x_nhwc = x_nhwc[:, ::stride, ::stride, :]
    N, H, W, K = x_nhwc.shape
    M = N * H * W
    x2d = x_nhwc.reshape(M, K)
    tm = _pick_tm(M)
    mpad = _round_up(M, tm)
    if mpad != M:
        x2d = jnp.pad(x2d, ((0, mpad - M), (0, 0)))
    grid = (mpad // tm,)

    inputs = [x2d]
    in_specs = [pl.BlockSpec((tm, K), lambda i: (i, 0))]
    out_shapes, out_specs, relu_flags, res_flags = [], [], [], []
    for h in heads:
        w, b = h["w"], h["b"]
        coutp = w.shape[1]
        inputs += [w, b]
        in_specs += [pl.BlockSpec((K, coutp), lambda i: (0, 0)),   # resident weight
                     pl.BlockSpec((1, coutp), lambda i: (0, 0))]   # resident bias
        res = h.get("residual")
        if res is not None:
            res2d = res.reshape(M, coutp)
            if mpad != M:
                res2d = jnp.pad(res2d, ((0, mpad - M), (0, 0)))
            inputs.append(res2d)
            in_specs.append(pl.BlockSpec((tm, coutp), lambda i: (i, 0)))
        relu_flags.append(bool(h["relu"]))
        res_flags.append(res is not None)
        out_shapes.append(jax.ShapeDtypeStruct((mpad, coutp),
                                               h.get("out_dtype", COMPUTE_DTYPE)))
        out_specs.append(pl.BlockSpec((tm, coutp), lambda i: (i, 0)))

    kernel = functools.partial(_matmul_heads_kernel,
                               relu_flags=tuple(relu_flags),
                               res_flags=tuple(res_flags))
    outs = pl.pallas_call(
        kernel,
        out_shape=tuple(out_shapes),
        grid=grid,
        in_specs=in_specs,
        out_specs=tuple(out_specs),
        compiler_params=pltpu.CompilerParams(
            dimension_semantics=("parallel",), vmem_limit_bytes=VMEM_LIMIT),
    )(*inputs)
    if not isinstance(outs, (tuple, list)):
        outs = (outs,)
    return [o[:M].reshape(N, H, W, o.shape[1]) for o in outs]


def conv3x3_bn_act(x_nhwc, w_flat, bias, *, stride, apply_relu,
                   out_dtype=COMPUTE_DTYPE):
    """3x3 conv + folded BN (+ ReLU) via stride-phase windows and fused-K matmul."""
    N, H, W, cinp = x_nhwc.shape
    kh = kw = 3
    coutp = w_flat.shape[1]
    assert w_flat.shape[0] == kh * kw * cinp
    pad = kh // 2
    Ho = (H + 2 * pad - kh) // stride + 1
    Wo = (W + 2 * pad - kw) // stride + 1
    wo_pad = _round_up(Wo, 8)                  # keep reshapes free relabels
    Hph = Ho + (kh - 1) // stride
    Wph = wo_pad + (kw - 1) // stride

    # Stride-phase sub-grids of the zero-padded input (total bytes == input bytes).
    xp = jnp.pad(x_nhwc, ((0, 0), (pad, pad), (pad, pad), (0, 0)))
    phase_list = []
    for pi in range(stride):
        for pj in range(stride):
            ph = xp[:, pi::stride, pj::stride, :]
            ph = ph[:, :Hph, :Wph, :]
            ph = jnp.pad(ph, ((0, 0), (0, Hph - ph.shape[1]),
                              (0, Wph - ph.shape[2]), (0, 0)))
            phase_list.append(ph)
    nph = stride * stride
    phases = jnp.stack(phase_list, axis=1).reshape(N * nph, Hph, Wph, cinp)

    band_h = _pick_band(Ho)
    nbands = Ho // band_h
    tn = _pick_tn(coutp)
    grid = (N, coutp // tn, nbands)
    kernel = functools.partial(_conv3x3_kernel, kh=kh, kw=kw, stride=stride,
                               band_h=band_h, wo_pad=wo_pad, apply_relu=apply_relu)
    out = pl.pallas_call(
        kernel,
        out_shape=jax.ShapeDtypeStruct((N, Ho, wo_pad, coutp), out_dtype),
        grid=grid,
        in_specs=[
            pl.BlockSpec((nph, Hph, Wph, cinp), lambda n, j, b: (n, 0, 0, 0)),
            pl.BlockSpec((kh * kw * cinp, tn), lambda n, j, b: (0, j)),
            pl.BlockSpec((1, tn), lambda n, j, b: (0, j)),
        ],
        out_specs=pl.BlockSpec((1, band_h, wo_pad, tn), lambda n, j, b: (n, b, 0, j)),
        scratch_shapes=[pltpu.VMEM((band_h * wo_pad, kh * kw * cinp), COMPUTE_DTYPE)],
        compiler_params=pltpu.CompilerParams(
            dimension_semantics=("parallel", "parallel", "parallel"),
            vmem_limit_bytes=VMEM_LIMIT),
    )(phases, w_flat, bias)
    if wo_pad != Wo:
        out = out[:, :, :Wo, :]
    return out


# -----------------------------------------------------------------------------
# Parameter preparation: fold BN into weights/bias, pad channels, cast to bf16
# -----------------------------------------------------------------------------
def prep_conv_params(w_oihw, bn):
    gamma, beta, mean, var = bn
    scale = gamma / jnp.sqrt(var + EPS)
    bias = beta - mean * scale
    Cout, Cin, kh, kw = w_oihw.shape
    w = w_oihw * scale[:, None, None, None]          # fold BN scale into weights
    cinp = _round_up(Cin, 128)
    coutp = _round_up(Cout, 128)
    if kh == 1 and kw == 1:
        w2d = jnp.transpose(w[:, :, 0, 0], (1, 0))   # (Cin, Cout)
        wprep = jnp.pad(w2d, ((0, cinp - Cin), (0, coutp - Cout))).astype(COMPUTE_DTYPE)
    else:
        whwio = jnp.transpose(w, (2, 3, 1, 0))       # (kh, kw, Cin, Cout)
        whwio = jnp.pad(whwio, ((0, 0), (0, 0), (0, cinp - Cin), (0, coutp - Cout)))
        wprep = whwio.reshape(kh * kw * cinp, coutp).astype(COMPUTE_DTYPE)
    # Invariant: padded weight columns AND padded bias entries are exactly zero, so
    # padded output channels stay zero through bias / ReLU / residual.
    biasp = jnp.pad(bias, (0, coutp - Cout)).reshape(1, coutp).astype(jnp.float32)
    return wprep, biasp


def prepare_layer_params(raw):
    p = {
        "conv1": prep_conv_params(raw["conv1_w"], raw["bn1"]),
        "conv2": prep_conv_params(raw["conv2_w"], raw["bn2"]),
        "conv3": prep_conv_params(raw["conv3_w"], raw["bn3"]),
    }
    if "shortcut_w" in raw:
        p["shortcut"] = prep_conv_params(raw["shortcut_w"], raw["shortcut_bn"])
    return p


# -----------------------------------------------------------------------------
# Bottleneck layer / stage forward
# -----------------------------------------------------------------------------
def bottleneck_forward(x_nhwc, p, stride, out_dtype, downsample_in_bottleneck=False):
    s1 = stride if downsample_in_bottleneck else 1
    s2 = 1 if downsample_in_bottleneck else stride
    w1, b1 = p["conv1"]
    if "shortcut" in p:
        ws, bs = p["shortcut"]
        if s1 == stride:
            # shortcut + conv1 share the same (strided) input -> single fused pass
            h, residual = conv1x1_heads(
                x_nhwc,
                [dict(w=w1, b=b1, relu=True), dict(w=ws, b=bs, relu=False)],
                stride=s1)
        else:
            (residual,) = conv1x1_heads(x_nhwc, [dict(w=ws, b=bs, relu=False)],
                                        stride=stride)
            (h,) = conv1x1_heads(x_nhwc, [dict(w=w1, b=b1, relu=True)], stride=s1)
    else:
        residual = x_nhwc
        (h,) = conv1x1_heads(x_nhwc, [dict(w=w1, b=b1, relu=True)], stride=s1)

    w2, b2 = p["conv2"]
    h = conv3x3_bn_act(h, w2, b2, stride=s2, apply_relu=True)

    w3, b3 = p["conv3"]
    # residual add + final ReLU fused into the conv3 matmul epilogue
    (out,) = conv1x1_heads(
        h, [dict(w=w3, b=b3, relu=True, residual=residual, out_dtype=out_dtype)],
        stride=1)
    return out


def resnet_stage_forward(x_nchw, layer_params, *, stride, out_channels,
                         downsample_in_bottleneck=False):
    h = jnp.transpose(x_nchw, (0, 2, 3, 1))          # NCHW -> NHWC
    Cin = h.shape[-1]
    cinp = _round_up(Cin, 128)
    h = jnp.pad(h, ((0, 0), (0, 0), (0, 0), (0, cinp - Cin))).astype(COMPUTE_DTYPE)
    n = len(layer_params)
    for li, p in enumerate(layer_params):
        od = jnp.float32 if li == n - 1 else COMPUTE_DTYPE
        h = bottleneck_forward(h, p, stride=stride if li == 0 else 1,
                               out_dtype=od,
                               downsample_in_bottleneck=downsample_in_bottleneck)
    h = h[:, :, :, :out_channels]
    return jnp.transpose(h, (0, 3, 1, 2))            # back to NCHW


# -----------------------------------------------------------------------------
# Deterministic parameter init (raw, PyTorch-layout)
# -----------------------------------------------------------------------------
def init_conv(key, cout, cin, k):
    fan_in = cin * k * k
    return jax.random.normal(key, (cout, cin, k, k), jnp.float32) / math.sqrt(fan_in)


def init_bn(key, c):
    k1, k2, k3, k4 = jax.random.split(key, 4)
    gamma = 1.0 + 0.1 * jax.random.normal(k1, (c,), jnp.float32)
    beta = 0.1 * jax.random.normal(k2, (c,), jnp.float32)
    mean = 0.1 * jax.random.normal(k3, (c,), jnp.float32)
    var = 1.0 + 0.1 * jnp.abs(jax.random.normal(k4, (c,), jnp.float32))
    return (gamma, beta, mean, var)


def init_stage_params(key, in_channels, out_channels, depth, stride, reduction=4):
    reduced = out_channels // reduction
    layers = []
    for li in range(depth):
        cin = in_channels if li == 0 else out_channels
        s = stride if li == 0 else 1
        key, *ks = jax.random.split(key, 9)
        p = {
            "conv1_w": init_conv(ks[0], reduced, cin, 1),
            "bn1": init_bn(ks[1], reduced),
            "conv2_w": init_conv(ks[2], reduced, reduced, 3),
            "bn2": init_bn(ks[3], reduced),
            "conv3_w": init_conv(ks[4], out_channels, reduced, 1),
            "bn3": init_bn(ks[5], out_channels),
        }
        if cin != out_channels or s != 1:
            p["shortcut_w"] = init_conv(ks[6], out_channels, cin, 1)
            p["shortcut_bn"] = init_bn(ks[7], out_channels)
        layers.append(p)
    return layers


# -----------------------------------------------------------------------------
# Pure-JAX f32 reference (lax.conv) for correctness check
# -----------------------------------------------------------------------------
def ref_conv_bn_act(x_nhwc, w_oihw, bn, stride, apply_relu):
    k = w_oihw.shape[2]
    pad = k // 2
    w_hwio = jnp.transpose(w_oihw, (2, 3, 1, 0))
    y = lax.conv_general_dilated(x_nhwc, w_hwio, (stride, stride),
                                 [(pad, pad), (pad, pad)],
                                 dimension_numbers=("NHWC", "HWIO", "NHWC"))
    gamma, beta, mean, var = bn
    y = (y - mean) / jnp.sqrt(var + EPS) * gamma + beta
    if apply_relu:
        y = jnp.maximum(y, 0.0)
    return y


def ref_stage(x_nchw, layer_params, stride, downsample_in_bottleneck=False):
    h = jnp.transpose(x_nchw, (0, 2, 3, 1))
    for li, p in enumerate(layer_params):
        s = stride if li == 0 else 1
        s1 = s if downsample_in_bottleneck else 1
        s2 = 1 if downsample_in_bottleneck else s
        r = h
        y = ref_conv_bn_act(h, p["conv1_w"], p["bn1"], s1, True)
        y = ref_conv_bn_act(y, p["conv2_w"], p["bn2"], s2, True)
        y = ref_conv_bn_act(y, p["conv3_w"], p["bn3"], 1, False)
        if "shortcut_w" in p:
            r = ref_conv_bn_act(r, p["shortcut_w"], p["shortcut_bn"], s, False)
        h = jnp.maximum(y + r, 0.0)
    return jnp.transpose(h, (0, 3, 1, 2))


# -----------------------------------------------------------------------------
if __name__ == "__main__":
    key = jax.random.PRNGKey(0)

    # (B, Cin, Cout, H, W, stride, depth, downsample_in_bottleneck)
    configs = [
        (2, 4, 8, 16, 16, 2, 2, False),    # stage stride 2, depth 2 (original test)
        (1, 16, 32, 28, 28, 1, 1, False),  # fused shortcut+conv1, multi-band 3x3, Wo pad
        (2, 8, 16, 16, 16, 2, 1, True),    # downsample in the first 1x1 conv
    ]
    for (B, CIN, COUT, H, W, STRIDE, DEPTH, DIB) in configs:
        key, kx, kp = jax.random.split(key, 3)
        x = jax.random.normal(kx, (B, CIN, H, W), jnp.float32)   # NCHW like PyTorch
        raw_params = init_stage_params(kp, CIN, COUT, DEPTH, STRIDE)
        prepared = [prepare_layer_params(p) for p in raw_params]

        fwd = jax.jit(functools.partial(resnet_stage_forward, stride=STRIDE,
                                        out_channels=COUT,
                                        downsample_in_bottleneck=DIB))
        out = jax.block_until_ready(fwd(x, prepared))
        assert out.shape == (B, COUT, H // STRIDE, W // STRIDE), out.shape

        ref = jax.block_until_ready(ref_stage(x, raw_params, STRIDE, DIB))
        max_err = float(jnp.max(jnp.abs(out - ref)))
        # bf16 MXU inputs (f32 accumulation) -> relaxed tolerance vs f32 reference.
        assert jnp.allclose(out, ref, rtol=5e-2, atol=5e-2), (out.shape, max_err)

    print("KERNEL_OK")
</pallas_src>

<mosaic_0001>
module attributes {stable_mosaic.version = 11 : i64} {
  func.func @_matmul_heads_kernel(%arg0: i32, %arg1: memref<512x128xbf16, #tpu.memory_space<vmem>>, %arg2: memref<128x128xbf16, #tpu.memory_space<vmem>>, %arg3: memref<1x128xf32, #tpu.memory_space<vmem>>, %arg4: memref<512x128xbf16, #tpu.memory_space<vmem>>) attributes {dimension_semantics = [#tpu.dimension_semantics<parallel>], iteration_bounds = array<i64: 1>, scalar_prefetch = 0 : i64, scratch_operands = 0 : i64, tpu.core_type = #tpu.core_type<tc>, window_params = [{transform_indices = @transform_0, window_bounds = array<i64: 512, 128>}, {pipeline_mode = #tpu.pipeline_mode<synchronous>, transform_indices = @transform_1, window_bounds = array<i64: 128, 128>}, {pipeline_mode = #tpu.pipeline_mode<synchronous>, transform_indices = @transform_2, window_bounds = array<i64: 1, 128>}, {transform_indices = @transform_3, window_bounds = array<i64: 512, 128>}]} {
    %c0 = arith.constant 0 : index
    %c0_0 = arith.constant 0 : index
    %0 = vector.load %arg1[%c0, %c0_0] : memref<512x128xbf16, #tpu.memory_space<vmem>>, vector<512x128xbf16>
    %c0_1 = arith.constant 0 : index
    %c0_2 = arith.constant 0 : index
    %1 = vector.load %arg2[%c0_1, %c0_2] : memref<128x128xbf16, #tpu.memory_space<vmem>>, vector<128x128xbf16>
    %cst = arith.constant dense<0.000000e+00> : vector<512x128xf32>
    %2 = tpu.matmul %0, %1, %cst {dimension_numbers = #tpu.dot_dimension_numbers<[1], [0], [0], [1], [0, 0, 1, 1], [], []>} : vector<512x128xbf16>, vector<128x128xbf16>, vector<512x128xf32> -> vector<512x128xf32>
    %c0_3 = arith.constant 0 : index
    %c0_4 = arith.constant 0 : index
    %3 = vector.load %arg3[%c0_3, %c0_4] : memref<1x128xf32, #tpu.memory_space<vmem>>, vector<1x128xf32>
    %4 = vector.broadcast %3 : vector<1x128xf32> to vector<512x128xf32>
    %5 = arith.addf %2, %4 : vector<512x128xf32>
    %cst_5 = arith.constant 0.000000e+00 : f32
    %6 = vector.broadcast %cst_5 : f32 to vector<512x128xf32>
    %7 = arith.maximumf %5, %6 : vector<512x128xf32>
    %8 = arith.truncf %7 : vector<512x128xf32> to vector<512x128xbf16>
    %c0_6 = arith.constant 0 : index
    %c0_7 = arith.constant 0 : index
    %9 = vector.load %arg4[%c0_6, %c0_7] : memref<512x128xbf16, #tpu.memory_space<vmem>>, vector<512x128xbf16>
    tpu.vector_store %arg4[%c0_6, %c0_7], %8 {strides = array<i32>} : memref<512x128xbf16, #tpu.memory_space<vmem>>, vector<512x128xbf16>,
    return
  }
  func.func @transform_0(%arg0: i32) -> (i32, i32) {
    %c0_i32 = arith.constant 0 : i32
    %c0_i32_0 = arith.constant 0 : i32
    return %arg0, %c0_i32 : i32, i32
  }
  func.func @transform_1(%arg0: i32) -> (i32, i32) {
    %c0_i32 = arith.constant 0 : i32
    %c0_i32_0 = arith.constant 0 : i32
    %c0_i32_1 = arith.constant 0 : i32
    return %c0_i32, %c0_i32_0 : i32, i32
  }
  func.func @transform_2(%arg0: i32) -> (i32, i32) {
    %c0_i32 = arith.constant 0 : i32
    %c0_i32_0 = arith.constant 0 : i32
    %c0_i32_1 = arith.constant 0 : i32
    return %c0_i32, %c0_i32_0 : i32, i32
  }
  func.func @transform_3(%arg0: i32) -> (i32, i32) {
    %c0_i32 = arith.constant 0 : i32
    %c0_i32_0 = arith.constant 0 : i32
    return %arg0, %c0_i32 : i32, i32
  }
}

module attributes {stable_mosaic.version = 11 : i64} {
  func.func @_conv3x3_kernel(%arg0: i32, %arg1: i32, %arg2: i32, %arg3: memref<4x9x9x128xbf16, #tpu.memory_space<vmem>>, %arg4: memref<1152x128xbf16, #tpu.memory_space<vmem>>, %arg5: memref<1x128xf32, #tpu.memory_space<vmem>>, %arg6: memref<1x8x8x128xbf16, #tpu.memory_space<vmem>>, %arg7: memref<64x1152xbf16, #tpu.memory_space<vmem>>) attributes {dimension_semantics = [#tpu.dimension_semantics<parallel>, #tpu.dimension_semantics<parallel>, #tpu.dimension_semantics<parallel>], iteration_bounds = array<i64: 2, 1, 1>, scalar_prefetch = 0 : i64, scratch_operands = 1 : i64, tpu.core_type = #tpu.core_type<tc>, window_params = [{transform_indices = @transform_0, window_bounds = array<i64: 4, 9, 9, 128>}, {transform_indices = @transform_1, window_bounds = array<i64: 1152, 128>}, {transform_indices = @transform_2, window_bounds = array<i64: 1, 128>}, {transform_indices = @transform_3, window_bounds = array<i64: 1, 8, 8, 128>}]} {
    %c8_i32 = arith.constant 8 : i32
    %0 = arith.muli %arg2, %c8_i32 : i32
    %c0_i32 = arith.constant 0 : i32
    %1 = arith.addi %0, %c0_i32 : i32
    %c0 = arith.constant 0 : index
    %2 = arith.index_cast %1 : i32 to index
    %c0_0 = arith.constant 0 : index
    %c0_1 = arith.constant 0 : index
    %3 = vector.load %arg3[%c0, %2, %c0_0, %c0_1] : memref<4x9x9x128xbf16, #tpu.memory_space<vmem>>, vector<1x8x8x128xbf16>
    %4 = vector.shape_cast %3 : vector<1x8x8x128xbf16> to vector<8x8x128xbf16>
    %5 = vector.shape_cast %4 : vector<8x8x128xbf16> to vector<64x128xbf16>
    %c0_2 = arith.constant 0 : index
    %c0_3 = arith.constant 0 : index
    %6 = vector.load %arg7[%c0_2, %c0_3] : memref<64x1152xbf16, #tpu.memory_space<vmem>>, vector<64x128xbf16>
    tpu.vector_store %arg7[%c0_2, %c0_3], %5 {strides = array<i32>} : memref<64x1152xbf16, #tpu.memory_space<vmem>>, vector<64x128xbf16>,
    %c0_i32_4 = arith.constant 0 : i32
    %7 = arith.addi %0, %c0_i32_4 : i32
    %c1 = arith.constant 1 : index
    %8 = arith.index_cast %7 : i32 to index
    %c0_5 = arith.constant 0 : index
    %c0_6 = arith.constant 0 : index
    %9 = vector.load %arg3[%c1, %8, %c0_5, %c0_6] : memref<4x9x9x128xbf16, #tpu.memory_space<vmem>>, vector<1x8x8x128xbf16>
    %10 = vector.shape_cast %9 : vector<1x8x8x128xbf16> to vector<8x8x128xbf16>
    %11 = vector.shape_cast %10 : vector<8x8x128xbf16> to vector<64x128xbf16>
    %c0_7 = arith.constant 0 : index
    %c128 = arith.constant 128 : index
    %12 = vector.load %arg7[%c0_7, %c128] : memref<64x1152xbf16, #tpu.memory_space<vmem>>, vector<64x128xbf16>
    tpu.vector_store %arg7[%c0_7, %c128], %11 {strides = array<i32>} : memref<64x1152xbf16, #tpu.memory_space<vmem>>, vector<64x128xbf16>,
    %c0_i32_8 = arith.constant 0 : i32
    %13 = arith.addi %0, %c0_i32_8 : i32
    %c0_9 = arith.constant 0 : index
    %14 = arith.index_cast %13 : i32 to index
    %c1_10 = arith.constant 1 : index
    %c0_11 = arith.constant 0 : index
    %15 = vector.load %arg3[%c0_9, %14, %c1_10, %c0_11] : memref<4x9x9x128xbf16, #tpu.memory_space<vmem>>, vector<1x8x8x128xbf16>
    %16 = vector.shape_cast %15 : vector<1x8x8x128xbf16> to vector<8x8x128xbf16>
    %17 = vector.shape_cast %16 : vector<8x8x128xbf16> to vector<64x128xbf16>
    %c0_12 = arith.constant 0 : index
    %c256 = arith.constant 256 : index
    %18 = vector.load %arg7[%c0_12, %c256] : memref<64x1152xbf16, #tpu.memory_space<vmem>>, vector<64x128xbf16>
    tpu.vector_store %arg7[%c0_12, %c256], %17 {strides = array<i32>} : memref<64x1152xbf16, #tpu.memory_space<vmem>>, vector<64x128xbf16>,
    %c0_i32_13 = arith.constant 0 : i32
    %19 = arith.addi %0, %c0_i32_13 : i32
    %c2 = arith.constant 2 : index
    %20 = arith.index_cast %19 : i32 to index
    %c0_14 = arith.constant 0 : index
    %c0_15 = arith.constant 0 : index
    %21 = vector.load %arg3[%c2, %20, %c0_14, %c0_15] : memref<4x9x9x128xbf16, #tpu.memory_space<vmem>>, vector<1x8x8x128xbf16>
    %22 = vector.shape_cast %21 : vector<1x8x8x128xbf16> to vector<8x8x128xbf16>
    %23 = vector.shape_cast %22 : vector<8x8x128xbf16> to vector<64x128xbf16>
    %c0_16 = arith.constant 0 : index
    %c384 = arith.constant 384 : index
    %24 = vector.load %arg7[%c0_16, %c384] : memref<64x1152xbf16, #tpu.memory_space<vmem>>, vector<64x128xbf16>
    tpu.vector_store %arg7[%c0_16, %c384], %23 {strides = array<i32>} : memref<64x1152xbf16, #tpu.memory_space<vmem>>, vector<64x128xbf16>,
    %c0_i32_17 = arith.constant 0 : i32
    %25 = arith.addi %0, %c0_i32_17 : i32
    %c3 = arith.constant 3 : index
    %26 = arith.index_cast %25 : i32 to index
    %c0_18 = arith.constant 0 : index
    %c0_19 = arith.constant 0 : index
    %27 = vector.load %arg3[%c3, %26, %c0_18, %c0_19] : memref<4x9x9x128xbf16, #tpu.memory_space<vmem>>, vector<1x8x8x128xbf16>
    %28 = vector.shape_cast %27 : vector<1x8x8x128xbf16> to vector<8x8x128xbf16>
    %29 = vector.shape_cast %28 : vector<8x8x128xbf16> to vector<64x128xbf16>
    %c0_20 = arith.constant 0 : index
    %c512 = arith.constant 512 : index
    %30 = vector.load %arg7[%c0_20, %c512] : memref<64x1152xbf16, #tpu.memory_space<vmem>>, vector<64x128xbf16>
    tpu.vector_store %arg7[%c0_20, %c512], %29 {strides = array<i32>} : memref<64x1152xbf16, #tpu.memory_space<vmem>>, vector<64x128xbf16>,
    %c0_i32_21 = arith.constant 0 : i32
    %31 = arith.addi %0, %c0_i32_21 : i32
    %c2_22 = arith.constant 2 : index
    %32 = arith.index_cast %31 : i32 to index
    %c1_23 = arith.constant 1 : index
    %c0_24 = arith.constant 0 : index
    %33 = vector.load %arg3[%c2_22, %32, %c1_23, %c0_24] : memref<4x9x9x128xbf16, #tpu.memory_space<vmem>>, vector<1x8x8x128xbf16>
    %34 = vector.shape_cast %33 : vector<1x8x8x128xbf16> to vector<8x8x128xbf16>
    %35 = vector.shape_cast %34 : vector<8x8x128xbf16> to vector<64x128xbf16>
    %c0_25 = arith.constant 0 : index
    %c640 = arith.constant 640 : index
    %36 = vector.load %arg7[%c0_25, %c640] : memref<64x1152xbf16, #tpu.memory_space<vmem>>, vector<64x128xbf16>
    tpu.vector_store %arg7[%c0_25, %c640], %35 {strides = array<i32>} : memref<64x1152xbf16, #tpu.memory_space<vmem>>, vector<64x128xbf16>,
    %c1_i32 = arith.constant 1 : i32
    %37 = arith.addi %0, %c1_i32 : i32
    %c0_26 = arith.constant 0 : index
    %38 = arith.index_cast %37 : i32 to index
    %c0_27 = arith.constant 0 : index
    %c0_28 = arith.constant 0 : index
    %39 = vector.load %arg3[%c0_26, %38, %c0_27, %c0_28] : memref<4x9x9x128xbf16, #tpu.memory_space<vmem>>, vector<1x8x8x128xbf16>
    %40 = vector.shape_cast %39 : vector<1x8x8x128xbf16> to vector<8x8x128xbf16>
    %41 = vector.shape_cast %40 : vector<8x8x128xbf16> to vector<64x128xbf16>
    %c0_29 = arith.constant 0 : index
    %c768 = arith.constant 768 : index
    %42 = vector.load %arg7[%c0_29, %c768] : memref<64x1152xbf16, #tpu.memory_space<vmem>>, vector<64x128xbf16>
    tpu.vector_store %arg7[%c0_29, %c768], %41 {strides = array<i32>} : memref<64x1152xbf16, #tpu.memory_space<vmem>>, vector<64x128xbf16>,
    %c1_i32_30 = arith.constant 1 : i32
    %43 = arith.addi %0, %c1_i32_30 : i32
    %c1_31 = arith.constant 1 : index
    %44 = arith.index_cast %43 : i32 to index
    %c0_32 = arith.constant 0 : index
    %c0_33 = arith.constant 0 : index
    %45 = vector.load %arg3[%c1_31, %44, %c0_32, %c0_33] : memref<4x9x9x128xbf16, #tpu.memory_space<vmem>>, vector<1x8x8x128xbf16>
    %46 = vector.shape_cast %45 : vector<1x8x8x128xbf16> to vector<8x8x128xbf16>
    %47 = vector.shape_cast %46 : vector<8x8x128xbf16> to vector<64x128xbf16>
    %c0_34 = arith.constant 0 : index
    %c896 = arith.constant 896 : index
    %48 = vector.load %arg7[%c0_34, %c896] : memref<64x1152xbf16, #tpu.memory_space<vmem>>, vector<64x128xbf16>
    tpu.vector_store %arg7[%c0_34, %c896], %47 {strides = array<i32>} : memref<64x1152xbf16, #tpu.memory_space<vmem>>, vector<64x128xbf16>,
    %c1_i32_35 = arith.constant 1 : i32
    %49 = arith.addi %0, %c1_i32_35 : i32
    %c0_36 = arith.constant 0 : index
    %50 = arith.index_cast %49 : i32 to index
    %c1_37 = arith.constant 1 : index
    %c0_38 = arith.constant 0 : index
    %51 = vector.load %arg3[%c0_36, %50, %c1_37, %c0_38] : memref<4x9x9x128xbf16, #tpu.memory_space<vmem>>, vector<1x8x8x128xbf16>
    %52 = vector.shape_cast %51 : vector<1x8x8x128xbf16> to vector<8x8x128xbf16>
    %53 = vector.shape_cast %52 : vector<8x8x128xbf16> to vector<64x128xbf16>
    %c0_39 = arith.constant 0 : index
    %c1024 = arith.constant 1024 : index
    %54 = vector.load %arg7[%c0_39, %c1024] : memref<64x1152xbf16, #tpu.memory_space<vmem>>, vector<64x128xbf16>
    tpu.vector_store %arg7[%c0_39, %c1024], %53 {strides = array<i32>} : memref<64x1152xbf16, #tpu.memory_space<vmem>>, vector<64x128xbf16>,
    %c0_40 = arith.constant 0 : index
    %c0_41 = arith.constant 0 : index
    %55 = vector.load %arg7[%c0_40, %c0_41] : memref<64x1152xbf16, #tpu.memory_space<vmem>>, vector<64x1152xbf16>
    %c0_42 = arith.constant 0 : index
    %c0_43 = arith.constant 0 : index
    %56 = vector.load %arg4[%c0_42, %c0_43] : memref<1152x128xbf16, #tpu.memory_space<vmem>>, vector<1152x128xbf16>
    %cst = arith.constant dense<0.000000e+00> : vector<64x128xf32>
    %57 = tpu.matmul %55, %56, %cst {dimension_numbers = #tpu.dot_dimension_numbers<[1], [0], [0], [1], [0, 0, 1, 1], [], []>} : vector<64x1152xbf16>, vector<1152x128xbf16>, vector<64x128xf32> -> vector<64x128xf32>
    %c0_44 = arith.constant 0 : index
    %c0_45 = arith.constant 0 : index
    %58 = vector.load %arg5[%c0_44, %c0_45] : memref<1x128xf32, #tpu.memory_space<vmem>>, vector<1x128xf32>
    %59 = vector.broadcast %58 : vector<1x128xf32> to vector<64x128xf32>
    %60 = arith.addf %57, %59 : vector<64x128xf32>
    %cst_46 = arith.constant 0.000000e+00 : f32
    %61 = vector.broadcast %cst_46 : f32 to vector<64x128xf32>
    %62 = arith.maximumf %60, %61 : vector<64x128xf32>
    %63 = vector.shape_cast %62 : vector<64x128xf32> to vector<1x8x8x128xf32>
    %64 = arith.truncf %63 : vector<1x8x8x128xf32> to vector<1x8x8x128xbf16>
    %c0_47 = arith.constant 0 : index
    %c0_48 = arith.constant 0 : index
    %c0_49 = arith.constant 0 : index
    %c0_50 = arith.constant 0 : index
    %65 = vector.load %arg6[%c0_47, %c0_48, %c0_49, %c0_50] : memref<1x8x8x128xbf16, #tpu.memory_space<vmem>>, vector<1x8x8x128xbf16>
    tpu.vector_store %arg6[%c0_47, %c0_48, %c0_49, %c0_50], %64 {strides = array<i32>} : memref<1x8x8x128xbf16, #tpu.memory_space<vmem>>, vector<1x8x8x128xbf16>,
    return
  }
  func.func @transform_0(%arg0: i32, %arg1: i32, %arg2: i32) -> (i32, i32, i32, i32) {
    %c0_i32 = arith.constant 0 : i32
    %c0_i32_0 = arith.constant 0 : i32
    %c0_i32_1 = arith.constant 0 : i32
    %c0_i32_2 = arith.constant 0 : i32
    return %arg0, %c0_i32, %c0_i32_0, %c0_i32_1 : i32, i32, i32, i32
  }
  func.func @transform_1(%arg0: i32, %arg1: i32, %arg2: i32) -> (i32, i32) {
    %c0_i32 = arith.constant 0 : i32
    %c0_i32_0 = arith.constant 0 : i32
    return %c0_i32, %arg1 : i32, i32
  }
  func.func @transform_2(%arg0: i32, %arg1: i32, %arg2: i32) -> (i32, i32) {
    %c0_i32 = arith.constant 0 : i32
    %c0_i32_0 = arith.constant 0 : i32
    return %c0_i32, %arg1 : i32, i32
  }
  func.func @transform_3(%arg0: i32, %arg1: i32, %arg2: i32) -> (i32, i32, i32, i32) {
    %c0_i32 = arith.constant 0 : i32
    %c0_i32_0 = arith.constant 0 : i32
    return %arg0, %arg2, %c0_i32, %arg1 : i32, i32, i32, i32
  }
}

module attributes {stable_mosaic.version = 11 : i64} {
  func.func @_matmul_heads_kernel(%arg0: i32, %arg1: memref<128x128xbf16, #tpu.memory_space<vmem>>, %arg2: memref<128x128xbf16, #tpu.memory_space<vmem>>, %arg3: memref<1x128xf32, #tpu.memory_space<vmem>>, %arg4: memref<128x128xbf16, #tpu.memory_space<vmem>>) attributes {dimension_semantics = [#tpu.dimension_semantics<parallel>], iteration_bounds = array<i64: 1>, scalar_prefetch = 0 : i64, scratch_operands = 0 : i64, tpu.core_type = #tpu.core_type<tc>, window_params = [{transform_indices = @transform_0, window_bounds = array<i64: 128, 128>}, {pipeline_mode = #tpu.pipeline_mode<synchronous>, transform_indices = @transform_1, window_bounds = array<i64: 128, 128>}, {pipeline_mode = #tpu.pipeline_mode<synchronous>, transform_indices = @transform_2, window_bounds = array<i64: 1, 128>}, {transform_indices = @transform_3, window_bounds = array<i64: 128, 128>}]} {
    %c0 = arith.constant 0 : index
    %c0_0 = arith.constant 0 : index
    %0 = vector.load %arg1[%c0, %c0_0] : memref<128x128xbf16, #tpu.memory_space<vmem>>, vector<128x128xbf16>
    %c0_1 = arith.constant 0 : index
    %c0_2 = arith.constant 0 : index
    %1 = vector.load %arg2[%c0_1, %c0_2] : memref<128x128xbf16, #tpu.memory_space<vmem>>, vector<128x128xbf16>
    %cst = arith.constant dense<0.000000e+00> : vector<128x128xf32>
    %2 = tpu.matmul %0, %1, %cst {dimension_numbers = #tpu.dot_dimension_numbers<[1], [0], [0], [1], [0, 0, 1, 1], [], []>} : vector<128x128xbf16>, vector<128x128xbf16>, vector<128x128xf32> -> vector<128x128xf32>
    %c0_3 = arith.constant 0 : index
    %c0_4 = arith.constant 0 : index
    %3 = vector.load %arg3[%c0_3, %c0_4] : memref<1x128xf32, #tpu.memory_space<vmem>>, vector<1x128xf32>
    %4 = vector.broadcast %3 : vector<1x128xf32> to vector<128x128xf32>
    %5 = arith.addf %2, %4 : vector<128x128xf32>
    %6 = arith.truncf %5 : vector<128x128xf32> to vector<128x128xbf16>
    %c0_5 = arith.constant 0 : index
    %c0_6 = arith.constant 0 : index
    %7 = vector.load %arg4[%c0_5, %c0_6] : memref<128x128xbf16, #tpu.memory_space<vmem>>, vector<128x128xbf16>
    tpu.vector_store %arg4[%c0_5, %c0_6], %6 {strides = array<i32>} : memref<128x128xbf16, #tpu.memory_space<vmem>>, vector<128x128xbf16>,
    return
  }
  func.func @transform_0(%arg0: i32) -> (i32, i32) {
    %c0_i32 = arith.constant 0 : i32
    %c0_i32_0 = arith.constant 0 : i32
    return %arg0, %c0_i32 : i32, i32
  }
  func.func @transform_1(%arg0: i32) -> (i32, i32) {
    %c0_i32 = arith.constant 0 : i32
    %c0_i32_0 = arith.constant 0 : i32
    %c0_i32_1 = arith.constant 0 : i32
    return %c0_i32, %c0_i32_0 : i32, i32
  }
  func.func @transform_2(%arg0: i32) -> (i32, i32) {
    %c0_i32 = arith.constant 0 : i32
    %c0_i32_0 = arith.constant 0 : i32
    %c0_i32_1 = arith.constant 0 : i32
    return %c0_i32, %c0_i32_0 : i32, i32
  }
  func.func @transform_3(%arg0: i32) -> (i32, i32) {
    %c0_i32 = arith.constant 0 : i32
    %c0_i32_0 = arith.constant 0 : i32
    return %arg0, %c0_i32 : i32, i32
  }
}

module attributes {stable_mosaic.version = 11 : i64} {
  func.func @_matmul_heads_kernel(%arg0: i32, %arg1: memref<128x128xbf16, #tpu.memory_space<vmem>>, %arg2: memref<128x128xbf16, #tpu.memory_space<vmem>>, %arg3: memref<1x128xf32, #tpu.memory_space<vmem>>, %arg4: memref<128x128xbf16, #tpu.memory_space<vmem>>, %arg5: memref<128x128xbf16, #tpu.memory_space<vmem>>) attributes {dimension_semantics = [#tpu.dimension_semantics<parallel>], iteration_bounds = array<i64: 1>, scalar_prefetch = 0 : i64, scratch_operands = 0 : i64, tpu.core_type = #tpu.core_type<tc>, window_params = [{transform_indices = @transform_0, window_bounds = array<i64: 128, 128>}, {pipeline_mode = #tpu.pipeline_mode<synchronous>, transform_indices = @transform_1, window_bounds = array<i64: 128, 128>}, {pipeline_mode = #tpu.pipeline_mode<synchronous>, transform_indices = @transform_2, window_bounds = array<i64: 1, 128>}, {transform_indices = @transform_3, window_bounds = array<i64: 128, 128>}, {transform_indices = @transform_4, window_bounds = array<i64: 128, 128>}]} {
    %c0 = arith.constant 0 : index
    %c0_0 = arith.constant 0 : index
    %0 = vector.load %arg1[%c0, %c0_0] : memref<128x128xbf16, #tpu.memory_space<vmem>>, vector<128x128xbf16>
    %c0_1 = arith.constant 0 : index
    %c0_2 = arith.constant 0 : index
    %1 = vector.load %arg2[%c0_1, %c0_2] : memref<128x128xbf16, #tpu.memory_space<vmem>>, vector<128x128xbf16>
    %cst = arith.constant dense<0.000000e+00> : vector<128x128xf32>
    %2 = tpu.matmul %0, %1, %cst {dimension_numbers = #tpu.dot_dimension_numbers<[1], [0], [0], [1], [0, 0, 1, 1], [], []>} : vector<128x128xbf16>, vector<128x128xbf16>, vector<128x128xf32> -> vector<128x128xf32>
    %c0_3 = arith.constant 0 : index
    %c0_4 = arith.constant 0 : index
    %3 = vector.load %arg3[%c0_3, %c0_4] : memref<1x128xf32, #tpu.memory_space<vmem>>, vector<1x128xf32>
    %4 = vector.broadcast %3 : vector<1x128xf32> to vector<128x128xf32>
    %5 = arith.addf %2, %4 : vector<128x128xf32>
    %c0_5 = arith.constant 0 : index
    %c0_6 = arith.constant 0 : index
    %6 = vector.load %arg4[%c0_5, %c0_6] : memref<128x128xbf16, #tpu.memory_space<vmem>>, vector<128x128xbf16>
    %7 = arith.extf %6 : vector<128x128xbf16> to vector<128x128xf32>
    %8 = arith.addf %5, %7 : vector<128x128xf32>
    %cst_7 = arith.constant 0.000000e+00 : f32
    %9 = vector.broadcast %cst_7 : f32 to vector<128x128xf32>
    %10 = arith.maximumf %8, %9 : vector<128x128xf32>
    %11 = arith.truncf %10 : vector<128x128xf32> to vector<128x128xbf16>
    %c0_8 = arith.constant 0 : index
    %c0_9 = arith.constant 0 : index
    %12 = vector.load %arg5[%c0_8, %c0_9] : memref<128x128xbf16, #tpu.memory_space<vmem>>, vector<128x128xbf16>
    tpu.vector_store %arg5[%c0_8, %c0_9], %11 {strides = array<i32>} : memref<128x128xbf16, #tpu.memory_space<vmem>>, vector<128x128xbf16>,
    return
  }
  func.func @transform_0(%arg0: i32) -> (i32, i32) {
    %c0_i32 = arith.constant 0 : i32
    %c0_i32_0 = arith.constant 0 : i32
    return %arg0, %c0_i32 : i32, i32
  }
  func.func @transform_1(%arg0: i32) -> (i32, i32) {
    %c0_i32 = arith.constant 0 : i32
    %c0_i32_0 = arith.constant 0 : i32
    %c0_i32_1 = arith.constant 0 : i32
    return %c0_i32, %c0_i32_0 : i32, i32
  }
  func.func @transform_2(%arg0: i32) -> (i32, i32) {
    %c0_i32 = arith.constant 0 : i32
    %c0_i32_0 = arith.constant 0 : i32
    %c0_i32_1 = arith.constant 0 : i32
    return %c0_i32, %c0_i32_0 : i32, i32
  }
  func.func @transform_3(%arg0: i32) -> (i32, i32) {
    %c0_i32 = arith.constant 0 : i32
    %c0_i32_0 = arith.constant 0 : i32
    return %arg0, %c0_i32 : i32, i32
  }
  func.func @transform_4(%arg0: i32) -> (i32, i32) {
    %c0_i32 = arith.constant 0 : i32
    %c0_i32_0 = arith.constant 0 : i32
    return %arg0, %c0_i32 : i32, i32
  }
}

module attributes {stable_mosaic.version = 11 : i64} {
  func.func @_matmul_heads_kernel(%arg0: i32, %arg1: memref<128x128xbf16, #tpu.memory_space<vmem>>, %arg2: memref<128x128xbf16, #tpu.memory_space<vmem>>, %arg3: memref<1x128xf32, #tpu.memory_space<vmem>>, %arg4: memref<128x128xbf16, #tpu.memory_space<vmem>>) attributes {dimension_semantics = [#tpu.dimension_semantics<parallel>], iteration_bounds = array<i64: 1>, scalar_prefetch = 0 : i64, scratch_operands = 0 : i64, tpu.core_type = #tpu.core_type<tc>, window_params = [{transform_indices = @transform_0, window_bounds = array<i64: 128, 128>}, {pipeline_mode = #tpu.pipeline_mode<synchronous>, transform_indices = @transform_1, window_bounds = array<i64: 128, 128>}, {pipeline_mode = #tpu.pipeline_mode<synchronous>, transform_indices = @transform_2, window_bounds = array<i64: 1, 128>}, {transform_indices = @transform_3, window_bounds = array<i64: 128, 128>}]} {
    %c0 = arith.constant 0 : index
    %c0_0 = arith.constant 0 : index
    %0 = vector.load %arg1[%c0, %c0_0] : memref<128x128xbf16, #tpu.memory_space<vmem>>, vector<128x128xbf16>
    %c0_1 = arith.constant 0 : index
    %c0_2 = arith.constant 0 : index
    %1 = vector.load %arg2[%c0_1, %c0_2] : memref<128x128xbf16, #tpu.memory_space<vmem>>, vector<128x128xbf16>
    %cst = arith.constant dense<0.000000e+00> : vector<128x128xf32>
    %2 = tpu.matmul %0, %1, %cst {dimension_numbers = #tpu.dot_dimension_numbers<[1], [0], [0], [1], [0, 0, 1, 1], [], []>} : vector<128x128xbf16>, vector<128x128xbf16>, vector<128x128xf32> -> vector<128x128xf32>
    %c0_3 = arith.constant 0 : index
    %c0_4 = arith.constant 0 : index
    %3 = vector.load %arg3[%c0_3, %c0_4] : memref<1x128xf32, #tpu.memory_space<vmem>>, vector<1x128xf32>
    %4 = vector.broadcast %3 : vector<1x128xf32> to vector<128x128xf32>
    %5 = arith.addf %2, %4 : vector<128x128xf32>
    %cst_5 = arith.constant 0.000000e+00 : f32
    %6 = vector.broadcast %cst_5 : f32 to vector<128x128xf32>
    %7 = arith.maximumf %5, %6 : vector<128x128xf32>
    %8 = arith.truncf %7 : vector<128x128xf32> to vector<128x128xbf16>
    %c0_6 = arith.constant 0 : index
    %c0_7 = arith.constant 0 : index
    %9 = vector.load %arg4[%c0_6, %c0_7] : memref<128x128xbf16, #tpu.memory_space<vmem>>, vector<128x128xbf16>
    tpu.vector_store %arg4[%c0_6, %c0_7], %8 {strides = array<i32>} : memref<128x128xbf16, #tpu.memory_space<vmem>>, vector<128x128xbf16>,
    return
  }
  func.func @transform_0(%arg0: i32) -> (i32, i32) {
    %c0_i32 = arith.constant 0 : i32
    %c0_i32_0 = arith.constant 0 : i32
    return %arg0, %c0_i32 : i32, i32
  }
  func.func @transform_1(%arg0: i32) -> (i32, i32) {
    %c0_i32 = arith.constant 0 : i32
    %c0_i32_0 = arith.constant 0 : i32
    %c0_i32_1 = arith.constant 0 : i32
    return %c0_i32, %c0_i32_0 : i32, i32
  }
  func.func @transform_2(%arg0: i32) -> (i32, i32) {
    %c0_i32 = arith.constant 0 : i32
    %c0_i32_0 = arith.constant 0 : i32
    %c0_i32_1 = arith.constant 0 : i32
    return %c0_i32, %c0_i32_0 : i32, i32
  }
  func.func @transform_3(%arg0: i32) -> (i32, i32) {
    %c0_i32 = arith.constant 0 : i32
    %c0_i32_0 = arith.constant 0 : i32
    return %arg0, %c0_i32 : i32, i32
  }
}

module attributes {stable_mosaic.version = 11 : i64} {
  func.func @_matmul_heads_kernel(%arg0: i32, %arg1: memref<128x128xbf16, #tpu.memory_space<vmem>>, %arg2: memref<128x128xbf16, #tpu.memory_space<vmem>>, %arg3: memref<1x128xf32, #tpu.memory_space<vmem>>, %arg4: memref<128x128xbf16, #tpu.memory_space<vmem>>, %arg5: memref<128x128xf32, #tpu.memory_space<vmem>>) attributes {dimension_semantics = [#tpu.dimension_semantics<parallel>], iteration_bounds = array<i64: 1>, scalar_prefetch = 0 : i64, scratch_operands = 0 : i64, tpu.core_type = #tpu.core_type<tc>, window_params = [{transform_indices = @transform_0, window_bounds = array<i64: 128, 128>}, {pipeline_mode = #tpu.pipeline_mode<synchronous>, transform_indices = @transform_1, window_bounds = array<i64: 128, 128>}, {pipeline_mode = #tpu.pipeline_mode<synchronous>, transform_indices = @transform_2, window_bounds = array<i64: 1, 128>}, {transform_indices = @transform_3, window_bounds = array<i64: 128, 128>}, {transform_indices = @transform_4, window_bounds = array<i64: 128, 128>}]} {
    %c0 = arith.constant 0 : index
    %c0_0 = arith.constant 0 : index
    %0 = vector.load %arg1[%c0, %c0_0] : memref<128x128xbf16, #tpu.memory_space<vmem>>, vector<128x128xbf16>
    %c0_1 = arith.constant 0 : index
    %c0_2 = arith.constant 0 : index
    %1 = vector.load %arg2[%c0_1, %c0_2] : memref<128x128xbf16, #tpu.memory_space<vmem>>, vector<128x128xbf16>
    %cst = arith.constant dense<0.000000e+00> : vector<128x128xf32>
    %2 = tpu.matmul %0, %1, %cst {dimension_numbers = #tpu.dot_dimension_numbers<[1], [0], [0], [1], [0, 0, 1, 1], [], []>} : vector<128x128xbf16>, vector<128x128xbf16>, vector<128x128xf32> -> vector<128x128xf32>
    %c0_3 = arith.constant 0 : index
    %c0_4 = arith.constant 0 : index
    %3 = vector.load %arg3[%c0_3, %c0_4] : memref<1x128xf32, #tpu.memory_space<vmem>>, vector<1x128xf32>
    %4 = vector.broadcast %3 : vector<1x128xf32> to vector<128x128xf32>
    %5 = arith.addf %2, %4 : vector<128x128xf32>
    %c0_5 = arith.constant 0 : index
    %c0_6 = arith.constant 0 : index
    %6 = vector.load %arg4[%c0_5, %c0_6] : memref<128x128xbf16, #tpu.memory_space<vmem>>, vector<128x128xbf16>
    %7 = arith.extf %6 : vector<128x128xbf16> to vector<128x128xf32>
    %8 = arith.addf %5, %7 : vector<128x128xf32>
    %cst_7 = arith.constant 0.000000e+00 : f32
    %9 = vector.broadcast %cst_7 : f32 to vector<128x128xf32>
    %10 = arith.maximumf %8, %9 : vector<128x128xf32>
    %c0_8 = arith.constant 0 : index
    %c0_9 = arith.constant 0 : index
    %11 = vector.load %arg5[%c0_8, %c0_9] : memref<128x128xf32, #tpu.memory_space<vmem>>, vector<128x128xf32>
    tpu.vector_store %arg5[%c0_8, %c0_9], %10 {strides = array<i32>} : memref<128x128xf32, #tpu.memory_space<vmem>>, vector<128x128xf32>,
    return
  }
  func.func @transform_0(%arg0: i32) -> (i32, i32) {
    %c0_i32 = arith.constant 0 : i32
    %c0_i32_0 = arith.constant 0 : i32
    return %arg0, %c0_i32 : i32, i32
  }
  func.func @transform_1(%arg0: i32) -> (i32, i32) {
    %c0_i32 = arith.constant 0 : i32
    %c0_i32_0 = arith.constant 0 : i32
    %c0_i32_1 = arith.constant 0 : i32
    return %c0_i32, %c0_i32_0 : i32, i32
  }
  func.func @transform_2(%arg0: i32) -> (i32, i32) {
    %c0_i32 = arith.constant 0 : i32
    %c0_i32_0 = arith.constant 0 : i32
    %c0_i32_1 = arith.constant 0 : i32
    return %c0_i32, %c0_i32_0 : i32, i32
  }
  func.func @transform_3(%arg0: i32) -> (i32, i32) {
    %c0_i32 = arith.constant 0 : i32
    %c0_i32_0 = arith.constant 0 : i32
    return %arg0, %c0_i32 : i32, i32
  }
  func.func @transform_4(%arg0: i32) -> (i32, i32) {
    %c0_i32 = arith.constant 0 : i32
    %c0_i32_0 = arith.constant 0 : i32
    return %arg0, %c0_i32 : i32, i32
  }
}

module attributes {stable_mosaic.version = 11 : i64} {
  func.func @_conv3x3_kernel(%arg0: i32, %arg1: i32, %arg2: i32, %arg3: memref<1x10x10x128xbf16, #tpu.memory_space<vmem>>, %arg4: memref<1152x128xbf16, #tpu.memory_space<vmem>>, %arg5: memref<1x128xf32, #tpu.memory_space<vmem>>, %arg6: memref<1x8x8x128xbf16, #tpu.memory_space<vmem>>, %arg7: memref<64x1152xbf16, #tpu.memory_space<vmem>>) attributes {dimension_semantics = [#tpu.dimension_semantics<parallel>, #tpu.dimension_semantics<parallel>, #tpu.dimension_semantics<parallel>], iteration_bounds = array<i64: 2, 1, 1>, scalar_prefetch = 0 : i64, scratch_operands = 1 : i64, tpu.core_type = #tpu.core_type<tc>, window_params = [{transform_indices = @transform_0, window_bounds = array<i64: 1, 10, 10, 128>}, {transform_indices = @transform_1, window_bounds = array<i64: 1152, 128>}, {transform_indices = @transform_2, window_bounds = array<i64: 1, 128>}, {transform_indices = @transform_3, window_bounds = array<i64: 1, 8, 8, 128>}]} {
    %c8_i32 = arith.constant 8 : i32
    %0 = arith.muli %arg2, %c8_i32 : i32
    %c0_i32 = arith.constant 0 : i32
    %1 = arith.addi %0, %c0_i32 : i32
    %c0 = arith.constant 0 : index
    %2 = arith.index_cast %1 : i32 to index
    %c0_0 = arith.constant 0 : index
    %c0_1 = arith.constant 0 : index
    %3 = vector.load %arg3[%c0, %2, %c0_0, %c0_1] : memref<1x10x10x128xbf16, #tpu.memory_space<vmem>>, vector<1x8x8x128xbf16>
    %4 = vector.shape_cast %3 : vector<1x8x8x128xbf16> to vector<8x8x128xbf16>
    %5 = vector.shape_cast %4 : vector<8x8x128xbf16> to vector<64x128xbf16>
    %c0_2 = arith.constant 0 : index
    %c0_3 = arith.constant 0 : index
    %6 = vector.load %arg7[%c0_2, %c0_3] : memref<64x1152xbf16, #tpu.memory_space<vmem>>, vector<64x128xbf16>
    tpu.vector_store %arg7[%c0_2, %c0_3], %5 {strides = array<i32>} : memref<64x1152xbf16, #tpu.memory_space<vmem>>, vector<64x128xbf16>,
    %c0_i32_4 = arith.constant 0 : i32
    %7 = arith.addi %0, %c0_i32_4 : i32
    %c0_5 = arith.constant 0 : index
    %8 = arith.index_cast %7 : i32 to index
    %c1 = arith.constant 1 : index
    %c0_6 = arith.constant 0 : index
    %9 = vector.load %arg3[%c0_5, %8, %c1, %c0_6] : memref<1x10x10x128xbf16, #tpu.memory_space<vmem>>, vector<1x8x8x128xbf16>
    %10 = vector.shape_cast %9 : vector<1x8x8x128xbf16> to vector<8x8x128xbf16>
    %11 = vector.shape_cast %10 : vector<8x8x128xbf16> to vector<64x128xbf16>
    %c0_7 = arith.constant 0 : index
    %c128 = arith.constant 128 : index
    %12 = vector.load %arg7[%c0_7, %c128] : memref<64x1152xbf16, #tpu.memory_space<vmem>>, vector<64x128xbf16>
    tpu.vector_store %arg7[%c0_7, %c128], %11 {strides = array<i32>} : memref<64x1152xbf16, #tpu.memory_space<vmem>>, vector<64x128xbf16>,
    %c0_i32_8 = arith.constant 0 : i32
    %13 = arith.addi %0, %c0_i32_8 : i32
    %c0_9 = arith.constant 0 : index
    %14 = arith.index_cast %13 : i32 to index
    %c2 = arith.constant 2 : index
    %c0_10 = arith.constant 0 : index
    %15 = vector.load %arg3[%c0_9, %14, %c2, %c0_10] : memref<1x10x10x128xbf16, #tpu.memory_space<vmem>>, vector<1x8x8x128xbf16>
    %16 = vector.shape_cast %15 : vector<1x8x8x128xbf16> to vector<8x8x128xbf16>
    %17 = vector.shape_cast %16 : vector<8x8x128xbf16> to vector<64x128xbf16>
    %c0_11 = arith.constant 0 : index
    %c256 = arith.constant 256 : index
    %18 = vector.load %arg7[%c0_11, %c256] : memref<64x1152xbf16, #tpu.memory_space<vmem>>, vector<64x128xbf16>
    tpu.vector_store %arg7[%c0_11, %c256], %17 {strides = array<i32>} : memref<64x1152xbf16, #tpu.memory_space<vmem>>, vector<64x128xbf16>,
    %c1_i32 = arith.constant 1 : i32
    %19 = arith.addi %0, %c1_i32 : i32
    %c0_12 = arith.constant 0 : index
    %20 = arith.index_cast %19 : i32 to index
    %c0_13 = arith.constant 0 : index
    %c0_14 = arith.constant 0 : index
    %21 = vector.load %arg3[%c0_12, %20, %c0_13, %c0_14] : memref<1x10x10x128xbf16, #tpu.memory_space<vmem>>, vector<1x8x8x128xbf16>
    %22 = vector.shape_cast %21 : vector<1x8x8x128xbf16> to vector<8x8x128xbf16>
    %23 = vector.shape_cast %22 : vector<8x8x128xbf16> to vector<64x128xbf16>
    %c0_15 = arith.constant 0 : index
    %c384 = arith.constant 384 : index
    %24 = vector.load %arg7[%c0_15, %c384] : memref<64x1152xbf16, #tpu.memory_space<vmem>>, vector<64x128xbf16>
    tpu.vector_store %arg7[%c0_15, %c384], %23 {strides = array<i32>} : memref<64x1152xbf16, #tpu.memory_space<vmem>>, vector<64x128xbf16>,
    %c1_i32_16 = arith.constant 1 : i32
    %25 = arith.addi %0, %c1_i32_16 : i32
    %c0_17 = arith.constant 0 : index
    %26 = arith.index_cast %25 : i32 to index
    %c1_18 = arith.constant 1 : index
    %c0_19 = arith.constant 0 : index
    %27 = vector.load %arg3[%c0_17, %26, %c1_18, %c0_19] : memref<1x10x10x128xbf16, #tpu.memory_space<vmem>>, vector<1x8x8x128xbf16>
    %28 = vector.shape_cast %27 : vector<1x8x8x128xbf16> to vector<8x8x128xbf16>
    %29 = vector.shape_cast %28 : vector<8x8x128xbf16> to vector<64x128xbf16>
    %c0_20 = arith.constant 0 : index
    %c512 = arith.constant 512 : index
    %30 = vector.load %arg7[%c0_20, %c512] : memref<64x1152xbf16, #tpu.memory_space<vmem>>, vector<64x128xbf16>
    tpu.vector_store %arg7[%c0_20, %c512], %29 {strides = array<i32>} : memref<64x1152xbf16, #tpu.memory_space<vmem>>, vector<64x128xbf16>,
    %c1_i32_21 = arith.constant 1 : i32
    %31 = arith.addi %0, %c1_i32_21 : i32
    %c0_22 = arith.constant 0 : index
    %32 = arith.index_cast %31 : i32 to index
    %c2_23 = arith.constant 2 : index
    %c0_24 = arith.constant 0 : index
    %33 = vector.load %arg3[%c0_22, %32, %c2_23, %c0_24] : memref<1x10x10x128xbf16, #tpu.memory_space<vmem>>, vector<1x8x8x128xbf16>
    %34 = vector.shape_cast %33 : vector<1x8x8x128xbf16> to vector<8x8x128xbf16>
    %35 = vector.shape_cast %34 : vector<8x8x128xbf16> to vector<64x128xbf16>
    %c0_25 = arith.constant 0 : index
    %c640 = arith.constant 640 : index
    %36 = vector.load %arg7[%c0_25, %c640] : memref<64x1152xbf16, #tpu.memory_space<vmem>>, vector<64x128xbf16>
    tpu.vector_store %arg7[%c0_25, %c640], %35 {strides = array<i32>} : memref<64x1152xbf16, #tpu.memory_space<vmem>>, vector<64x128xbf16>,
    %c2_i32 = arith.constant 2 : i32
    %37 = arith.addi %0, %c2_i32 : i32
    %c0_26 = arith.constant 0 : index
    %38 = arith.index_cast %37 : i32 to index
    %c0_27 = arith.constant 0 : index
    %c0_28 = arith.constant 0 : index
    %39 = vector.load %arg3[%c0_26, %38, %c0_27, %c0_28] : memref<1x10x10x128xbf16, #tpu.memory_space<vmem>>, vector<1x8x8x128xbf16>
    %40 = vector.shape_cast %39 : vector<1x8x8x128xbf16> to vector<8x8x128xbf16>
    %41 = vector.shape_cast %40 : vector<8x8x128xbf16> to vector<64x128xbf16>
    %c0_29 = arith.constant 0 : index
    %c768 = arith.constant 768 : index
    %42 = vector.load %arg7[%c0_29, %c768] : memref<64x1152xbf16, #tpu.memory_space<vmem>>, vector<64x128xbf16>
    tpu.vector_store %arg7[%c0_29, %c768], %41 {strides = array<i32>} : memref<64x1152xbf16, #tpu.memory_space<vmem>>, vector<64x128xbf16>,
    %c2_i32_30 = arith.constant 2 : i32
    %43 = arith.addi %0, %c2_i32_30 : i32
    %c0_31 = arith.constant 0 : index
    %44 = arith.index_cast %43 : i32 to index
    %c1_32 = arith.constant 1 : index
    %c0_33 = arith.constant 0 : index
    %45 = vector.load %arg3[%c0_31, %44, %c1_32, %c0_33] : memref<1x10x10x128xbf16, #tpu.memory_space<vmem>>, vector<1x8x8x128xbf16>
    %46 = vector.shape_cast %45 : vector<1x8x8x128xbf16> to vector<8x8x128xbf16>
    %47 = vector.shape_cast %46 : vector<8x8x128xbf16> to vector<64x128xbf16>
    %c0_34 = arith.constant 0 : index
    %c896 = arith.constant 896 : index
    %48 = vector.load %arg7[%c0_34, %c896] : memref<64x1152xbf16, #tpu.memory_space<vmem>>, vector<64x128xbf16>
    tpu.vector_store %arg7[%c0_34, %c896], %47 {strides = array<i32>} : memref<64x1152xbf16, #tpu.memory_space<vmem>>, vector<64x128xbf16>,
    %c2_i32_35 = arith.constant 2 : i32
    %49 = arith.addi %0, %c2_i32_35 : i32
    %c0_36 = arith.constant 0 : index
    %50 = arith.index_cast %49 : i32 to index
    %c2_37 = arith.constant 2 : index
    %c0_38 = arith.constant 0 : index
    %51 = vector.load %arg3[%c0_36, %50, %c2_37, %c0_38] : memref<1x10x10x128xbf16, #tpu.memory_space<vmem>>, vector<1x8x8x128xbf16>
    %52 = vector.shape_cast %51 : vector<1x8x8x128xbf16> to vector<8x8x128xbf16>
    %53 = vector.shape_cast %52 : vector<8x8x128xbf16> to vector<64x128xbf16>
    %c0_39 = arith.constant 0 : index
    %c1024 = arith.constant 1024 : index
    %54 = vector.load %arg7[%c0_39, %c1024] : memref<64x1152xbf16, #tpu.memory_space<vmem>>, vector<64x128xbf16>
    tpu.vector_store %arg7[%c0_39, %c1024], %53 {strides = array<i32>} : memref<64x1152xbf16, #tpu.memory_space<vmem>>, vector<64x128xbf16>,
    %c0_40 = arith.constant 0 : index
    %c0_41 = arith.constant 0 : index
    %55 = vector.load %arg7[%c0_40, %c0_41] : memref<64x1152xbf16, #tpu.memory_space<vmem>>, vector<64x1152xbf16>
    %c0_42 = arith.constant 0 : index
    %c0_43 = arith.constant 0 : index
    %56 = vector.load %arg4[%c0_42, %c0_43] : memref<1152x128xbf16, #tpu.memory_space<vmem>>, vector<1152x128xbf16>
    %cst = arith.constant dense<0.000000e+00> : vector<64x128xf32>
    %57 = tpu.matmul %55, %56, %cst {dimension_numbers = #tpu.dot_dimension_numbers<[1], [0], [0], [1], [0, 0, 1, 1], [], []>} : vector<64x1152xbf16>, vector<1152x128xbf16>, vector<64x128xf32> -> vector<64x128xf32>
    %c0_44 = arith.constant 0 : index
    %c0_45 = arith.constant 0 : index
    %58 = vector.load %arg5[%c0_44, %c0_45] : memref<1x128xf32, #tpu.memory_space<vmem>>, vector<1x128xf32>
    %59 = vector.broadcast %58 : vector<1x128xf32> to vector<64x128xf32>
    %60 = arith.addf %57, %59 : vector<64x128xf32>
    %cst_46 = arith.constant 0.000000e+00 : f32
    %61 = vector.broadcast %cst_46 : f32 to vector<64x128xf32>
    %62 = arith.maximumf %60, %61 : vector<64x128xf32>
    %63 = vector.shape_cast %62 : vector<64x128xf32> to vector<1x8x8x128xf32>
    %64 = arith.truncf %63 : vector<1x8x8x128xf32> to vector<1x8x8x128xbf16>
    %c0_47 = arith.constant 0 : index
    %c0_48 = arith.constant 0 : index
    %c0_49 = arith.constant 0 : index
    %c0_50 = arith.constant 0 : index
    %65 = vector.load %arg6[%c0_47, %c0_48, %c0_49, %c0_50] : memref<1x8x8x128xbf16, #tpu.memory_space<vmem>>, vector<1x8x8x128xbf16>
    tpu.vector_store %arg6[%c0_47, %c0_48, %c0_49, %c0_50], %64 {strides = array<i32>} : memref<1x8x8x128xbf16, #tpu.memory_space<vmem>>, vector<1x8x8x128xbf16>,
    return
  }
  func.func @transform_0(%arg0: i32, %arg1: i32, %arg2: i32) -> (i32, i32, i32, i32) {
    %c0_i32 = arith.constant 0 : i32
    %c0_i32_0 = arith.constant 0 : i32
    %c0_i32_1 = arith.constant 0 : i32
    %c0_i32_2 = arith.constant 0 : i32
    return %arg0, %c0_i32, %c0_i32_0, %c0_i32_1 : i32, i32, i32, i32
  }
  func.func @transform_1(%arg0: i32, %arg1: i32, %arg2: i32) -> (i32, i32) {
    %c0_i32 = arith.constant 0 : i32
    %c0_i32_0 = arith.constant 0 : i32
    return %c0_i32, %arg1 : i32, i32
  }
  func.func @transform_2(%arg0: i32, %arg1: i32, %arg2: i32) -> (i32, i32) {
    %c0_i32 = arith.constant 0 : i32
    %c0_i32_0 = arith.constant 0 : i32
    return %c0_i32, %arg1 : i32, i32
  }
  func.func @transform_3(%arg0: i32, %arg1: i32, %arg2: i32) -> (i32, i32, i32, i32) {
    %c0_i32 = arith.constant 0 : i32
    %c0_i32_0 = arith.constant 0 : i32
    return %arg0, %arg2, %c0_i32, %arg1 : i32, i32, i32, i32
  }
}

</mosaic_0001>

<bundles_post_ra>
// kernel: resnet_stage_forward.8
= control target key start
LH: loop header
LB: loop body
LE: loop exit
PB: predicated region body
PF: predicated region fallthrough
CT: control target
= control target key end

     0   :  { %s1424_s1 = inlined_call_operand.vmem [shape: bf16[128,128], index: 1, kind: input, shape index: {}]   ;;  %s1425_s2 = inlined_call_operand.vmem [shape: f32[1,128], index: 2, kind: input, shape index: {}]   ;;  %s1426_s0 = inlined_call_operand.vmem [shape: bf16[512,128], index: 0, kind: input, shape index: {}]   ;;  %s1427_s3 = inlined_call_operand.vmem [shape: bf16[512,128], index: 3, kind: output, shape index: {}]  }
   0x1   :  { %v902_v0 = vld [vmem:[%s1424_s1 + $0x38] sm:$0xff]  ;;  %v901_v1 = vld [vmem:[%s1424_s1 + $0x30] sm:$0xff]  ;;  %v900_v2 = vld [vmem:[%s1424_s1 + $0x28] sm:$0xff] }
   0x2   :  { %338 = vmatpush.bf16.msra.mxu0 %v902_v0  ;;  %1094 = vmatpush.bf16.msra.mxu1 %v902_v0  ;;  %v899_v3 = vld [vmem:[%s1424_s1 + $0x20] sm:$0xff]  ;;  %v898_v4 = vld [vmem:[%s1424_s1 + $0x18] sm:$0xff]  ;;  %v897_v5 = vld [vmem:[%s1424_s1 + $0x10] sm:$0xff] }
   0x3   :  { %1095 = vmatpush.bf16.msra.mxu2 %v902_v0  ;;  %1096 = vmatpush.bf16.msra.mxu3 %v902_v0  ;;  %v896_v6 = vld [vmem:[%s1424_s1 + $0x8] sm:$0xff]  ;;  %v895_v7 = vld [vmem:[%s1424_s1] sm:$0xff]  ;;  %v865_v16 = vld [vmem:[%s1426_s0 + $0x10] sm:$0xff] }
   0x4   :  { %v863_v8 = vld [vmem:[%s1426_s0] sm:$0xff]  ;;  %v864_v12 = vld [vmem:[%s1426_s0 + $0x8] sm:$0xff]  ;;  %v873_v17 = vld [vmem:[%s1426_s0 + $0x50] sm:$0xff] }
   0x5   :  { %v871_v9 = vld [vmem:[%s1426_s0 + $0x40] sm:$0xff]  ;;  %v872_v13 = vld [vmem:[%s1426_s0 + $0x48] sm:$0xff]  ;;  %v881_v18 = vld [vmem:[%s1426_s0 + $0x90] sm:$0xff] }
   0x6   :  { %339 = vmatpush.bf16.msra.mxu0 %v901_v1  ;;  %1097 = vmatpush.bf16.msra.mxu1 %v901_v1  ;;  %v879_v10 = vld [vmem:[%s1426_s0 + $0x80] sm:$0xff]  ;;  %v880_v14 = vld [vmem:[%s1426_s0 + $0x88] sm:$0xff]  ;;  %v889_v19 = vld [vmem:[%s1426_s0 + $0xd0] sm:$0xff] }
   0x7   :  { %1098 = vmatpush.bf16.msra.mxu2 %v901_v1  ;;  %1099 = vmatpush.bf16.msra.mxu3 %v901_v1  ;;  %v887_v11 = vld [vmem:[%s1426_s0 + $0xc0] sm:$0xff]  ;;  %v888_v15 = vld [vmem:[%s1426_s0 + $0xc8] sm:$0xff]  ;;  %v866_v20 = vld [vmem:[%s1426_s0 + $0x18] sm:$0xff] }
   0x8   :  { %v874_v21 = vld [vmem:[%s1426_s0 + $0x58] sm:$0xff]  ;;  %v867_v24 = vld [vmem:[%s1426_s0 + $0x20] sm:$0xff]  ;;  %v868_v28 = vld [vmem:[%s1426_s0 + $0x28] sm:$0xff] }
   0x9   :  { %v882_v22 = vld [vmem:[%s1426_s0 + $0x98] sm:$0xff]  ;;  %v875_v25 = vld [vmem:[%s1426_s0 + $0x60] sm:$0xff]  ;;  %v876_v29 = vld [vmem:[%s1426_s0 + $0x68] sm:$0xff] }
   0xa   :  { %340 = vmatpush.bf16.msra.mxu0 %v900_v2  ;;  %1100 = vmatpush.bf16.msra.mxu1 %v900_v2  ;;  %v890_v23 = vld [vmem:[%s1426_s0 + $0xd8] sm:$0xff]  ;;  %v883_v26 = vld [vmem:[%s1426_s0 + $0xa0] sm:$0xff]  ;;  %v884_v30 = vld [vmem:[%s1426_s0 + $0xa8] sm:$0xff] }
   0xb   :  { %1101 = vmatpush.bf16.msra.mxu2 %v900_v2  ;;  %1102 = vmatpush.bf16.msra.mxu3 %v900_v2  ;;  %v891_v27 = vld [vmem:[%s1426_s0 + $0xe0] sm:$0xff]  ;;  %v892_v31 = vld [vmem:[%s1426_s0 + $0xe8] sm:$0xff]  ;;  %v869_v32 = vld [vmem:[%s1426_s0 + $0x30] sm:$0xff] }
   0xc   :  { %v877_v33 = vld [vmem:[%s1426_s0 + $0x70] sm:$0xff]  ;;  %v870_v36 = vld [vmem:[%s1426_s0 + $0x38] sm:$0xff]  ;;  %v1262_v42 = vld [vmem:[%s1425_s2] ss:$0 sm:$0xff] }
   0xd   :  { %v885_v34 = vld [vmem:[%s1426_s0 + $0xb0] sm:$0xff]  ;;  %v878_v37 = vld [vmem:[%s1426_s0 + $0x78] sm:$0xff] }
   0xe   :  { %341 = vmatpush.bf16.msra.mxu0 %v899_v3  ;;  %1103 = vmatpush.bf16.msra.mxu1 %v899_v3  ;;  %v893_v35 = vld [vmem:[%s1426_s0 + $0xf0] sm:$0xff]  ;;  %v886_v38 = vld [vmem:[%s1426_s0 + $0xb8] sm:$0xff] }
   0xf   :  { %1104 = vmatpush.bf16.msra.mxu2 %v899_v3  ;;  %1105 = vmatpush.bf16.msra.mxu3 %v899_v3  ;;  %v894_v39 = vld [vmem:[%s1426_s0 + $0xf8] sm:$0xff] }
  0x12   :  { %342 = vmatpush.bf16.msra.mxu0 %v898_v4  ;;  %1106 = vmatpush.bf16.msra.mxu1 %v898_v4 }
  0x13   :  { %1107 = vmatpush.bf16.msra.mxu2 %v898_v4  ;;  %1108 = vmatpush.bf16.msra.mxu3 %v898_v4 }
  0x16   :  { %343 = vmatpush.bf16.msra.mxu0 %v897_v5  ;;  %1109 = vmatpush.bf16.msra.mxu1 %v897_v5 }
  0x17   :  { %1110 = vmatpush.bf16.msra.mxu2 %v897_v5  ;;  %1111 = vmatpush.bf16.msra.mxu3 %v897_v5 }
  0x1a   :  { %344 = vmatpush.bf16.msra.mxu0 %v896_v6  ;;  %1112 = vmatpush.bf16.msra.mxu1 %v896_v6 }
  0x1b   :  { %1113 = vmatpush.bf16.msra.mxu2 %v896_v6  ;;  %1114 = vmatpush.bf16.msra.mxu3 %v896_v6 }
  0x1e   :  { %345 = vmatpush.bf16.msra.mxu0 %v895_v7  ;;  %1115 = vmatpush.bf16.msra.mxu1 %v895_v7 }
  0x1f   :  { %1116 = vmatpush.bf16.msra.mxu2 %v895_v7  ;;  %1117 = vmatpush.bf16.msra.mxu3 %v895_v7 }
  0x21   :  { %346 = vmatmul.bf16.vlgmr.msra.gmra.mxu0 %v863_v8  ;;  %386 = vmatmul.bf16.vlgmr.msra.gmra.mxu1 %v871_v9 }
  0x22   :  { %426 = vmatmul.bf16.vlgmr.msra.gmra.mxu2 %v879_v10  ;;  %466 = vmatmul.bf16.vlgmr.msra.gmra.mxu3 %v887_v11 }
  0x31   :  { %351 = vmatmul.bf16.gmra.mxu0 %v864_v12  ;;  %391 = vmatmul.bf16.gmra.mxu1 %v872_v13 }
  0x32   :  { %431 = vmatmul.bf16.gmra.mxu2 %v880_v14  ;;  %471 = vmatmul.bf16.gmra.mxu3 %v888_v15 }
  0x41   :  { %356 = vmatmul.bf16.gmra.mxu0 %v865_v16  ;;  %396 = vmatmul.bf16.gmra.mxu1 %v873_v17 }
  0x42   :  { %436 = vmatmul.bf16.gmra.mxu2 %v881_v18  ;;  %476 = vmatmul.bf16.gmra.mxu3 %v889_v19 }
  0x51   :  { %361 = vmatmul.bf16.gmra.mxu0 %v866_v20  ;;  %401 = vmatmul.bf16.gmra.mxu1 %v874_v21 }
  0x52   :  { %441 = vmatmul.bf16.gmra.mxu2 %v882_v22  ;;  %481 = vmatmul.bf16.gmra.mxu3 %v890_v23 }
  0x61   :  { %366 = vmatmul.bf16.gmra.mxu0 %v867_v24  ;;  %406 = vmatmul.bf16.gmra.mxu1 %v875_v25 }
  0x62   :  { %446 = vmatmul.bf16.gmra.mxu2 %v883_v26  ;;  %486 = vmatmul.bf16.gmra.mxu3 %v891_v27 }
  0x71   :  { %371 = vmatmul.bf16.gmra.mxu0 %v868_v28  ;;  %411 = vmatmul.bf16.gmra.mxu1 %v876_v29 }
  0x72   :  { %451 = vmatmul.bf16.gmra.mxu2 %v884_v30  ;;  %491 = vmatmul.bf16.gmra.mxu3 %v892_v31 }
  0x81   :  { %376 = vmatmul.bf16.gmra.mxu0 %v869_v32  ;;  %416 = vmatmul.bf16.gmra.mxu1 %v877_v33 }
  0x82   :  { %456 = vmatmul.bf16.gmra.mxu2 %v885_v34  ;;  %496 = vmatmul.bf16.gmra.mxu3 %v893_v35 }
  0x91   :  { %381 = vmatmul.bf16.gmra.mxu0 %v870_v36  ;;  %421 = vmatmul.bf16.gmra.mxu1 %v878_v37 }
  0x92   :  { %461 = vmatmul.bf16.gmra.mxu2 %v886_v38  ;;  %501 = vmatmul.bf16.gmra.mxu3 %v894_v39 }
  0x9e   :  { %v347_v40 = vpop.f32.mrf.mxu0  ;;  %v387_v41 = vpop.f32.mrf.mxu1 }
  0x9f   :  { %v348_v43 = vadd.f32 %v1262_v42, %v347_v40  ;;  %v388_v44 = vadd.f32 %v1262_v42, %v387_v41 }
  0xa1   :  { %v507_v51 = vmax.f32 %v348_v43, 0.0  ;;  %v523_v52 = vmax.f32 %v388_v44, 0.0 }
  0xa5   :  { %v427_v45 = vpop.f32.mrf.mxu2  ;;  %v467_v46 = vpop.f32.mrf.mxu3 }
  0xa6   :  { %v349_v47 = vpop.f32.mrf.mxu0  ;;  %v389_v48 = vpop.f32.mrf.mxu1  ;;  %v428_v57 = vadd.f32 %v1262_v42, %v427_v45  ;;  %v468_v58 = vadd.f32 %v1262_v42, %v467_v46 }
  0xa7   :  { %v350_v49 = vadd.f32 %v1262_v42, %v349_v47  ;;  %v390_v50 = vadd.f32 %v1262_v42, %v389_v48 }
  0xa8   :  { %v539_v1 = vmax.f32 %v428_v57, 0.0  ;;  %v555_v2 = vmax.f32 %v468_v58, 0.0 }
  0xa9   :  { %v508_v53 = vmax.f32 %v350_v49, 0.0  ;;  %v524_v54 = vmax.f32 %v390_v50, 0.0 }
  0xab   :  { %v906_v55 = vpack.c.bf16 %v508_v53, %v507_v51  ;;  %v946_v56 = vpack.c.bf16 %v524_v54, %v523_v52 }
  0xad   :  { %907 = vst [vmem:[%s1427_s3] sm:$0xff] %v906_v55   ;;  %v429_v59 = vpop.f32.mrf.mxu2  ;;  %v469_v60 = vpop.f32.mrf.mxu3 }
  0xae   :  { %1070 = vst [vmem:[%s1427_s3 + $0x40] sm:$0xff] %v946_v56   ;;  %v430_v61 = vadd.f32 %v1262_v42, %v429_v59  ;;  %v470_v62 = vadd.f32 %v1262_v42, %v469_v60  ;;  %v352_v63 = vpop.f32.mrf.mxu0  ;;  %v392_v0 = vpop.f32.mrf.mxu1 }
  0xaf   :  { %v353_v7 = vadd.f32 %v1262_v42, %v352_v63  ;;  %v393_v8 = vadd.f32 %v1262_v42, %v392_v0 }
  0xb0   :  { %v540_v3 = vmax.f32 %v430_v61, 0.0  ;;  %v556_v4 = vmax.f32 %v470_v62, 0.0 }
  0xb1   :  { %v509_v15 = vmax.f32 %v353_v7, 0.0  ;;  %v525_v16 = vmax.f32 %v393_v8, 0.0 }
  0xb2   :  { %v986_v5 = vpack.c.bf16 %v540_v3, %v539_v1  ;;  %v1026_v6 = vpack.c.bf16 %v556_v4, %v555_v2 }
  0xb4   :  { %1078 = vst [vmem:[%s1427_s3 + $0x80] sm:$0xff] %v986_v5  }
  0xb5   :  { %1086 = vst [vmem:[%s1427_s3 + $0xc0] sm:$0xff] %v1026_v6   ;;  %v432_v9 = vpop.f32.mrf.mxu2  ;;  %v472_v10 = vpop.f32.mrf.mxu3 }
  0xb6   :  { %v354_v11 = vpop.f32.mrf.mxu0  ;;  %v394_v12 = vpop.f32.mrf.mxu1  ;;  %v433_v21 = vadd.f32 %v1262_v42, %v432_v9  ;;  %v473_v22 = vadd.f32 %v1262_v42, %v472_v10 }
  0xb7   :  { %v355_v13 = vadd.f32 %v1262_v42, %v354_v11  ;;  %v395_v14 = vadd.f32 %v1262_v42, %v394_v12 }
  0xb8   :  { %v541_v29 = vmax.f32 %v433_v21, 0.0  ;;  %v557_v30 = vmax.f32 %v473_v22, 0.0 }
  0xb9   :  { %v510_v17 = vmax.f32 %v355_v13, 0.0  ;;  %v526_v18 = vmax.f32 %v395_v14, 0.0 }
  0xbb   :  { %v911_v19 = vpack.c.bf16 %v510_v17, %v509_v15  ;;  %v951_v20 = vpack.c.bf16 %v526_v18, %v525_v16 }
  0xbd   :  { %1063 = vst [vmem:[%s1427_s3 + $0x8] sm:$0xff] %v911_v19   ;;  %v434_v23 = vpop.f32.mrf.mxu2  ;;  %v474_v24 = vpop.f32.mrf.mxu3 }
  0xbe   :  { %1071 = vst [vmem:[%s1427_s3 + $0x48] sm:$0xff] %v951_v20   ;;  %v435_v25 = vadd.f32 %v1262_v42, %v434_v23  ;;  %v475_v26 = vadd.f32 %v1262_v42, %v474_v24  ;;  %v357_v27 = vpop.f32.mrf.mxu0  ;;  %v397_v28 = vpop.f32.mrf.mxu1 }
  0xbf   :  { %v358_v35 = vadd.f32 %v1262_v42, %v357_v27  ;;  %v398_v36 = vadd.f32 %v1262_v42, %v397_v28 }
  0xc0   :  { %v542_v31 = vmax.f32 %v435_v25, 0.0  ;;  %v558_v32 = vmax.f32 %v475_v26, 0.0 }
  0xc1   :  { %v511_v44 = vmax.f32 %v358_v35, 0.0  ;;  %v527_v45 = vmax.f32 %v398_v36, 0.0 }
  0xc2   :  { %v991_v33 = vpack.c.bf16 %v542_v31, %v541_v29  ;;  %v1031_v34 = vpack.c.bf16 %v558_v32, %v557_v30 }
  0xc4   :  { %1079 = vst [vmem:[%s1427_s3 + $0x88] sm:$0xff] %v991_v33  }
  0xc5   :  { %1087 = vst [vmem:[%s1427_s3 + $0xc8] sm:$0xff] %v1031_v34   ;;  %v437_v37 = vpop.f32.mrf.mxu2  ;;  %v477_v38 = vpop.f32.mrf.mxu3 }
  0xc6   :  { %v359_v39 = vpop.f32.mrf.mxu0  ;;  %v399_v40 = vpop.f32.mrf.mxu1  ;;  %v438_v50 = vadd.f32 %v1262_v42, %v437_v37  ;;  %v478_v51 = vadd.f32 %v1262_v42, %v477_v38 }
  0xc7   :  { %v360_v41 = vadd.f32 %v1262_v42, %v359_v39  ;;  %v400_v43 = vadd.f32 %v1262_v42, %v399_v40 }
  0xc8   :  { %v543_v58 = vmax.f32 %v438_v50, 0.0  ;;  %v559_v59 = vmax.f32 %v478_v51, 0.0 }
  0xc9   :  { %v512_v46 = vmax.f32 %v360_v41, 0.0  ;;  %v528_v47 = vmax.f32 %v400_v43, 0.0 }
  0xcb   :  { %v916_v48 = vpack.c.bf16 %v512_v46, %v511_v44  ;;  %v956_v49 = vpack.c.bf16 %v528_v47, %v527_v45 }
  0xcd   :  { %1064 = vst [vmem:[%s1427_s3 + $0x10] sm:$0xff] %v916_v48   ;;  %v439_v52 = vpop.f32.mrf.mxu2  ;;  %v479_v53 = vpop.f32.mrf.mxu3 }
  0xce   :  { %1072 = vst [vmem:[%s1427_s3 + $0x50] sm:$0xff] %v956_v49   ;;  %v440_v54 = vadd.f32 %v1262_v42, %v439_v52  ;;  %v480_v55 = vadd.f32 %v1262_v42, %v479_v53  ;;  %v362_v56 = vpop.f32.mrf.mxu0  ;;  %v402_v57 = vpop.f32.mrf.mxu1 }
  0xcf   :  { %v363_v0 = vadd.f32 %v1262_v42, %v362_v56  ;;  %v403_v1 = vadd.f32 %v1262_v42, %v402_v57 }
  0xd0   :  { %v544_v60 = vmax.f32 %v440_v54, 0.0  ;;  %v560_v61 = vmax.f32 %v480_v55, 0.0 }
  0xd1   :  { %v513_v8 = vmax.f32 %v363_v0, 0.0  ;;  %v529_v9 = vmax.f32 %v403_v1, 0.0 }
  0xd2   :  { %v996_v62 = vpack.c.bf16 %v544_v60, %v543_v58  ;;  %v1036_v63 = vpack.c.bf16 %v560_v61, %v559_v59 }
  0xd4   :  { %1080 = vst [vmem:[%s1427_s3 + $0x90] sm:$0xff] %v996_v62  }
  0xd5   :  { %1088 = vst [vmem:[%s1427_s3 + $0xd0] sm:$0xff] %v1036_v63   ;;  %v442_v2 = vpop.f32.mrf.mxu2  ;;  %v482_v3 = vpop.f32.mrf.mxu3 }
  0xd6   :  { %v364_v4 = vpop.f32.mrf.mxu0  ;;  %v404_v5 = vpop.f32.mrf.mxu1  ;;  %v443_v14 = vadd.f32 %v1262_v42, %v442_v2  ;;  %v483_v15 = vadd.f32 %v1262_v42, %v482_v3 }
  0xd7   :  { %v365_v6 = vadd.f32 %v1262_v42, %v364_v4  ;;  %v405_v7 = vadd.f32 %v1262_v42, %v404_v5 }
  0xd8   :  { %v545_v22 = vmax.f32 %v443_v14, 0.0  ;;  %v561_v23 = vmax.f32 %v483_v15, 0.0 }
  0xd9   :  { %v514_v10 = vmax.f32 %v365_v6, 0.0  ;;  %v530_v11 = vmax.f32 %v405_v7, 0.0 }
  0xdb   :  { %v921_v12 = vpack.c.bf16 %v514_v10, %v513_v8  ;;  %v961_v13 = vpack.c.bf16 %v530_v11, %v529_v9 }
  0xdd   :  { %1065 = vst [vmem:[%s1427_s3 + $0x18] sm:$0xff] %v921_v12   ;;  %v444_v16 = vpop.f32.mrf.mxu2  ;;  %v484_v17 = vpop.f32.mrf.mxu3 }
  0xde   :  { %1073 = vst [vmem:[%s1427_s3 + $0x58] sm:$0xff] %v961_v13   ;;  %v445_v18 = vadd.f32 %v1262_v42, %v444_v16  ;;  %v485_v19 = vadd.f32 %v1262_v42, %v484_v17  ;;  %v367_v20 = vpop.f32.mrf.mxu0  ;;  %v407_v21 = vpop.f32.mrf.mxu1 }
  0xdf   :  { %v368_v28 = vadd.f32 %v1262_v42, %v367_v20  ;;  %v408_v29 = vadd.f32 %v1262_v42, %v407_v21 }
  0xe0   :  { %v546_v24 = vmax.f32 %v445_v18, 0.0  ;;  %v562_v25 = vmax.f32 %v485_v19, 0.0 }
  0xe1   :  { %v515_v36 = vmax.f32 %v368_v28, 0.0  ;;  %v531_v37 = vmax.f32 %v408_v29, 0.0 }
  0xe2   :  { %v1001_v26 = vpack.c.bf16 %v546_v24, %v545_v22  ;;  %v1041_v27 = vpack.c.bf16 %v562_v25, %v561_v23 }
  0xe4   :  { %1081 = vst [vmem:[%s1427_s3 + $0x98] sm:$0xff] %v1001_v26  }
  0xe5   :  { %1089 = vst [vmem:[%s1427_s3 + $0xd8] sm:$0xff] %v1041_v27   ;;  %v447_v30 = vpop.f32.mrf.mxu2  ;;  %v487_v31 = vpop.f32.mrf.mxu3 }
  0xe6   :  { %v369_v32 = vpop.f32.mrf.mxu0  ;;  %v409_v33 = vpop.f32.mrf.mxu1  ;;  %v448_v43 = vadd.f32 %v1262_v42, %v447_v30  ;;  %v488_v44 = vadd.f32 %v1262_v42, %v487_v31 }
  0xe7   :  { %v370_v34 = vadd.f32 %v1262_v42, %v369_v32  ;;  %v410_v35 = vadd.f32 %v1262_v42, %v409_v33 }
  0xe8   :  { %v547_v51 = vmax.f32 %v448_v43, 0.0  ;;  %v563_v52 = vmax.f32 %v488_v44, 0.0 }
  0xe9   :  { %v516_v38 = vmax.f32 %v370_v34, 0.0  ;;  %v532_v39 = vmax.f32 %v410_v35, 0.0 }
  0xeb   :  { %v926_v40 = vpack.c.bf16 %v516_v38, %v515_v36  ;;  %v966_v41 = vpack.c.bf16 %v532_v39, %v531_v37 }
  0xed   :  { %1066 = vst [vmem:[%s1427_s3 + $0x20] sm:$0xff] %v926_v40   ;;  %v449_v45 = vpop.f32.mrf.mxu2  ;;  %v489_v46 = vpop.f32.mrf.mxu3 }
  0xee   :  { %1074 = vst [vmem:[%s1427_s3 + $0x60] sm:$0xff] %v966_v41   ;;  %v450_v47 = vadd.f32 %v1262_v42, %v449_v45  ;;  %v490_v48 = vadd.f32 %v1262_v42, %v489_v46  ;;  %v372_v49 = vpop.f32.mrf.mxu0  ;;  %v412_v50 = vpop.f32.mrf.mxu1 }
  0xef   :  { %v373_v57 = vadd.f32 %v1262_v42, %v372_v49  ;;  %v413_v58 = vadd.f32 %v1262_v42, %v412_v50 }
  0xf0   :  { %v548_v53 = vmax.f32 %v450_v47, 0.0  ;;  %v564_v54 = vmax.f32 %v490_v48, 0.0 }
  0xf1   :  { %v517_v1 = vmax.f32 %v373_v57, 0.0  ;;  %v533_v2 = vmax.f32 %v413_v58, 0.0 }
  0xf2   :  { %v1006_v55 = vpack.c.bf16 %v548_v53, %v547_v51  ;;  %v1046_v56 = vpack.c.bf16 %v564_v54, %v563_v52 }
  0xf4   :  { %1082 = vst [vmem:[%s1427_s3 + $0xa0] sm:$0xff] %v1006_v55  }
  0xf5   :  { %1090 = vst [vmem:[%s1427_s3 + $0xe0] sm:$0xff] %v1046_v56   ;;  %v452_v59 = vpop.f32.mrf.mxu2  ;;  %v492_v60 = vpop.f32.mrf.mxu3 }
  0xf6   :  { %v374_v61 = vpop.f32.mrf.mxu0  ;;  %v414_v62 = vpop.f32.mrf.mxu1  ;;  %v453_v7 = vadd.f32 %v1262_v42, %v452_v59  ;;  %v493_v8 = vadd.f32 %v1262_v42, %v492_v60 }
  0xf7   :  { %v375_v63 = vadd.f32 %v1262_v42, %v374_v61  ;;  %v415_v0 = vadd.f32 %v1262_v42, %v414_v62 }
  0xf8   :  { %v549_v15 = vmax.f32 %v453_v7, 0.0  ;;  %v565_v16 = vmax.f32 %v493_v8, 0.0 }
  0xf9   :  { %v518_v3 = vmax.f32 %v375_v63, 0.0  ;;  %v534_v4 = vmax.f32 %v415_v0, 0.0 }
  0xfb   :  { %v931_v5 = vpack.c.bf16 %v518_v3, %v517_v1  ;;  %v971_v6 = vpack.c.bf16 %v534_v4, %v533_v2 }
  0xfd   :  { %1067 = vst [vmem:[%s1427_s3 + $0x28] sm:$0xff] %v931_v5   ;;  %v454_v9 = vpop.f32.mrf.mxu2  ;;  %v494_v10 = vpop.f32.mrf.mxu3 }
  0xfe   :  { %1075 = vst [vmem:[%s1427_s3 + $0x68] sm:$0xff] %v971_v6   ;;  %v455_v11 = vadd.f32 %v1262_v42, %v454_v9  ;;  %v495_v12 = vadd.f32 %v1262_v42, %v494_v10  ;;  %v377_v13 = vpop.f32.mrf.mxu0  ;;  %v417_v14 = vpop.f32.mrf.mxu1 }
  0xff   :  { %v378_v21 = vadd.f32 %v1262_v42, %v377_v13  ;;  %v418_v22 = vadd.f32 %v1262_v42, %v417_v14 }
 0x100   :  { %v550_v17 = vmax.f32 %v455_v11, 0.0  ;;  %v566_v18 = vmax.f32 %v495_v12, 0.0 }
 0x101   :  { %v519_v29 = vmax.f32 %v378_v21, 0.0  ;;  %v535_v30 = vmax.f32 %v418_v22, 0.0 }
 0x102   :  { %v1011_v19 = vpack.c.bf16 %v550_v17, %v549_v15  ;;  %v1051_v20 = vpack.c.bf16 %v566_v18, %v565_v16 }
 0x104   :  { %1083 = vst [vmem:[%s1427_s3 + $0xa8] sm:$0xff] %v1011_v19  }
 0x105   :  { %1091 = vst [vmem:[%s1427_s3 + $0xe8] sm:$0xff] %v1051_v20   ;;  %v457_v23 = vpop.f32.mrf.mxu2  ;;  %v497_v24 = vpop.f32.mrf.mxu3 }
 0x106   :  { %v379_v25 = vpop.f32.mrf.mxu0  ;;  %v419_v26 = vpop.f32.mrf.mxu1  ;;  %v458_v35 = vadd.f32 %v1262_v42, %v457_v23  ;;  %v498_v36 = vadd.f32 %v1262_v42, %v497_v24 }
 0x107   :  { %v380_v27 = vadd.f32 %v1262_v42, %v379_v25  ;;  %v420_v28 = vadd.f32 %v1262_v42, %v419_v26 }
 0x108   :  { %v551_v44 = vmax.f32 %v458_v35, 0.0  ;;  %v567_v45 = vmax.f32 %v498_v36, 0.0 }
 0x109   :  { %v520_v31 = vmax.f32 %v380_v27, 0.0  ;;  %v536_v32 = vmax.f32 %v420_v28, 0.0 }
 0x10b   :  { %v936_v33 = vpack.c.bf16 %v520_v31, %v519_v29  ;;  %v976_v34 = vpack.c.bf16 %v536_v32, %v535_v30 }
 0x10d   :  { %1068 = vst [vmem:[%s1427_s3 + $0x30] sm:$0xff] %v936_v33   ;;  %v459_v37 = vpop.f32.mrf.mxu2  ;;  %v499_v38 = vpop.f32.mrf.mxu3 }
 0x10e   :  { %1076 = vst [vmem:[%s1427_s3 + $0x70] sm:$0xff] %v976_v34   ;;  %v460_v39 = vadd.f32 %v1262_v42, %v459_v37  ;;  %v500_v40 = vadd.f32 %v1262_v42, %v499_v38  ;;  %v382_v41 = vpop.f32.mrf.mxu0  ;;  %v422_v43 = vpop.f32.mrf.mxu1 }
 0x10f   :  { %v383_v50 = vadd.f32 %v1262_v42, %v382_v41  ;;  %v423_v51 = vadd.f32 %v1262_v42, %v422_v43 }
 0x110   :  { %v552_v46 = vmax.f32 %v460_v39, 0.0  ;;  %v568_v47 = vmax.f32 %v500_v40, 0.0 }
 0x111   :  { %v521_v58 = vmax.f32 %v383_v50, 0.0  ;;  %v537_v59 = vmax.f32 %v423_v51, 0.0 }
 0x112   :  { %v1016_v48 = vpack.c.bf16 %v552_v46, %v551_v44  ;;  %v1056_v49 = vpack.c.bf16 %v568_v47, %v567_v45 }
 0x114   :  { %1084 = vst [vmem:[%s1427_s3 + $0xb0] sm:$0xff] %v1016_v48  }
 0x115   :  { %1092 = vst [vmem:[%s1427_s3 + $0xf0] sm:$0xff] %v1056_v49   ;;  %v462_v52 = vpop.f32.mrf.mxu2  ;;  %v502_v53 = vpop.f32.mrf.mxu3 }
 0x116   :  { %v384_v54 = vpop.f32.mrf.mxu0  ;;  %v424_v55 = vpop.f32.mrf.mxu1  ;;  %v463_v0 = vadd.f32 %v1262_v42, %v462_v52  ;;  %v503_v1 = vadd.f32 %v1262_v42, %v502_v53 }
 0x117   :  { %v385_v56 = vadd.f32 %v1262_v42, %v384_v54  ;;  %v425_v57 = vadd.f32 %v1262_v42, %v424_v55 }
 0x118   :  { %v553_v6 = vmax.f32 %v463_v0, 0.0  ;;  %v569_v7 = vmax.f32 %v503_v1, 0.0 }
 0x119   :  { %v522_v60 = vmax.f32 %v385_v56, 0.0  ;;  %v538_v61 = vmax.f32 %v425_v57, 0.0 }
 0x11b   :  { %v941_v62 = vpack.c.bf16 %v522_v60, %v521_v58  ;;  %v981_v63 = vpack.c.bf16 %v538_v61, %v537_v59 }
 0x11d   :  { %1069 = vst [vmem:[%s1427_s3 + $0x38] sm:$0xff] %v941_v62   ;;  %v464_v2 = vpop.f32.mrf.mxu2  ;;  %v504_v3 = vpop.f32.mrf.mxu3 }
 0x11e   :  { %1077 = vst [vmem:[%s1427_s3 + $0x78] sm:$0xff] %v981_v63   ;;  %v465_v4 = vadd.f32 %v1262_v42, %v464_v2  ;;  %v505_v5 = vadd.f32 %v1262_v42, %v504_v3 }
 0x120   :  { %v554_v8 = vmax.f32 %v465_v4, 0.0  ;;  %v570_v9 = vmax.f32 %v505_v5, 0.0 }
 0x122   :  { %v1021_v10 = vpack.c.bf16 %v554_v8, %v553_v6  ;;  %v1061_v11 = vpack.c.bf16 %v570_v9, %v569_v7 }
 0x124   :  { %1085 = vst [vmem:[%s1427_s3 + $0xb8] sm:$0xff] %v1021_v10  }
 0x125   :  { %1093 = vst [vmem:[%s1427_s3 + $0xf8] sm:$0xff] %v1061_v11  }

// kernel: resnet_stage_forward.9
= control target key start
LH: loop header
LB: loop body
LE: loop exit
PB: predicated region body
PF: predicated region fallthrough
CT: control target
= control target key end

     0   :  { %s2764_s12 = smov 0   ;;  %s2766_s13 = smov 0   ;;  %s3234_s0 = inlined_call_operand.vmem [shape: bf16[8,9,9,128], index: 0, kind: input, shape index: {}]   ;;  %s3235_s1 = inlined_call_operand.vmem [shape: bf16[1152,128], index: 1, kind: input, shape index: {}]   ;;  %s3236_s2 = inlined_call_operand.vmem [shape: f32[1,128], index: 2, kind: input, shape index: {}]   ;;  %s3237_s3 = inlined_call_operand.vmem [shape: bf16[2,8,8,128], index: 3, kind: output, shape index: {}]  }
   0x1   :  { %s2768_s14 = smov 0  }
   0x2 LB: > { %s32_s15 = sadd.s32 1, %s2738_s13  ;;  %p2035_p0 = scmp.ge.s32.totalorder %s2742_s14, 1  ;;  %s2742_s14 = sphi %s2768_s14, %s13_s14   ;;  %s2738_s13 = sphi %s2766_s13, %s3241_s13   ;;  %s2734_s12 = sphi %s2764_s12, %s3240_s12  }
   0x3   : > { %p34_p1 = scmp.ge.s32.totalorder %s32_s15, 2  ;;  %p179_p2 = scmp.lt.s32.totalorder %s2742_s14, 3 }
   0x5   : > { %s3243_s15 = smov (%p34_p1, %s32_s15), 0  ;;  %p180_p3 = pnand %p2035_p0, %p179_p2 }
   0x6   : > { %s2036_s18 = sshll.u32 (!%p180_p3), %s2734_s12, 2  ;;  %p233_p5 = scmp.lt.s32.totalorder (!%p180_p3), %s2734_s12, 1 }
   0x7   : > { %183 = sbr.rel (%p180_p3) target bundleno = 335 (0x14f), region = 32  ;;  %p219_p4 = scmp.lt.s32.totalorder (!%p180_p3), %s2036_s18, 7 }
   0xc   : > { %v2590_v0 = vld [vmem:[%s3235_s1 + $0x38] sm:$0xff]  ;;  %v2589_v2 = vld [vmem:[%s3235_s1 + $0x30] sm:$0xff]  ;;  %s3245_s18 = smov (!%p219_p4, %s2036_s18), 7  ;;  %v2588_v6 = vld [vmem:[%s3235_s1 + $0x28] sm:$0xff]  ;;  %vm300_vm0 = vsmask.f32 3328 }
   0xd   : > { %v2606_v1 = vld [vmem:[%s3235_s1 + $0xb8] sm:$0xff]  ;;  %2678 = vmatpush.bf16.msra.mxu1 %v2590_v0  ;;  %1600 = vmatpush.bf16.msra.mxu0 %v2590_v0  ;;  %v2605_v3 = vld [vmem:[%s3235_s1 + $0xb0] sm:$0xff]  ;;  %s2694_s29 = smul.u32 72, %s3245_s18  ;;  %v2604_v7 = vld [vmem:[%s3235_s1 + $0xa8] sm:$0xff]  ;;  %vm301_vm1 = vsmask.f32 7440 }
   0xe   : > { %1658 = vmatpush.bf16.msra.mxu2 %v2606_v1  ;;  %v2614_v4 = vld [vmem:[%s3235_s1 + $0xf8] sm:$0xff]  ;;  %v2613_v5 = vld [vmem:[%s3235_s1 + $0xf0] sm:$0xff]  ;;  %v2587_v8 = vld [vmem:[%s3235_s1 + $0x20] sm:$0xff]  ;;  %s3247_s12 = smov (!%p233_p5, %s2734_s12), 1 }
   0xf   : > { %1687 = vmatpush.bf16.msra.mxu3 %v2614_v4  ;;  %s2812_s9 = scalar_lea.vmem %s3234_s0, %s2694_s29  ;;  %v2603_v12 = vld [vmem:[%s3235_s1 + $0xa0] sm:$0xff]  ;;  %v2612_v13 = vld [vmem:[%s3235_s1 + $0xe8] sm:$0xff]  ;;  %v2586_v26 = vld [vmem:[%s3235_s1 + $0x18] sm:$0xff]  ;;  %s2546_s6 = sshll.u32 %s3247_s12, 5 }
  0x10   : > { %v253_v9 = vld [vmem:[%s2812_s9 + $0x20] sm:$0xf]  ;;  %v254_v10 = vld [vmem:[%s2812_s9 + $0x28] sm:$0xf]  ;;  %v285_v16 = vld [vmem:[%s2812_s9 + $0x4] sm:$0x1]  ;;  %s3209_s10 = scalar_lea.vmem %s3237_s3, %s2546_s6 }
  0x11   : > { %2679 = vmatpush.bf16.msra.mxu1 %v2589_v2  ;;  %1601 = vmatpush.bf16.msra.mxu0 %v2589_v2  ;;  %v249_v11 = vld [vmem:[%s2812_s9] sm:$0xf]  ;;  %261 = vst [vmem:[#allocation2 + $0x90] sm:$0xf] %v253_v9  ;;  %v250_v14 = vld [vmem:[%s2812_s9 + $0x8] sm:$0xf]  ;;  %vm2846_vm2 = vmor %vm300_vm0, %vm301_vm1 }
  0x12   : > { %1659 = vmatpush.bf16.msra.mxu2 %v2605_v3  ;;  %262 = vst [vmem:[#allocation2 + $0xb4] sm:$0xf] %v254_v10  ;;  %v284_v15 = vld [vmem:[%s2812_s9] sm:$0xf]  ;;  %v286_v17 = vld [vmem:[%s2812_s9 + $0x8] sm:$0xf] }
  0x13   : > { %1688 = vmatpush.bf16.msra.mxu3 %v2613_v5  ;;  %257 = vst [vmem:[#allocation2] sm:$0xf] %v249_v11  ;;  %v287_v18 = vld [vmem:[%s2812_s9 + $0xc] sm:$0x1]  ;;  %v304_v19 = vshrl.u32 %v284_v15, 16  ;;  %v307_v20 = vshll.u32 %v284_v15, 16 }
  0x14   : > { %258 = vst [vmem:[#allocation2 + $0x24] sm:$0xf] %v250_v14  ;;  %v313_v21 = vshll.u32 %v285_v16, 16  ;;  %v318_v22 = vshrl.u32 %v286_v17, 16  ;;  %v2611_v23 = vld [vmem:[%s3235_s1 + $0xe0] sm:$0xff]  ;;  %v321_v24 = vshll.u32 %v286_v17, 16 }
  0x15   : > { %2680 = vmatpush.bf16.msra.mxu1 %v2588_v6  ;;  %1602 = vmatpush.bf16.msra.mxu0 %v2588_v6  ;;  %v327_v25 = vshll.u32 %v287_v18, 16  ;;  %v306_v27 = vrot.slane %v304_v19, 4  ;;  %v309_v28 = vrot.slane %v307_v20, 5  ;;  %v2602_v30 = vld [vmem:[%s3235_s1 + $0x98] sm:$0xff]  ;;  %v255_v32 = vld [vmem:[%s2812_s9 + $0x30] sm:$0xf] }
  0x16   : > { %1660 = vmatpush.bf16.msra.mxu2 %v2604_v7  ;;  %v320_v29 = vrot.slane %v318_v22, 4  ;;  %v323_v31 = vrot.slane %v321_v24, 5  ;;  %v256_v33 = vld [vmem:[%s2812_s9 + $0x38] sm:$0xf]  ;;  %v315_v35 = vrot.slane %v313_v21, 5  ;;  %v2585_v40 = vld [vmem:[%s3235_s1 + $0x10] sm:$0xff] }
  0x17   : > { %1689 = vmatpush.bf16.msra.mxu3 %v2612_v13  ;;  %v310_v34 = vor.u32 %v309_v28, %v306_v27  ;;  %263 = vst [vmem:[#allocation2 + $0xd8] sm:$0xf] %v255_v32  ;;  %v2610_v36 = vld [vmem:[%s3235_s1 + $0xd8] sm:$0xff]  ;;  %v329_v39 = vrot.slane %v327_v25, 5  ;;  %v2601_v42 = vld [vmem:[%s3235_s1 + $0x90] sm:$0xff]  ;;  %v2584_v45 = vld [vmem:[%s3235_s1 + $0x8] sm:$0xff] }
  0x18   : > { %v324_v38 = vor.u32 %v323_v31, %v320_v29  ;;  %264 = vst [vmem:[#allocation2 + $0xfc] sm:$0xf] %v256_v33  ;;  %v251_v44 = vld [vmem:[%s2812_s9 + $0x10] sm:$0xf]  ;;  %v252_v48 = vld [vmem:[%s2812_s9 + $0x18] sm:$0xf] }
  0x19   : > { %2681 = vmatpush.bf16.msra.mxu1 %v2587_v8  ;;  %1603 = vmatpush.bf16.msra.mxu0 %v2587_v8  ;;  %v311_v41 = vrot.slane %v310_v34, 4  ;;  %v2609_v47 = vld [vmem:[%s3235_s1 + $0xd0] sm:$0xff]  ;;  %259 = vst [vmem:[#allocation2 + $0x48] sm:$0xf] %v251_v44  ;;  %v2049_v51 = vld [vmem:[%s2812_s9 + $0x98] sm:$0xf] }
  0x1a   : > { %1661 = vmatpush.bf16.msra.mxu2 %v2603_v12  ;;  %v325_v43 = vrot.slane %v324_v38, 4  ;;  %v2048_v50 = vld [vmem:[%s2812_s9 + $0x90] sm:$0xf]  ;;  %v289_v53 = vld [vmem:[%s2812_s9 + $0x14] sm:$0x1]  ;;  %v2600_v54 = vld [vmem:[%s3235_s1 + $0x88] sm:$0xff] }
  0x1b   : > { %1690 = vmatpush.bf16.msra.mxu3 %v2611_v23  ;;  %v316_v46 = vsel %vm2846_vm2, %v311_v41, %v315_v35  ;;  %v288_v52 = vld [vmem:[%s2812_s9 + $0x10] sm:$0xf]  ;;  %260 = vst [vmem:[#allocation2 + $0x6c] sm:$0xf] %v252_v48  ;;  %v290_v55 = vld [vmem:[%s2812_s9 + $0x18] sm:$0xf] }
  0x1c   : > { %v330_v49 = vsel %vm2846_vm2, %v325_v43, %v329_v39  ;;  %423 = vst [vmem:[#allocation2 + $0x8] sm:$0xf] %v316_v46  ;;  %v2186_v56 = vld [vmem:[#allocation2 + $0x90] sm:$0xf]  ;;  %v2569_v57 = vld [vmem:[#allocation2 + $0xb0] sm:$0xf0] }
  0x1d   : > { %2682 = vmatpush.bf16.msra.mxu1 %v2586_v26  ;;  %1604 = vmatpush.bf16.msra.mxu0 %v2586_v26  ;;  %424 = vst [vmem:[#allocation2 + $0x2c] sm:$0xf] %v330_v49  ;;  %v2114_v58 = vld [vmem:[#allocation2] sm:$0xf]  ;;  %v291_v59 = vld [vmem:[%s2812_s9 + $0x1c] sm:$0x1]  ;;  %v2187_v15 = vor.u32 %v2569_v57, %v2186_v56 }
  0x1e   : > { %1662 = vmatpush.bf16.msra.mxu2 %v2602_v30  ;;  %442 = vst [vmem:[#allocation2 + $0xc] sm:$0xf] %v2048_v50  ;;  %v2608_v60 = vld [vmem:[%s3235_s1 + $0xc8] sm:$0xff]  ;;  %v332_v61 = vshrl.u32 %v288_v52, 16  ;;  %v335_v62 = vshll.u32 %v288_v52, 16  ;;  %v341_v63 = vshll.u32 %v289_v53, 16 }
  0x1f   : > { %1691 = vmatpush.bf16.msra.mxu3 %v2610_v36  ;;  %443 = vst [vmem:[#allocation2 + $0x30] sm:$0xf] %v2049_v51  ;;  %v2583_v0 = vld [vmem:[%s3235_s1] sm:$0xff]  ;;  %v346_v2 = vshrl.u32 %v290_v55, 16  ;;  %v349_v3 = vshll.u32 %v290_v55, 16  ;;  %v355_v4 = vshll.u32 %v291_v59, 16 }
  0x20   : > { %v2551_v1 = vld [vmem:[#allocation2 + $0x20] sm:$0xf0]  ;;  %v2598_v5 = vld [vmem:[%s3235_s1 + $0x78] sm:$0xff]  ;;  %v334_v8 = vrot.slane %v332_v61, 4  ;;  %v337_v9 = vrot.slane %v335_v62, 5  ;;  %v343_v12 = vrot.slane %v341_v63, 5 }
  0x21   : > { %2683 = vmatpush.bf16.msra.mxu1 %v2585_v40  ;;  %1605 = vmatpush.bf16.msra.mxu0 %v2585_v40  ;;  %v2599_v6 = vld [vmem:[%s3235_s1 + $0x80] sm:$0xff]  ;;  %v2622_v7 = vld [vmem:[%s3235_s1 + $0x138] sm:$0xff]  ;;  %v348_v13 = vrot.slane %v346_v2, 4  ;;  %v351_v14 = vrot.slane %v349_v3, 5  ;;  %v2597_v16 = vld [vmem:[%s3235_s1 + $0x70] sm:$0xff]  ;;  %v2115_v17 = vor.u32 %v2551_v1, %v2114_v58  ;;  %v357_v25 = vrot.slane %v355_v4, 5 }
  0x22   : > { %1663 = vmatpush.bf16.msra.mxu2 %v2601_v42  ;;  %v2638_v11 = vld [vmem:[%s3235_s1 + $0x1b8] sm:$0xff]  ;;  %v338_v19 = vor.u32 %v337_v9, %v334_v8  ;;  %v2040_v20 = vld [vmem:[%s2812_s9 + $0x48] sm:$0xf]  ;;  %v2041_v21 = vld [vmem:[%s2812_s9 + $0x50] sm:$0xf] }
  0x23   : > { %1692 = vmatpush.bf16.msra.mxu3 %v2609_v47  ;;  %v2122_v10 = vld [vmem:[#allocation2 + $0x8] sm:$0xf]  ;;  %v2607_v23 = vld [vmem:[%s3235_s1 + $0xc0] sm:$0xff]  ;;  %v352_v24 = vor.u32 %v351_v14, %v348_v13  ;;  %276 = vst [vmem:[#allocation2 + $0x4] sm:$0xf] %v2040_v20  ;;  %v2646_v29 = vld [vmem:[%s3235_s1 + $0x1f8] sm:$0xff] }
  0x24   : > { %v2552_v18 = vld [vmem:[#allocation2 + $0x28] sm:$0xf0]  ;;  %v2050_v26 = vld [vmem:[%s2812_s9 + $0xa0] sm:$0xf]  ;;  %v339_v28 = vrot.slane %v338_v19, 4  ;;  %v2621_v30 = vld [vmem:[%s3235_s1 + $0x130] sm:$0xff] }
  0x25   : > { %2684 = vmatpush.bf16.msra.mxu1 %v2584_v45  ;;  %1606 = vmatpush.bf16.msra.mxu0 %v2584_v45  ;;  %v2123_v22 = vor.u32 %v2552_v18, %v2122_v10  ;;  %v2548_v27 = vld [vmem:[#allocation2 + $0xc] sm:$0xf]  ;;  %277 = vst [vmem:[#allocation2 + $0x28] sm:$0xf] %v2041_v21  ;;  %v353_v32 = vrot.slane %v352_v24, 4  ;;  %v2637_v33 = vld [vmem:[%s3235_s1 + $0x1b0] sm:$0xff] }
  0x26   : > { %1664 = vmatpush.bf16.msra.mxu2 %v2600_v54  ;;  %v2124_v31 = vld [vmem:[#allocation2 + $0x2c] sm:$0xf0]  ;;  %v2596_v34 = vld [vmem:[%s3235_s1 + $0x68] sm:$0xff]  ;;  %v344_v36 = vsel %vm2846_vm2, %v339_v28, %v343_v12  ;;  %444 = vst [vmem:[#allocation2 + $0x54] sm:$0xf] %v2050_v26  ;;  %v2595_v51 = vld [vmem:[%s3235_s1 + $0x60] sm:$0xff] }
  0x27   : > { %1693 = vmatpush.bf16.msra.mxu3 %v2608_v60  ;;  %v2127_v35 = vor.u32 %v2548_v27, %v2124_v31  ;;  %v2051_v38 = vld [vmem:[%s2812_s9 + $0xa8] sm:$0xf]  ;;  %v358_v40 = vsel %vm2846_vm2, %v353_v32, %v357_v25  ;;  %425 = vst [vmem:[#allocation2 + $0x50] sm:$0xf] %v344_v36  ;;  %v2056_v41 = vld [vmem:[%s2812_s9 + $0xd8] sm:$0xf] }
  0x28   : > { %v2620_v39 = vld [vmem:[%s3235_s1 + $0x128] sm:$0xff]  ;;  %v2057_v42 = vld [vmem:[%s2812_s9 + $0xe0] sm:$0xf]  ;;  %426 = vst [vmem:[#allocation2 + $0x74] sm:$0xf] %v358_v40  ;;  %v2645_v44 = vld [vmem:[%s3235_s1 + $0x1f0] sm:$0xff] }
  0x29   : > { %2685 = vmatpush.bf16.msra.mxu1 %v2583_v0  ;;  %1607 = vmatpush.bf16.msra.mxu0 %v2583_v0  ;;  %v2636_v43 = vld [vmem:[%s3235_s1 + $0x1a8] sm:$0xff]  ;;  %v292_v45 = vld [vmem:[%s2812_s9 + $0x20] sm:$0xf]  ;;  %445 = vst [vmem:[#allocation2 + $0x78] sm:$0xf] %v2051_v38  ;;  %v2594_v8 = vld [vmem:[%s3235_s1 + $0x58] sm:$0xff] }
  0x2a   : > { %1665 = vmatpush.bf16.msra.mxu2 %v2599_v6  ;;  %v293_v46 = vld [vmem:[%s2812_s9 + $0x24] sm:$0x1]  ;;  %v294_v47 = vld [vmem:[%s2812_s9 + $0x28] sm:$0xf]  ;;  %461 = vst [vmem:[#allocation2 + $0x10] sm:$0xf] %v2056_v41 }
  0x2b   : > { %1694 = vmatpush.bf16.msra.mxu3 %v2607_v23  ;;  %v295_v48 = vld [vmem:[%s2812_s9 + $0x2c] sm:$0x1]  ;;  %462 = vst [vmem:[#allocation2 + $0x34] sm:$0xf] %v2057_v42  ;;  %v360_v49 = vshrl.u32 %v292_v45, 16  ;;  %v363_v50 = vshll.u32 %v292_v45, 16 }
  0x2c   : > { %1618 = vmatmul.bf16.vlgmr.msra.gmra.mxu1 %v2187_v15  ;;  %1608 = vmatmul.bf16.vlgmr.msra.gmra.mxu0 %v2115_v17  ;;  %v2619_v52 = vld [vmem:[%s3235_s1 + $0x120] sm:$0xff]  ;;  %v369_v53 = vshll.u32 %v293_v46, 16  ;;  %v374_v54 = vshrl.u32 %v294_v47, 16  ;;  %v377_v55 = vshll.u32 %v294_v47, 16  ;;  %v2644_v56 = vld [vmem:[%s3235_s1 + $0x1e8] sm:$0xff]  ;;  %v383_v62 = vshll.u32 %v295_v48, 16 }
  0x2d   : > { %1629 = vmatpush.bf16.msrb.mxu1 %v2598_v5  ;;  %1716 = vmatpush.bf16.msrb.mxu0 %v2622_v7  ;;  %v2222_v57 = vld [vmem:[#allocation2 + $0xd8] sm:$0xf]  ;;  %v2578_v58 = vld [vmem:[#allocation2 + $0xf8] sm:$0xf0]  ;;  %v2150_v59 = vld [vmem:[#allocation2 + $0x48] sm:$0xf] }
  0x2e   : > { %1774 = vmatpush.bf16.msrb.mxu2 %v2638_v11  ;;  %1695 = vmatmul.bf16.vlgmr.msra.gmra.mxu3 %v2127_v35  ;;  %v362_v60 = vrot.slane %v360_v49, 4  ;;  %v365_v61 = vrot.slane %v363_v50, 5  ;;  %v2635_v63 = vld [vmem:[%s3235_s1 + $0x1a0] sm:$0xff]  ;;  %v2560_v0 = vld [vmem:[#allocation2 + $0x68] sm:$0xf0]  ;;  %v376_v2 = vrot.slane %v374_v54, 4  ;;  %v2223_v14 = vor.u32 %v2578_v58, %v2222_v57 }
  0x2f   : > { %1666 = vmatmul.bf16.vlgmr.msra.gmra.mxu2 %v2123_v22  ;;  %1803 = vmatpush.bf16.msrb.mxu3 %v2646_v29  ;;  %v2158_v1 = vld [vmem:[#allocation2 + $0x50] sm:$0xf]  ;;  %v379_v3 = vrot.slane %v377_v55, 5  ;;  %v2561_v4 = vld [vmem:[#allocation2 + $0x70] sm:$0xf0]  ;;  %v371_v6 = vrot.slane %v369_v53, 5 }
  0x30   : > { %v366_v5 = vor.u32 %v365_v61, %v362_v60  ;;  %v2042_v7 = vld [vmem:[%s2812_s9 + $0x58] sm:$0xf]  ;;  %v385_v10 = vrot.slane %v383_v62, 5  ;;  %v2043_v11 = vld [vmem:[%s2812_s9 + $0x60] sm:$0xf]  ;;  %v2593_v15 = vld [vmem:[%s3235_s1 + $0x50] sm:$0xff]  ;;  %v2159_v20 = vor.u32 %v2561_v4, %v2158_v1 }
  0x31   : > { %1630 = vmatpush.bf16.msrb.mxu1 %v2597_v16  ;;  %1717 = vmatpush.bf16.msrb.mxu0 %v2621_v30  ;;  %v380_v9 = vor.u32 %v379_v3, %v376_v2  ;;  %278 = vst [vmem:[#allocation2 + $0x4c] sm:$0xf] %v2042_v7  ;;  %v2618_v12 = vld [vmem:[%s3235_s1 + $0x118] sm:$0xff]  ;;  %v2151_v16 = vor.u32 %v2560_v0, %v2150_v59  ;;  %v2557_v17 = vld [vmem:[#allocation2 + $0x54] sm:$0xf]  ;;  %v2643_v32 = vld [vmem:[%s3235_s1 + $0x1e0] sm:$0xff] }
  0x32   : > { %1775 = vmatpush.bf16.msrb.mxu2 %v2637_v33  ;;  %v367_v13 = vrot.slane %v366_v5, 4  ;;  %279 = vst [vmem:[#allocation2 + $0x70] sm:$0xf] %v2043_v11  ;;  %v2052_v19 = vld [vmem:[%s2812_s9 + $0xb0] sm:$0xf]  ;;  %v2634_v31 = vld [vmem:[%s3235_s1 + $0x198] sm:$0xff] }
  0x33   : > { %1804 = vmatpush.bf16.msrb.mxu3 %v2645_v44  ;;  %v381_v18 = vrot.slane %v380_v9, 4  ;;  %v2617_v21 = vld [vmem:[%s3235_s1 + $0x110] sm:$0xff]  ;;  %v2160_v22 = vld [vmem:[#allocation2 + $0x74] sm:$0xf0]  ;;  %446 = vst [vmem:[#allocation2 + $0x9c] sm:$0xf] %v2052_v19 }
  0x34   : > { %v372_v23 = vsel %vm2846_vm2, %v367_v13, %v371_v6  ;;  %v2053_v24 = vld [vmem:[%s2812_s9 + $0xb8] sm:$0xf]  ;;  %v2058_v26 = vld [vmem:[%s2812_s9 + $0xe8] sm:$0xf]  ;;  %v296_v27 = vld [vmem:[%s2812_s9 + $0x30] sm:$0xf]  ;;  %v2163_v30 = vor.u32 %v2557_v17, %v2160_v22 }
  0x35   : > { %1631 = vmatpush.bf16.msrb.mxu1 %v2596_v34  ;;  %1718 = vmatpush.bf16.msrb.mxu0 %v2620_v39  ;;  %v386_v25 = vsel %vm2846_vm2, %v381_v18, %v385_v10  ;;  %427 = vst [vmem:[#allocation2 + $0x98] sm:$0xf] %v372_v23  ;;  %v2059_v28 = vld [vmem:[%s2812_s9 + $0xf0] sm:$0xf]  ;;  %v297_v29 = vld [vmem:[%s2812_s9 + $0x34] sm:$0x1] }
  0x36   : > { %1776 = vmatpush.bf16.msrb.mxu2 %v2636_v43  ;;  %428 = vst [vmem:[#allocation2 + $0xbc] sm:$0xf] %v386_v25  ;;  %v388_v33 = vshrl.u32 %v296_v27, 16  ;;  %v298_v34 = vld [vmem:[%s2812_s9 + $0x38] sm:$0xf]  ;;  %v391_v35 = vshll.u32 %v296_v27, 16 }
  0x37   : > { %1805 = vmatpush.bf16.msrb.mxu3 %v2644_v56  ;;  %447 = vst [vmem:[#allocation2 + $0xc0] sm:$0xf] %v2053_v24  ;;  %v2592_v36 = vld [vmem:[%s3235_s1 + $0x48] sm:$0xff]  ;;  %v299_v38 = vld [vmem:[%s2812_s9 + $0x3c] sm:$0x1]  ;;  %v397_v42 = vshll.u32 %v297_v29, 16 }
  0x38   : > { %463 = vst [vmem:[#allocation2 + $0x58] sm:$0xf] %v2058_v26  ;;  %v2616_v39 = vld [vmem:[%s3235_s1 + $0x108] sm:$0xff]  ;;  %v390_v40 = vrot.slane %v388_v33, 4  ;;  %v393_v41 = vrot.slane %v391_v35, 5  ;;  %v2633_v43 = vld [vmem:[%s3235_s1 + $0x190] sm:$0xff] }
  0x39   : > { %1632 = vmatpush.bf16.msrb.mxu1 %v2595_v51  ;;  %1719 = vmatpush.bf16.msrb.mxu0 %v2619_v52  ;;  %464 = vst [vmem:[#allocation2 + $0x7c] sm:$0xf] %v2059_v28  ;;  %v2642_v44 = vld [vmem:[%s3235_s1 + $0x1d8] sm:$0xff]  ;;  %v402_v45 = vshrl.u32 %v298_v34, 16  ;;  %v405_v46 = vshll.u32 %v298_v34, 16  ;;  %v411_v47 = vshll.u32 %v299_v38, 16 }
  0x3a   : > { %1777 = vmatpush.bf16.msrb.mxu2 %v2635_v63  ;;  %v394_v48 = vor.u32 %v393_v41, %v390_v40  ;;  %v399_v49 = vrot.slane %v397_v42, 5  ;;  %v2044_v50 = vld [vmem:[%s2812_s9 + $0x68] sm:$0xf]  ;;  %v2591_v51 = vld [vmem:[%s3235_s1 + $0x40] sm:$0xff]  ;;  %v2630_v52 = vld [vmem:[%s3235_s1 + $0x178] sm:$0xff] }
  0x3b   : > { %1806 = vmatpush.bf16.msrb.mxu3 %v2643_v32  ;;  %v404_v53 = vrot.slane %v402_v45, 4  ;;  %v407_v54 = vrot.slane %v405_v46, 5  ;;  %v2547_v55 = vld [vmem:[#allocation2 + $0x4] sm:$0xf]  ;;  %v2116_v56 = vld [vmem:[#allocation2 + $0x24] sm:$0xf0] }
  0x3c   : > { %1623 = vmatmul.bf16.gmra.mxu1 %v2223_v14  ;;  %1613 = vmatmul.bf16.gmra.mxu0 %v2151_v16  ;;  %v2615_v57 = vld [vmem:[%s3235_s1 + $0x100] sm:$0xff]  ;;  %v2130_v58 = vld [vmem:[#allocation2 + $0x10] sm:$0xf]  ;;  %v395_v59 = vrot.slane %v394_v48, 4  ;;  %v3006_v61 = vld [vmem:[%s3235_s1 + $0x238] sm:$0xff]  ;;  %v413_v63 = vrot.slane %v411_v47, 5  ;;  %v2119_v9 = vor.u32 %v2547_v55, %v2116_v56 }
  0x3d   : > { %1633 = vmatpush.bf16.msrb.mxu1 %v2594_v8  ;;  %1720 = vmatpush.bf16.msrb.mxu0 %v2618_v12  ;;  %v2045_v60 = vld [vmem:[%s2812_s9 + $0x70] sm:$0xf]  ;;  %v408_v62 = vor.u32 %v407_v54, %v404_v53  ;;  %280 = vst [vmem:[#allocation2 + $0x94] sm:$0xf] %v2044_v50  ;;  %v2553_v0 = vld [vmem:[#allocation2 + $0x30] sm:$0xf0] }
  0x3e   : > { %1778 = vmatpush.bf16.msrb.mxu2 %v2634_v31  ;;  %1700 = vmatmul.bf16.gmra.mxu3 %v2163_v30  ;;  %v2194_v1 = vld [vmem:[#allocation2 + $0x98] sm:$0xf]  ;;  %v400_v2 = vsel %vm2846_vm2, %v395_v59, %v399_v49  ;;  %281 = vst [vmem:[#allocation2 + $0xb8] sm:$0xf] %v2045_v60  ;;  %v2570_v3 = vld [vmem:[#allocation2 + $0xb8] sm:$0xf0]  ;;  %v2131_v10 = vor.u32 %v2553_v0, %v2130_v58 }
  0x3f   : > { %1671 = vmatmul.bf16.gmra.mxu2 %v2159_v20  ;;  %1807 = vmatpush.bf16.msrb.mxu3 %v2642_v44  ;;  %v2629_v4 = vld [vmem:[%s3235_s1 + $0x170] sm:$0xff]  ;;  %v409_v5 = vrot.slane %v408_v62, 4  ;;  %429 = vst [vmem:[#allocation2 + $0xe0] sm:$0xf] %v400_v2  ;;  %v2566_v6 = vld [vmem:[#allocation2 + $0x9c] sm:$0xf]  ;;  %v2195_v14 = vor.u32 %v2570_v3, %v2194_v1 }
  0x40   : > { %v2054_v7 = vld [vmem:[%s2812_s9 + $0xc0] sm:$0xf]  ;;  %v2055_v8 = vld [vmem:[%s2812_s9 + $0xc8] sm:$0xf]  ;;  %v2653_v12 = vld [vmem:[%s3235_s1 + $0x230] sm:$0xff] }
  0x41   : > { %1634 = vmatpush.bf16.msrb.mxu1 %v2593_v15  ;;  %1721 = vmatpush.bf16.msrb.mxu0 %v2617_v21  ;;  %v414_v11 = vsel %vm2846_vm2, %v409_v5, %v413_v63  ;;  %448 = vst [vmem:[#allocation2 + $0xe4] sm:$0xf] %v2054_v7  ;;  %v2060_v13 = vld [vmem:[%s2812_s9 + $0xf8] sm:$0xf]  ;;  %v2196_v15 = vld [vmem:[#allocation2 + $0xbc] sm:$0xf0] }
  0x42   : > { %1779 = vmatpush.bf16.msrb.mxu2 %v2633_v43  ;;  %430 = vst [vmem:[#allocation2 + $0x104] sm:$0xf] %v414_v11  ;;  %v2061_v16 = vld [vmem:[%s2812_s9 + $0x100] sm:$0xf]  ;;  %v2080_v17 = vld [vmem:[%s2812_s9 + $0x8] sm:$0xf]  ;;  %v2199_v21 = vor.u32 %v2566_v6, %v2196_v15 }
  0x43   : > { %449 = vst [vmem:[#allocation2 + $0x108] sm:$0xf] %v2055_v8  ;;  %v2628_v18 = vld [vmem:[%s3235_s1 + $0x168] sm:$0xff]  ;;  %v2081_v20 = vld [vmem:[%s2812_s9 + $0x10] sm:$0xf]  ;;  %v2627_v24 = vld [vmem:[%s3235_s1 + $0x160] sm:$0xff] }
  0x44   : > { %v2632_v19 = vld [vmem:[%s3235_s1 + $0x188] sm:$0xff]  ;;  %465 = vst [vmem:[#allocation2 + $0xa0] sm:$0xf] %v2060_v13  ;;  %v2641_v22 = vld [vmem:[%s3235_s1 + $0x1d0] sm:$0xff]  ;;  %v2631_v25 = vld [vmem:[%s3235_s1 + $0x180] sm:$0xff] }
  0x45   : > { %1635 = vmatpush.bf16.msrb.mxu1 %v2592_v36  ;;  %1722 = vmatpush.bf16.msrb.mxu0 %v2616_v39  ;;  %466 = vst [vmem:[#allocation2 + $0xc4] sm:$0xf] %v2061_v16  ;;  %v3037_v23 = vld [vmem:[%s3235_s1 + $0x228] sm:$0xff]  ;;  %v2046_v27 = vld [vmem:[%s2812_s9 + $0x78] sm:$0xf]  ;;  %v3054_v29 = vld [vmem:[%s3235_s1 + $0x220] sm:$0xff] }
  0x46   : > { %625 = vst [vmem:[#allocation2 + $0x18] sm:$0xf] %v2080_v17  ;;  %1780 = vmatpush.bf16.msrb.mxu2 %v2632_v19  ;;  %1808 = vmatpush.bf16.msrb.mxu3 %v2641_v22  ;;  %v2640_v26 = vld [vmem:[%s3235_s1 + $0x1c8] sm:$0xff]  ;;  %v2047_v28 = vld [vmem:[%s2812_s9 + $0x80] sm:$0xf]  ;;  %v2626_v30 = vld [vmem:[%s3235_s1 + $0x158] sm:$0xff] }
  0x47   : > { %626 = vst [vmem:[#allocation2 + $0x3c] sm:$0xf] %v2081_v20  ;;  %v2556_v31 = vld [vmem:[#allocation2 + $0x4c] sm:$0xf]  ;;  %v2152_v32 = vld [vmem:[#allocation2 + $0x6c] sm:$0xf0] }
  0x48   : > { %282 = vst [vmem:[#allocation2 + $0xdc] sm:$0xf] %v2046_v27  ;;  %v2166_v33 = vld [vmem:[#allocation2 + $0x58] sm:$0xf]  ;;  %v2562_v34 = vld [vmem:[#allocation2 + $0x78] sm:$0xf0]  ;;  %v2155_v42 = vor.u32 %v2556_v31, %v2152_v32 }
  0x49   : > { %1636 = vmatpush.bf16.msrb.mxu1 %v2591_v51  ;;  %1723 = vmatpush.bf16.msrb.mxu0 %v2615_v57  ;;  %283 = vst [vmem:[#allocation2 + $0x100] sm:$0xf] %v2047_v28  ;;  %v2230_v35 = vld [vmem:[#allocation2 + $0xe0] sm:$0xf]  ;;  %v2579_v36 = vld [vmem:[#allocation2 + $0x100] sm:$0xf0]  ;;  %v2167_v43 = vor.u32 %v2562_v34, %v2166_v33 }
  0x4a   : > { %1781 = vmatpush.bf16.msrb.mxu2 %v2631_v25  ;;  %1809 = vmatpush.bf16.msrb.mxu3 %v2640_v26  ;;  %v2625_v38 = vld [vmem:[%s3235_s1 + $0x150] sm:$0xff]  ;;  %v2575_v39 = vld [vmem:[#allocation2 + $0xe4] sm:$0xf]  ;;  %v2062_v40 = vld [vmem:[%s2812_s9 + $0x108] sm:$0xf]  ;;  %v2231_v46 = vor.u32 %v2579_v36, %v2230_v35 }
  0x4b   : > { %v2063_v41 = vld [vmem:[%s2812_s9 + $0x110] sm:$0xf]  ;;  %v2232_v44 = vld [vmem:[#allocation2 + $0x104] sm:$0xf0]  ;;  %467 = vst [vmem:[#allocation2 + $0xe8] sm:$0xf] %v2062_v40 }
  0x4c   : > { %1637 = vmatmul.bf16.vlgmr.msrb.gmra.mxu1 %v2119_v9  ;;  %1724 = vmatmul.bf16.vlgmr.msrb.gmra.mxu0 %v2131_v10  ;;  %v2088_v45 = vld [vmem:[%s2812_s9 + $0x50] sm:$0xf]  ;;  %468 = vst [vmem:[#allocation2 + $0x10c] sm:$0xf] %v2063_v41  ;;  %v2089_v47 = vld [vmem:[%s2812_s9 + $0x58] sm:$0xf]  ;;  %v2235_v54 = vor.u32 %v2575_v39, %v2232_v44 }
  0x4d   : > { %1745 = vmatpush.bf16.msra.mxu1 %v2630_v52  ;;  %1832 = vmatpush.bf16.msra.mxu0 %v3006_v61  ;;  %v2082_v48 = vld [vmem:[%s2812_s9 + $0x18] sm:$0xf]  ;;  %644 = vst [vmem:[#allocation2 + $0x1c] sm:$0xf] %v2088_v45  ;;  %v2083_v49 = vld [vmem:[%s2812_s9 + $0x20] sm:$0xf] }
  0x4e   : > { %1705 = vmatmul.bf16.gmra.mxu3 %v2199_v21  ;;  %2686 = vmatpush.bf16.msra.mxu2 %v3006_v61  ;;  %v2064_v50 = vld [vmem:[%s2812_s9 + $0x90] sm:$0xf]  ;;  %645 = vst [vmem:[#allocation2 + $0x40] sm:$0xf] %v2089_v47  ;;  %v2066_v51 = vld [vmem:[%s2812_s9 + $0x98] sm:$0xf] }
  0x4f   : > { %1676 = vmatmul.bf16.gmra.mxu2 %v2195_v14  ;;  %v486_v52 = vshrl.u32 %v2064_v50, 16  ;;  %v489_v53 = vshll.u32 %v2064_v50, 16  ;;  %v2624_v55 = vld [vmem:[%s3235_s1 + $0x148] sm:$0xff]  ;;  %v2639_v56 = vld [vmem:[%s3235_s1 + $0x1c0] sm:$0xff]  ;;  %v2650_v57 = vld [vmem:[%s3235_s1 + $0x218] sm:$0xff]  ;;  %v500_v58 = vshrl.u32 %v2066_v51, 16 }
  0x50   : > { %627 = vst [vmem:[#allocation2 + $0x60] sm:$0xf] %v2082_v48  ;;  %1810 = vmatpush.bf16.msrb.mxu3 %v2639_v56  ;;  %v3084_v60 = vld [vmem:[%s3235_s1 + $0x210] sm:$0xff]  ;;  %v2067_v62 = vld [vmem:[%s2812_s9 + $0x9c] sm:$0x1]  ;;  %v2623_v0 = vld [vmem:[%s3235_s1 + $0x140] sm:$0xff] }
  0x51   : > { %1746 = vmatpush.bf16.msra.mxu1 %v2629_v4  ;;  %1833 = vmatpush.bf16.msra.mxu0 %v2653_v12  ;;  %628 = vst [vmem:[#allocation2 + $0x84] sm:$0xf] %v2083_v49  ;;  %v488_v59 = vrot.slane %v486_v52, 4  ;;  %v2065_v61 = vld [vmem:[%s2812_s9 + $0x94] sm:$0x1]  ;;  %v491_v63 = vrot.slane %v489_v53, 5 }
  0x52   : > { %2687 = vmatpush.bf16.msra.mxu2 %v2653_v12  ;;  %v495_v1 = vshll.u32 %v2065_v61, 16  ;;  %v502_v2 = vrot.slane %v500_v58, 4  ;;  %v503_v3 = vshll.u32 %v2066_v51, 16  ;;  %v509_v4 = vshll.u32 %v2067_v62, 16  ;;  %v2096_v6 = vld [vmem:[%s2812_s9 + $0x8] sm:$0xf] }
  0x53   : > { %v492_v5 = vor.u32 %v491_v63, %v488_v59  ;;  %v2098_v9 = vld [vmem:[%s2812_s9 + $0x10] sm:$0xf]  ;;  %v3098_v10 = vld [vmem:[%s3235_s1 + $0x208] sm:$0xff]  ;;  %v669_v13 = vshrl.u32 %v2096_v6, 16  ;;  %v2565_v14 = vld [vmem:[#allocation2 + $0x94] sm:$0xf] }
  0x54   : > { %v497_v7 = vrot.slane %v495_v1, 5  ;;  %v505_v8 = vrot.slane %v503_v3, 5  ;;  %v2097_v12 = vld [vmem:[%s2812_s9 + $0xc] sm:$0x1]  ;;  %v2188_v15 = vld [vmem:[#allocation2 + $0xb4] sm:$0xf0] }
  0x55   : > { %1747 = vmatpush.bf16.msra.mxu1 %v2628_v18  ;;  %1834 = vmatpush.bf16.msra.mxu0 %v3037_v23  ;;  %v493_v11 = vrot.slane %v492_v5, 4  ;;  %v2202_v16 = vld [vmem:[#allocation2 + $0xa0] sm:$0xf]  ;;  %v511_v18 = vrot.slane %v509_v4, 5  ;;  %v2099_v19 = vld [vmem:[%s2812_s9 + $0x14] sm:$0x1] }
  0x56   : > { %2688 = vmatpush.bf16.msra.mxu2 %v3037_v23  ;;  %v506_v17 = vor.u32 %v505_v8, %v502_v2  ;;  %v672_v20 = vshll.u32 %v2096_v6, 16  ;;  %v678_v21 = vshll.u32 %v2097_v12, 16  ;;  %v2571_v22 = vld [vmem:[#allocation2 + $0xc0] sm:$0xf0]  ;;  %v683_v25 = vshrl.u32 %v2098_v9, 16 }
  0x57   : > { %v498_v23 = vsel %vm2846_vm2, %v493_v11, %v497_v7  ;;  %v686_v26 = vshll.u32 %v2098_v9, 16  ;;  %v2138_v27 = vld [vmem:[#allocation2 + $0x18] sm:$0xf]  ;;  %v2554_v31 = vld [vmem:[#allocation2 + $0x38] sm:$0xf0]  ;;  %v2647_v58 = vld [vmem:[%s3235_s1 + $0x200] sm:$0xff] }
  0x58   : > { %v507_v28 = vrot.slane %v506_v17, 4  ;;  %605 = vst [vmem:[#allocation2 + $0x14] sm:$0xf] %v498_v23  ;;  %v685_v32 = vrot.slane %v683_v25, 4  ;;  %v2550_v34 = vld [vmem:[#allocation2 + $0x1c] sm:$0xf]  ;;  %v2139_v47 = vor.u32 %v2554_v31, %v2138_v27 }
  0x59   : > { %1748 = vmatpush.bf16.msra.mxu1 %v2627_v24  ;;  %1835 = vmatpush.bf16.msra.mxu0 %v3054_v29  ;;  %v671_v24 = vrot.slane %v669_v13, 4  ;;  %v688_v33 = vrot.slane %v686_v26, 5  ;;  %v2140_v35 = vld [vmem:[#allocation2 + $0x3c] sm:$0xf0]  ;;  %v2091_v39 = vld [vmem:[%s2812_s9 + $0x68] sm:$0xf] }
  0x5a   : > { %2689 = vmatpush.bf16.msra.mxu2 %v3054_v29  ;;  %v692_v29 = vshll.u32 %v2099_v19, 16  ;;  %v512_v36 = vsel %vm2846_vm2, %v507_v28, %v511_v18  ;;  %v680_v41 = vrot.slane %v678_v21, 5  ;;  %v2084_v49 = vld [vmem:[%s2812_s9 + $0x28] sm:$0xf]  ;;  %647 = vst [vmem:[#allocation2 + $0x88] sm:$0xf] %v2091_v39 }
  0x5b   : > { %606 = vst [vmem:[#allocation2 + $0x38] sm:$0xf] %v512_v36  ;;  %v689_v44 = vor.u32 %v688_v33, %v685_v32  ;;  %v2085_v52 = vld [vmem:[%s2812_s9 + $0x30] sm:$0xf]  ;;  %v2069_v62 = vld [vmem:[%s2812_s9 + $0xa4] sm:$0x1] }
  0x5c   : > { %1642 = vmatmul.bf16.gmra.mxu1 %v2155_v42  ;;  %1729 = vmatmul.bf16.gmra.mxu0 %v2167_v43  ;;  %v2191_v42 = vor.u32 %v2565_v14, %v2188_v15  ;;  %v2203_v43 = vor.u32 %v2571_v22, %v2202_v16  ;;  %v694_v45 = vrot.slane %v692_v29, 5  ;;  %629 = vst [vmem:[#allocation2 + $0xa8] sm:$0xf] %v2084_v49  ;;  %v2071_v63 = vld [vmem:[%s2812_s9 + $0xac] sm:$0x1] }
  0x5d   : > { %1749 = vmatpush.bf16.msra.mxu1 %v2626_v30  ;;  %1836 = vmatpush.bf16.msra.mxu0 %v2650_v57  ;;  %v674_v30 = vrot.slane %v672_v20, 5  ;;  %v690_v51 = vrot.slane %v689_v44, 4  ;;  %630 = vst [vmem:[#allocation2 + $0xcc] sm:$0xf] %v2085_v52  ;;  %v537_v3 = vshll.u32 %v2071_v63, 16 }
  0x5e   : > { %1710 = vmatmul.bf16.gmra.mxu3 %v2235_v54  ;;  %2690 = vmatpush.bf16.msra.mxu2 %v2650_v57  ;;  %v2143_v57 = vor.u32 %v2550_v34, %v2140_v35  ;;  %v2100_v7 = vld [vmem:[%s2812_s9 + $0x18] sm:$0xf]  ;;  %v2102_v9 = vld [vmem:[%s2812_s9 + $0x20] sm:$0xf]  ;;  %v2101_v12 = vld [vmem:[%s2812_s9 + $0x1c] sm:$0x1] }
  0x5f   : > { %1681 = vmatmul.bf16.gmra.mxu2 %v2231_v46  ;;  %v675_v40 = vor.u32 %v674_v30, %v671_v24  ;;  %v2068_v46 = vld [vmem:[%s2812_s9 + $0xa0] sm:$0xf]  ;;  %v695_v59 = vsel %vm2846_vm2, %v690_v51, %v694_v45  ;;  %v2103_v13 = vld [vmem:[%s2812_s9 + $0x24] sm:$0x1]  ;;  %v2574_v14 = vld [vmem:[#allocation2 + $0xdc] sm:$0xf] }
  0x60   : > { %v514_v50 = vshrl.u32 %v2068_v46, 16  ;;  %v517_v53 = vshll.u32 %v2068_v46, 16  ;;  %789 = vst [vmem:[#allocation2 + $0x44] sm:$0xf] %v695_v59  ;;  %v2224_v15 = vld [vmem:[#allocation2 + $0xfc] sm:$0xf0] }
  0x61   : > { %1750 = vmatpush.bf16.msra.mxu1 %v2625_v38  ;;  %1837 = vmatpush.bf16.msra.mxu0 %v3084_v60  ;;  %v2090_v38 = vld [vmem:[%s2812_s9 + $0x60] sm:$0xf]  ;;  %v676_v48 = vrot.slane %v675_v40, 4  ;;  %v539_v17 = vrot.slane %v537_v3, 5  ;;  %v697_v18 = vshrl.u32 %v2100_v7, 16  ;;  %v700_v19 = vshll.u32 %v2100_v7, 16 }
  0x62   : > { %646 = vst [vmem:[#allocation2 + $0x64] sm:$0xf] %v2090_v38  ;;  %v516_v56 = vrot.slane %v514_v50, 4  ;;  %2691 = vmatpush.bf16.msra.mxu2 %v3084_v60  ;;  %v519_v61 = vrot.slane %v517_v53, 5  ;;  %v706_v20 = vshll.u32 %v2101_v12, 16  ;;  %v711_v21 = vshrl.u32 %v2102_v9, 16 }
  0x63   : > { %v681_v54 = vsel %vm2846_vm2, %v676_v48, %v680_v41  ;;  %v714_v22 = vshll.u32 %v2102_v9, 16  ;;  %v720_v23 = vshll.u32 %v2103_v13, 16  ;;  %v2580_v24 = vld [vmem:[#allocation2 + $0x108] sm:$0xf0]  ;;  %v699_v26 = vrot.slane %v697_v18, 4 }
  0x64   : > { %788 = vst [vmem:[#allocation2 + $0x20] sm:$0xf] %v681_v54  ;;  %v520_v60 = vor.u32 %v519_v61, %v516_v56  ;;  %v702_v27 = vrot.slane %v700_v19, 5  ;;  %v2174_v28 = vld [vmem:[#allocation2 + $0x60] sm:$0xf]  ;;  %v713_v31 = vrot.slane %v711_v21, 4  ;;  %v2227_v41 = vor.u32 %v2574_v14, %v2224_v15 }
  0x65   : > { %1751 = vmatpush.bf16.msra.mxu1 %v2624_v55  ;;  %1838 = vmatpush.bf16.msra.mxu0 %v3098_v10  ;;  %v2070_v55 = vld [vmem:[%s2812_s9 + $0xa8] sm:$0xf]  ;;  %v2563_v30 = vld [vmem:[#allocation2 + $0x80] sm:$0xf0]  ;;  %v716_v32 = vrot.slane %v714_v22, 5  ;;  %v708_v39 = vrot.slane %v706_v20, 5 }
  0x66   : > { %v528_v1 = vshrl.u32 %v2070_v55, 16  ;;  %v531_v2 = vshll.u32 %v2070_v55, 16  ;;  %2692 = vmatpush.bf16.msra.mxu2 %v3098_v10  ;;  %v521_v4 = vrot.slane %v520_v60, 4  ;;  %v2238_v10 = vld [vmem:[#allocation2 + $0xe8] sm:$0xf]  ;;  %v703_v38 = vor.u32 %v702_v27, %v699_v26 }
  0x67   : > { %v2176_v29 = vld [vmem:[#allocation2 + $0x84] sm:$0xf0]  ;;  %v2092_v35 = vld [vmem:[%s2812_s9 + $0x70] sm:$0xf]  ;;  %v2093_v36 = vld [vmem:[%s2812_s9 + $0x78] sm:$0xf]  ;;  %v2175_v46 = vor.u32 %v2563_v30, %v2174_v28 }
  0x68   : > { %v530_v6 = vrot.slane %v528_v1, 4  ;;  %v533_v8 = vrot.slane %v531_v2, 5  ;;  %v722_v40 = vrot.slane %v720_v23, 5  ;;  %v2072_v44 = vld [vmem:[%s2812_s9 + $0xb0] sm:$0xf] }
  0x69   : > { %1752 = vmatpush.bf16.msra.mxu1 %v2623_v0  ;;  %1839 = vmatpush.bf16.msra.mxu0 %v2647_v58  ;;  %v523_v0 = vshll.u32 %v2069_v62, 16  ;;  %v2559_v33 = vld [vmem:[#allocation2 + $0x64] sm:$0xf]  ;;  %v2074_v45 = vld [vmem:[%s2812_s9 + $0xb8] sm:$0xf]  ;;  %v542_v49 = vshrl.u32 %v2072_v44, 16 }
  0x6a   : > { %v534_v16 = vor.u32 %v533_v8, %v530_v6  ;;  %2693 = vmatpush.bf16.msra.mxu2 %v2647_v58  ;;  %648 = vst [vmem:[#allocation2 + $0xac] sm:$0xf] %v2092_v35  ;;  %v2086_v48 = vld [vmem:[%s2812_s9 + $0x38] sm:$0xf]  ;;  %v545_v51 = vshll.u32 %v2072_v44, 16  ;;  %v556_v55 = vshrl.u32 %v2074_v45, 16  ;;  %v2179_v56 = vor.u32 %v2559_v33, %v2176_v29 }
  0x6b   : > { %v525_v5 = vrot.slane %v523_v0, 5  ;;  %649 = vst [vmem:[#allocation2 + $0xd0] sm:$0xf] %v2093_v36  ;;  %v2087_v53 = vld [vmem:[%s2812_s9 + $0x40] sm:$0xf]  ;;  %v544_v54 = vrot.slane %v542_v49, 4 }
  0x6c   : > { %1647 = vmatmul.bf16.gmra.mxu1 %v2191_v42  ;;  %1734 = vmatmul.bf16.gmra.mxu0 %v2203_v43  ;;  %v535_v25 = vrot.slane %v534_v16, 4  ;;  %v2239_v42 = vor.u32 %v2580_v24, %v2238_v10  ;;  %v717_v43 = vor.u32 %v716_v32, %v713_v31  ;;  %631 = vst [vmem:[#allocation2 + $0xf0] sm:$0xf] %v2086_v48  ;;  %v2073_v58 = vld [vmem:[%s2812_s9 + $0xb4] sm:$0x1]  ;;  %v547_v61 = vrot.slane %v545_v51, 5 }
  0x6d   : > { %v526_v11 = vsel %vm2846_vm2, %v521_v4, %v525_v5  ;;  %v2075_v59 = vld [vmem:[%s2812_s9 + $0xbc] sm:$0x1]  ;;  %v551_v62 = vshll.u32 %v2073_v58, 16  ;;  %632 = vst [vmem:[#allocation2 + $0x114] sm:$0xf] %v2087_v53  ;;  %v558_v63 = vrot.slane %v556_v55, 4 }
  0x6e   : > { %1811 = vmatmul.bf16.vlgmr.msrb.gmra.mxu3 %v2143_v57  ;;  %607 = vst [vmem:[#allocation2 + $0x5c] sm:$0xf] %v526_v11  ;;  %v540_v34 = vsel %vm2846_vm2, %v535_v25, %v539_v17  ;;  %v718_v50 = vrot.slane %v717_v43, 4  ;;  %v559_v60 = vshll.u32 %v2074_v45, 16  ;;  %v565_v0 = vshll.u32 %v2075_v59, 16 }
  0x6f   : > { %1782 = vmatmul.bf16.vlgmr.msrb.gmra.mxu2 %v2139_v47  ;;  %608 = vst [vmem:[#allocation2 + $0x80] sm:$0xf] %v540_v34  ;;  %v704_v47 = vrot.slane %v703_v38, 4  ;;  %v548_v1 = vor.u32 %v547_v61, %v544_v54  ;;  %v553_v2 = vrot.slane %v551_v62, 5  ;;  %v2104_v3 = vld [vmem:[%s2812_s9 + $0x28] sm:$0xf] }
  0x70   : > { %v723_v57 = vsel %vm2846_vm2, %v718_v50, %v722_v40  ;;  %v561_v4 = vrot.slane %v559_v60, 5  ;;  %v2106_v5 = vld [vmem:[%s2812_s9 + $0x30] sm:$0xf]  ;;  %v725_v7 = vshrl.u32 %v2104_v3, 16  ;;  %v728_v8 = vshll.u32 %v2104_v3, 16 }
  0x71   : > { %v709_v52 = vsel %vm2846_vm2, %v704_v47, %v708_v39  ;;  %791 = vst [vmem:[#allocation2 + $0x8c] sm:$0xf] %v723_v57  ;;  %v549_v6 = vrot.slane %v548_v1, 4  ;;  %v739_v9 = vshrl.u32 %v2106_v5, 16  ;;  %v2549_v11 = vld [vmem:[#allocation2 + $0x14] sm:$0xf] }
  0x72   : > { %790 = vst [vmem:[#allocation2 + $0x68] sm:$0xf] %v709_v52  ;;  %v2132_v12 = vld [vmem:[#allocation2 + $0x34] sm:$0xf0]  ;;  %v2146_v13 = vld [vmem:[#allocation2 + $0x20] sm:$0xf]  ;;  %v562_v15 = vor.u32 %v561_v4, %v558_v63 }
  0x73   : > { %v2555_v14 = vld [vmem:[#allocation2 + $0x40] sm:$0xf0]  ;;  %v567_v16 = vrot.slane %v565_v0, 5  ;;  %v2105_v17 = vld [vmem:[%s2812_s9 + $0x2c] sm:$0x1]  ;;  %v554_v18 = vsel %vm2846_vm2, %v549_v6, %v553_v2  ;;  %v727_v10 = vrot.slane %v725_v7, 4  ;;  %v2135_v38 = vor.u32 %v2549_v11, %v2132_v12 }
  0x74   : > { %v2107_v19 = vld [vmem:[%s2812_s9 + $0x34] sm:$0x1]  ;;  %v730_v20 = vrot.slane %v728_v8, 5  ;;  %v734_v21 = vshll.u32 %v2105_v17, 16  ;;  %v2210_v22 = vld [vmem:[#allocation2 + $0xa8] sm:$0xf]  ;;  %v2147_v39 = vor.u32 %v2555_v14, %v2146_v13 }
  0x75   : > { %v2572_v23 = vld [vmem:[#allocation2 + $0xc8] sm:$0xf0]  ;;  %v563_v24 = vrot.slane %v562_v15, 4  ;;  %609 = vst [vmem:[#allocation2 + $0xa4] sm:$0xf] %v554_v18  ;;  %v741_v27 = vrot.slane %v739_v9, 4 }
  0x76   : > { %v731_v25 = vor.u32 %v730_v20, %v727_v10  ;;  %v736_v26 = vrot.slane %v734_v21, 5  ;;  %v742_v28 = vshll.u32 %v2106_v5, 16  ;;  %v2108_v30 = vld [vmem:[%s2812_s9 + $0x38] sm:$0xf]  ;;  %v2568_v31 = vld [vmem:[#allocation2 + $0xac] sm:$0xf] }
  0x77   : > { %v2212_v32 = vld [vmem:[#allocation2 + $0xcc] sm:$0xf0]  ;;  %v568_v33 = vsel %vm2846_vm2, %v563_v24, %v567_v16  ;;  %v748_v29 = vshll.u32 %v2107_v19, 16  ;;  %v2109_v34 = vld [vmem:[%s2812_s9 + $0x3c] sm:$0x1]  ;;  %v753_v36 = vshrl.u32 %v2108_v30, 16 }
  0x78   : > { %v2110_v35 = vld [vmem:[%s2812_s9 + $0x40] sm:$0xf]  ;;  %610 = vst [vmem:[#allocation2 + $0xc8] sm:$0xf] %v568_v33  ;;  %v744_v43 = vrot.slane %v742_v28, 5  ;;  %v756_v48 = vshll.u32 %v2108_v30, 16  ;;  %v2215_v55 = vor.u32 %v2568_v31, %v2212_v32 }
  0x79   : > { %v2094_v40 = vld [vmem:[%s2812_s9 + $0x80] sm:$0xf]  ;;  %v750_v44 = vrot.slane %v748_v29, 5  ;;  %v755_v45 = vrot.slane %v753_v36, 4  ;;  %v2111_v47 = vld [vmem:[%s2812_s9 + $0x44] sm:$0x1] }
  0x7a   : > { %650 = vst [vmem:[#allocation2 + $0xf4] sm:$0xf] %v2094_v40  ;;  %v762_v49 = vshll.u32 %v2109_v34, 16  ;;  %v745_v51 = vor.u32 %v744_v43, %v741_v27  ;;  %v767_v52 = vshrl.u32 %v2110_v35, 16  ;;  %v770_v53 = vshll.u32 %v2110_v35, 16 }
  0x7b   : > { %v2076_v54 = vld [vmem:[%s2812_s9 + $0xc0] sm:$0xf]  ;;  %v2078_v58 = vld [vmem:[%s2812_s9 + $0xc8] sm:$0xf]  ;;  %v776_v63 = vshll.u32 %v2111_v47, 16 }
  0x7c   : > { %1652 = vmatmul.bf16.gmra.mxu1 %v2227_v41  ;;  %1739 = vmatmul.bf16.gmra.mxu0 %v2239_v42  ;;  %v2095_v41 = vld [vmem:[%s2812_s9 + $0x88] sm:$0xf]  ;;  %v732_v42 = vrot.slane %v731_v25, 4  ;;  %v764_v57 = vrot.slane %v762_v49, 5  ;;  %v746_v59 = vrot.slane %v745_v51, 4  ;;  %v769_v61 = vrot.slane %v767_v52, 4 }
  0x7d   : > { %651 = vst [vmem:[#allocation2 + $0x118] sm:$0xf] %v2095_v41  ;;  %v772_v62 = vrot.slane %v770_v53, 5  ;;  %v2077_v60 = vld [vmem:[%s2812_s9 + $0xc4] sm:$0x1]  ;;  %v570_v1 = vshrl.u32 %v2076_v54, 16 }
  0x7e   : > { %1816 = vmatmul.bf16.gmra.mxu3 %v2179_v56  ;;  %v737_v50 = vsel %vm2846_vm2, %v732_v42, %v736_v26  ;;  %v758_v56 = vrot.slane %v756_v48, 5  ;;  %v573_v2 = vshll.u32 %v2076_v54, 16  ;;  %v579_v3 = vshll.u32 %v2077_v60, 16  ;;  %v2079_v7 = vld [vmem:[%s2812_s9 + $0xcc] sm:$0x1] }
  0x7f   : > { %1787 = vmatmul.bf16.gmra.mxu2 %v2175_v46  ;;  %v2211_v46 = vor.u32 %v2572_v23, %v2210_v22  ;;  %792 = vst [vmem:[#allocation2 + $0xb0] sm:$0xf] %v737_v50  ;;  %v751_v4 = vsel %vm2846_vm2, %v746_v59, %v750_v44  ;;  %v773_v5 = vor.u32 %v772_v62, %v769_v61  ;;  %v778_v6 = vrot.slane %v776_v63, 5  ;;  %v2558_v21 = vld [vmem:[#allocation2 + $0x5c] sm:$0xf] }
  0x80   : > { %v759_v0 = vor.u32 %v758_v56, %v755_v45  ;;  %v584_v8 = vshrl.u32 %v2078_v58, 16  ;;  %793 = vst [vmem:[#allocation2 + $0xd4] sm:$0xf] %v751_v4  ;;  %v572_v11 = vrot.slane %v570_v1, 4  ;;  %v575_v13 = vrot.slane %v573_v2, 5 }
  0x81   : > { %v774_v12 = vrot.slane %v773_v5, 4  ;;  %v587_v16 = vshll.u32 %v2078_v58, 16  ;;  %v593_v17 = vshll.u32 %v2079_v7, 16  ;;  %v581_v10 = vrot.slane %v579_v3, 5  ;;  %v2168_v22 = vld [vmem:[#allocation2 + $0x7c] sm:$0xf0] }
  0x82   : > { %v760_v9 = vrot.slane %v759_v0, 4  ;;  %v586_v15 = vrot.slane %v584_v8, 4  ;;  %v576_v19 = vor.u32 %v575_v13, %v572_v11  ;;  %v2182_v24 = vld [vmem:[#allocation2 + $0x68] sm:$0xf]  ;;  %v2564_v25 = vld [vmem:[#allocation2 + $0x88] sm:$0xf0]  ;;  %v2171_v33 = vor.u32 %v2558_v21, %v2168_v22 }
  0x83   : > { %v779_v18 = vsel %vm2846_vm2, %v774_v12, %v778_v6  ;;  %v589_v20 = vrot.slane %v587_v16, 5  ;;  %v595_v27 = vrot.slane %v593_v17, 5  ;;  %v2246_v28 = vld [vmem:[#allocation2 + $0xf0] sm:$0xf]  ;;  %v2581_v30 = vld [vmem:[#allocation2 + $0x110] sm:$0xf0]  ;;  %v2183_v29 = vor.u32 %v2564_v25, %v2182_v24 }
  0x84   : > { %v765_v14 = vsel %vm2846_vm2, %v760_v9, %v764_v57  ;;  %795 = vst [vmem:[#allocation2 + $0x11c] sm:$0xf] %v779_v18  ;;  %v577_v23 = vrot.slane %v576_v19, 4  ;;  %v2247_v34 = vor.u32 %v2581_v30, %v2246_v28  ;;  %v2577_v35 = vld [vmem:[#allocation2 + $0xf4] sm:$0xf] }
  0x85   : > { %794 = vst [vmem:[#allocation2 + $0xf8] sm:$0xf] %v765_v14  ;;  %v590_v26 = vor.u32 %v589_v20, %v586_v15  ;;  %v2248_v36 = vld [vmem:[#allocation2 + $0x114] sm:$0xf0]  ;;  %v2567_v40 = vld [vmem:[#allocation2 + $0xa4] sm:$0xf] }
  0x86   : > { %v582_v31 = vsel %vm2846_vm2, %v577_v23, %v581_v10  ;;  %v2204_v41 = vld [vmem:[#allocation2 + $0xc4] sm:$0xf0]  ;;  %v2218_v42 = vld [vmem:[#allocation2 + $0xb0] sm:$0xf]  ;;  %v2719_v1 = vld [vmem:[%s3236_s2] ss:$0 sm:$0xff] }
  0x87   : > { %v591_v32 = vrot.slane %v590_v26, 4  ;;  %611 = vst [vmem:[#allocation2 + $0xec] sm:$0xf] %v582_v31  ;;  %v2573_v43 = vld [vmem:[#allocation2 + $0xd0] sm:$0xf0] }
  0x88   : > { %v2219_v47 = vor.u32 %v2573_v43, %v2218_v42 }
  0x8b   : > { %v2582_v45 = vld [vmem:[#allocation2 + $0x118] sm:$0xf0] }
  0x8c   : > { %1753 = vmatmul.bf16.vlgmr.msra.gmra.mxu1 %v2135_v38  ;;  %1840 = vmatmul.bf16.vlgmr.msra.gmra.mxu0 %v2147_v39  ;;  %v596_v38 = vsel %vm2846_vm2, %v591_v32, %v595_v27  ;;  %v2251_v39 = vor.u32 %v2577_v35, %v2248_v36  ;;  %v2254_v44 = vld [vmem:[#allocation2 + $0xf8] sm:$0xf] }
  0x8d   : > { %612 = vst [vmem:[#allocation2 + $0x110] sm:$0xf] %v596_v38  ;;  %v2255_v50 = vor.u32 %v2582_v45, %v2254_v44 }
  0x8e   : > { %1821 = vmatmul.bf16.gmra.mxu3 %v2215_v55  ;;  %v2576_v54 = vld [vmem:[#allocation2 + $0xec] sm:$0xf] }
  0x8f   : > { %1792 = vmatmul.bf16.gmra.mxu2 %v2211_v46  ;;  %v2207_v46 = vor.u32 %v2567_v40, %v2204_v41 }
  0x94   : > { %v2240_v55 = vld [vmem:[#allocation2 + $0x10c] sm:$0xf0] }
  0x95   : > { %v2243_v56 = vor.u32 %v2576_v54, %v2240_v55 }
  0x9c   : > { %1758 = vmatmul.bf16.gmra.mxu1 %v2171_v33  ;;  %1845 = vmatmul.bf16.gmra.mxu0 %v2183_v29 }
  0x9e   : > { %1826 = vmatmul.bf16.gmra.mxu3 %v2251_v39 }
  0x9f   : > { %1797 = vmatmul.bf16.gmra.mxu2 %v2247_v34 }
  0xa9   : > { %v1619_v48 = vpop.f32.mrf.mxu1  ;;  %v1609_v49 = vpop.f32.mrf.mxu0 }
  0xaa   : > { %v1610_v2 = vadd.f32 %v2719_v1, %v1609_v49  ;;  %v1620_v29 = vadd.f32 %v2719_v1, %v1619_v48 }
  0xac   : > { %1763 = vmatmul.bf16.gmra.mxu1 %v2207_v46  ;;  %1850 = vmatmul.bf16.gmra.mxu0 %v2219_v47 }
  0xaf   : > { %1855 = vmatmul.bf16.vlgmr.msra.gmra.mxu2 %v2255_v50 }
  0xb1   : > { %v1621_v51 = vpop.f32.mrf.mxu1  ;;  %v1611_v52 = vpop.f32.mrf.mxu0 }
  0xb2   : > { %v1667_v37 = vpop.f32.mrf.mxu2  ;;  %v1696_v53 = vpop.f32.mrf.mxu3  ;;  %v1612_v11 = vadd.f32 %v2719_v1, %v1611_v52  ;;  %v1622_v42 = vadd.f32 %v2719_v1, %v1621_v51 }
  0xb9   : > { %v1624_v58 = vpop.f32.mrf.mxu1  ;;  %v1614_v59 = vpop.f32.mrf.mxu0 }
  0xba   : > { %v1669_v57 = vpop.f32.mrf.mxu2  ;;  %v3175_v61 = vpop.f32.mrf.mxu3  ;;  %v1615_v19 = vadd.f32 %v2719_v1, %v1614_v59  ;;  %v1625_v48 = vadd.f32 %v2719_v1, %v1624_v58 }
  0xbc   : > { %1768 = vmatmul.bf16.gmra.mxu1 %v2243_v56 }
  0xc1   : > { %v1626_v63 = vpop.f32.mrf.mxu1  ;;  %v1616_v60 = vpop.f32.mrf.mxu0 }
  0xc2   : > { %v1672_v62 = vpop.f32.mrf.mxu2  ;;  %v1701_v0 = vpop.f32.mrf.mxu3  ;;  %v1617_v25 = vadd.f32 %v2719_v1, %v1616_v60  ;;  %v1627_v51 = vadd.f32 %v2719_v1, %v1626_v63 }
  0xc9   : > { %v1638_v4 = vpop.f32.mrf.mxu1  ;;  %v1725_v5 = vpop.f32.mrf.mxu0 }
  0xca   : > { %v1674_v3 = vpop.f32.mrf.mxu2  ;;  %v1639_v6 = vadd.f32 %v1638_v4, %v1610_v2  ;;  %v3180_v8 = vpop.f32.mrf.mxu3 }
  0xcc   : > { %v1668_v7 = vadd.f32 %v1667_v37, %v1639_v6 }
  0xce   : > { %v1697_v9 = vadd.f32 %v1696_v53, %v1668_v7 }
  0xd0   : > { %v1726_v12 = vadd.f32 %v1725_v5, %v1697_v9 }
  0xd1   : > { %v1640_v14 = vpop.f32.mrf.mxu1  ;;  %v1727_v15 = vpop.f32.mrf.mxu0 }
  0xd2   : > { %v1677_v13 = vpop.f32.mrf.mxu2  ;;  %v1641_v16 = vadd.f32 %v1640_v14, %v1612_v11  ;;  %v1706_v18 = vpop.f32.mrf.mxu3 }
  0xd4   : > { %v1670_v17 = vadd.f32 %v1669_v57, %v1641_v16 }
  0xd6   : > { %v1699_v9 = vadd.f32 %v3175_v61, %v1670_v17 }
  0xd9   : > { %v1643_v20 = vpop.f32.mrf.mxu1  ;;  %v1730_v21 = vpop.f32.mrf.mxu0 }
  0xda   : > { %v1679_v10 = vpop.f32.mrf.mxu2  ;;  %v1644_v22 = vadd.f32 %v1643_v20, %v1615_v19  ;;  %v3184_v28 = vpop.f32.mrf.mxu3 }
  0xdc   : > { %v1673_v23 = vadd.f32 %v1672_v62, %v1644_v22 }
  0xde   : > { %v1702_v24 = vadd.f32 %v1701_v0, %v1673_v23 }
  0xe0   : > { %v3182_v26 = vadd.f32 %v1730_v21, %v1702_v24 }
  0xe1   : > { %v1645_v30 = vpop.f32.mrf.mxu1  ;;  %v3186_v31 = vpop.f32.mrf.mxu0 }
  0xe2   : > { %v1682_v27 = vpop.f32.mrf.mxu2  ;;  %v1646_v32 = vadd.f32 %v1645_v30, %v1617_v25  ;;  %v1711_v39 = vpop.f32.mrf.mxu3 }
  0xe4   : > { %v1675_v33 = vadd.f32 %v1674_v3, %v1646_v32 }
  0xe9   : > { %v1648_v35 = vpop.f32.mrf.mxu1  ;;  %v1735_v36 = vpop.f32.mrf.mxu0 }
  0xea   : > { %v1684_v34 = vpop.f32.mrf.mxu2  ;;  %v1649_v38 = vadd.f32 %v1648_v35, %v1620_v29  ;;  %v3194_v50 = vpop.f32.mrf.mxu3 }
  0xec   : > { %v1678_v40 = vadd.f32 %v1677_v13, %v1649_v38  ;;  %v1728_v13 = vadd.f32 %v1727_v15, %v1699_v9  ;;  %v1704_v15 = vadd.f32 %v3180_v8, %v1675_v33 }
  0xee   : > { %v1707_v41 = vadd.f32 %v1706_v18, %v1678_v40  ;;  %v1733_v29 = vadd.f32 %v3186_v31, %v1704_v15 }
  0xf0   : > { %v3188_v43 = vadd.f32 %v1735_v36, %v1707_v41 }
  0xf1   : > { %v1650_v45 = vpop.f32.mrf.mxu1  ;;  %v3190_v46 = vpop.f32.mrf.mxu0 }
  0xf2   : > { %v1783_v44 = vpop.f32.mrf.mxu2  ;;  %v1651_v47 = vadd.f32 %v1650_v45, %v1622_v42  ;;  %v1812_v57 = vpop.f32.mrf.mxu3 }
  0xf4   : > { %v3192_v49 = vadd.f32 %v1679_v10, %v1651_v47 }
  0xf6   : > { %v1709_v31 = vadd.f32 %v3184_v28, %v3192_v49 }
  0xf9   : > { %v1653_v52 = vpop.f32.mrf.mxu1  ;;  %v1740_v53 = vpop.f32.mrf.mxu0 }
  0xfa   : > { %v1785_v37 = vpop.f32.mrf.mxu2  ;;  %v1654_v54 = vadd.f32 %v1653_v52, %v1625_v48  ;;  %v1814_v58 = vpop.f32.mrf.mxu3 }
  0xfc   : > { %v1683_v55 = vadd.f32 %v1682_v27, %v1654_v54 }
  0xfe   : > { %v1712_v56 = vadd.f32 %v1711_v39, %v1683_v55 }
 0x100   : > { %v3196_v59 = vadd.f32 %v1740_v53, %v1712_v56  ;;  %v1738_v53 = vadd.f32 %v3190_v46, %v1709_v31 }
 0x101   : > { %v1655_v60 = vpop.f32.mrf.mxu1  ;;  %v3198_v0 = vpop.f32.mrf.mxu0 }
 0x102   : > { %v1788_v62 = vpop.f32.mrf.mxu2  ;;  %v1656_v2 = vadd.f32 %v1655_v60, %v1627_v51  ;;  %v1817_v18 = vpop.f32.mrf.mxu3 }
 0x104   : > { %v3200_v3 = vadd.f32 %v1684_v34, %v1656_v2 }
 0x106   : > { %v1714_v46 = vadd.f32 %v3194_v50, %v3200_v3 }
 0x109   : > { %v1754_v4 = vpop.f32.mrf.mxu1  ;;  %v1841_v5 = vpop.f32.mrf.mxu0 }
 0x10a   : > { %v1755_v6 = vadd.f32 %v1754_v4, %v1726_v12  ;;  %v1790_v7 = vpop.f32.mrf.mxu2  ;;  %v1819_v27 = vpop.f32.mrf.mxu3 }
 0x10c   : > { %v1784_v11 = vadd.f32 %v1783_v44, %v1755_v6 }
 0x10e   : > { %v1813_v14 = vadd.f32 %v1812_v57, %v1784_v11 }
 0x110   : > { %v1842_v20 = vadd.f32 %v1841_v5, %v1813_v14 }
 0x111   : > { %v1756_v63 = vpop.f32.mrf.mxu1  ;;  %v1843_v1 = vpop.f32.mrf.mxu0 }
 0x112   : > { %v1757_v16 = vadd.f32 %v1756_v63, %v1728_v13  ;;  %v1793_v10 = vpop.f32.mrf.mxu2  ;;  %v1861_v24 = vmax.f32 %v1842_v20, 0.0  ;;  %v1822_v41 = vpop.f32.mrf.mxu3  ;;  %v1743_v13 = vadd.f32 %v3198_v0, %v1714_v46 }
 0x114   : > { %v1786_v19 = vadd.f32 %v1785_v37, %v1757_v16 }
 0x116   : > { %v1815_v21 = vadd.f32 %v1814_v58, %v1786_v19 }
 0x118   : > { %v1844_v22 = vadd.f32 %v1843_v1, %v1815_v21 }
 0x119   : > { %v1759_v23 = vpop.f32.mrf.mxu1  ;;  %v1846_v12 = vpop.f32.mrf.mxu0 }
 0x11a   : > { %v1862_v25 = vmax.f32 %v1844_v22, 0.0  ;;  %v1760_v61 = vadd.f32 %v1759_v23, %v3182_v26  ;;  %v1795_v32 = vpop.f32.mrf.mxu2  ;;  %v1824_v54 = vpop.f32.mrf.mxu3 }
 0x11c   : > { %v2658_v17 = vpack.c.bf16 %v1862_v25, %v1861_v24  ;;  %v1789_v30 = vadd.f32 %v1788_v62, %v1760_v61 }
 0x11e   : > { %2659 = vst [vmem:[%s3209_s10] sm:$0xff] %v2658_v17   ;;  %v1818_v36 = vadd.f32 %v1817_v18, %v1789_v30 }
 0x120   : > { %v1847_v39 = vadd.f32 %v1846_v12, %v1818_v36 }
 0x121   : > { %v1761_v34 = vpop.f32.mrf.mxu1  ;;  %v1848_v35 = vpop.f32.mrf.mxu0 }
 0x122   : > { %v1762_v26 = vadd.f32 %v1761_v34, %v1733_v29  ;;  %v1798_v44 = vpop.f32.mrf.mxu2  ;;  %v1863_v8 = vmax.f32 %v1847_v39, 0.0  ;;  %v1827_v49 = vpop.f32.mrf.mxu3 }
 0x124   : > { %v1791_v38 = vadd.f32 %v1790_v7, %v1762_v26 }
 0x126   : > { %v1820_v40 = vadd.f32 %v1819_v27, %v1791_v38 }
 0x128   : > { %v1849_v42 = vadd.f32 %v1848_v35, %v1820_v40 }
 0x129   : > { %v1764_v45 = vpop.f32.mrf.mxu1  ;;  %v1851_v48 = vpop.f32.mrf.mxu0 }
 0x12a   : > { %v1864_v33 = vmax.f32 %v1849_v42, 0.0  ;;  %v1765_v47 = vadd.f32 %v1764_v45, %v3188_v43  ;;  %v1800_v51 = vpop.f32.mrf.mxu2  ;;  %v1829_v18 = vpop.f32.mrf.mxu3 }
 0x12c   : > { %v2663_v37 = vpack.c.bf16 %v1864_v33, %v1863_v8  ;;  %v1794_v52 = vadd.f32 %v1793_v10, %v1765_v47 }
 0x12e   : > { %2675 = vst [vmem:[%s3209_s10 + $0x8] sm:$0xff] %v2663_v37   ;;  %v1823_v56 = vadd.f32 %v1822_v41, %v1794_v52 }
 0x130   : > { %v1852_v2 = vadd.f32 %v1851_v48, %v1823_v56 }
 0x131   : > { %v1766_v55 = vpop.f32.mrf.mxu1  ;;  %v1853_v60 = vpop.f32.mrf.mxu0 }
 0x132   : > { %v1767_v57 = vadd.f32 %v1766_v55, %v1738_v53  ;;  %v1865_v5 = vmax.f32 %v1852_v2, 0.0  ;;  %v1856_v9 = vpop.f32.mrf.mxu2 }
 0x134   : > { %v1796_v62 = vadd.f32 %v1795_v32, %v1767_v57 }
 0x136   : > { %v1825_v58 = vadd.f32 %v1824_v54, %v1796_v62 }
 0x138   : > { %v1854_v43 = vadd.f32 %v1853_v60, %v1825_v58 }
 0x139   : > { %v1769_v4 = vpop.f32.mrf.mxu1 }
 0x13a   : > { %v1866_v6 = vmax.f32 %v1854_v43, 0.0  ;;  %v1770_v28 = vadd.f32 %v1769_v4, %v3196_v59  ;;  %v1858_v20 = vpop.f32.mrf.mxu2 }
 0x13c   : > { %v2668_v7 = vpack.c.bf16 %v1866_v6, %v1865_v5  ;;  %v1799_v11 = vadd.f32 %v1798_v44, %v1770_v28 }
 0x13e   : > { %2676 = vst [vmem:[%s3209_s10 + $0x10] sm:$0xff] %v2668_v7   ;;  %v1828_v1 = vadd.f32 %v1827_v49, %v1799_v11 }
 0x140   : > { %v1857_v19 = vadd.f32 %v1856_v9, %v1828_v1 }
 0x141   : > { %v1771_v63 = vpop.f32.mrf.mxu1 }
 0x142   : > { %v1772_v14 = vadd.f32 %v1771_v63, %v1743_v13  ;;  %v1867_v21 = vmax.f32 %v1857_v19, 0.0 }
 0x144   : > { %v1801_v16 = vadd.f32 %v1800_v51, %v1772_v14 }
 0x146   : > { %v1830_v10 = vadd.f32 %v1829_v18, %v1801_v16 }
 0x148   : > { %v1859_v59 = vadd.f32 %v1858_v20, %v1830_v10 }
 0x14a   : > { %v1868_v22 = vmax.f32 %v1859_v59, 0.0 }
 0x14c   : > { %v2673_v23 = vpack.c.bf16 %v1868_v22, %v1867_v21 }
 0x14e   : > { %2677 = vst [vmem:[%s3209_s10 + $0x18] sm:$0xff] %v2673_v23  }
 0x14f PF: > { %s13_s14 = sadd.s32 1, %s2742_s14   ;;  %s3240_s12 = smov %s2738_s13 }
 0x150   : > { %p10_p6 = scmp.ge.s32.totalorder %s13_s14, 4   ;;  %s3241_s13 = smov %s3243_s15 }
 0x152   :  { %12 = sbr.rel (!%p10_p6) target bundleno = 2 (0x2), region = 74 }

// kernel: resnet_stage_forward.7
= control target key start
LH: loop header
LB: loop body
LE: loop exit
PB: predicated region body
PF: predicated region fallthrough
CT: control target
= control target key end

     0   :  { %s478_s1 = inlined_call_operand.vmem [shape: bf16[128,128], index: 1, kind: input, shape index: {}]   ;;  %s479_s2 = inlined_call_operand.vmem [shape: f32[1,128], index: 2, kind: input, shape index: {}]   ;;  %s480_s0 = inlined_call_operand.vmem [shape: bf16[128,128], index: 0, kind: input, shape index: {}]   ;;  %s481_s3 = inlined_call_operand.vmem [shape: bf16[128,128], index: 3, kind: output, shape index: {}]  }
   0x1   :  { %v310_v0 = vld [vmem:[%s478_s1 + $0x38] sm:$0xff]  ;;  %v309_v1 = vld [vmem:[%s478_s1 + $0x30] sm:$0xff]  ;;  %v308_v2 = vld [vmem:[%s478_s1 + $0x28] sm:$0xff] }
   0x2   :  { %146 = vmatpush.bf16.msra.mxu0 %v310_v0  ;;  %358 = vmatpush.bf16.msra.mxu1 %v310_v0  ;;  %v307_v3 = vld [vmem:[%s478_s1 + $0x20] sm:$0xff]  ;;  %v306_v4 = vld [vmem:[%s478_s1 + $0x18] sm:$0xff]  ;;  %v305_v5 = vld [vmem:[%s478_s1 + $0x10] sm:$0xff] }
   0x3   :  { %359 = vmatpush.bf16.msra.mxu2 %v310_v0  ;;  %360 = vmatpush.bf16.msra.mxu3 %v310_v0  ;;  %v304_v6 = vld [vmem:[%s478_s1 + $0x8] sm:$0xff]  ;;  %v303_v7 = vld [vmem:[%s478_s1] sm:$0xff]  ;;  %v297_v9 = vld [vmem:[%s480_s0 + $0x10] sm:$0xff] }
   0x4   :  { %v295_v8 = vld [vmem:[%s480_s0] sm:$0xff]  ;;  %v301_v11 = vld [vmem:[%s480_s0 + $0x30] sm:$0xff]  ;;  %v296_v12 = vld [vmem:[%s480_s0 + $0x8] sm:$0xff] }
   0x5   :  { %v299_v10 = vld [vmem:[%s480_s0 + $0x20] sm:$0xff]  ;;  %v298_v13 = vld [vmem:[%s480_s0 + $0x18] sm:$0xff]  ;;  %v300_v14 = vld [vmem:[%s480_s0 + $0x28] sm:$0xff] }
   0x6   :  { %147 = vmatpush.bf16.msra.mxu0 %v309_v1  ;;  %361 = vmatpush.bf16.msra.mxu1 %v309_v1  ;;  %v302_v15 = vld [vmem:[%s480_s0 + $0x38] sm:$0xff]  ;;  %v382_v18 = vld [vmem:[%s479_s2] ss:$0 sm:$0xff] }
   0x7   :  { %362 = vmatpush.bf16.msra.mxu2 %v309_v1  ;;  %363 = vmatpush.bf16.msra.mxu3 %v309_v1 }
   0xa   :  { %148 = vmatpush.bf16.msra.mxu0 %v308_v2  ;;  %364 = vmatpush.bf16.msra.mxu1 %v308_v2 }
   0xb   :  { %365 = vmatpush.bf16.msra.mxu2 %v308_v2  ;;  %366 = vmatpush.bf16.msra.mxu3 %v308_v2 }
   0xe   :  { %149 = vmatpush.bf16.msra.mxu0 %v307_v3  ;;  %367 = vmatpush.bf16.msra.mxu1 %v307_v3 }
   0xf   :  { %368 = vmatpush.bf16.msra.mxu2 %v307_v3  ;;  %369 = vmatpush.bf16.msra.mxu3 %v307_v3 }
  0x12   :  { %150 = vmatpush.bf16.msra.mxu0 %v306_v4  ;;  %370 = vmatpush.bf16.msra.mxu1 %v306_v4 }
  0x13   :  { %371 = vmatpush.bf16.msra.mxu2 %v306_v4  ;;  %372 = vmatpush.bf16.msra.mxu3 %v306_v4 }
  0x16   :  { %151 = vmatpush.bf16.msra.mxu0 %v305_v5  ;;  %373 = vmatpush.bf16.msra.mxu1 %v305_v5 }
  0x17   :  { %374 = vmatpush.bf16.msra.mxu2 %v305_v5  ;;  %375 = vmatpush.bf16.msra.mxu3 %v305_v5 }
  0x1a   :  { %152 = vmatpush.bf16.msra.mxu0 %v304_v6  ;;  %376 = vmatpush.bf16.msra.mxu1 %v304_v6 }
  0x1b   :  { %377 = vmatpush.bf16.msra.mxu2 %v304_v6  ;;  %378 = vmatpush.bf16.msra.mxu3 %v304_v6 }
  0x1e   :  { %153 = vmatpush.bf16.msra.mxu0 %v303_v7  ;;  %379 = vmatpush.bf16.msra.mxu1 %v303_v7 }
  0x1f   :  { %380 = vmatpush.bf16.msra.mxu2 %v303_v7  ;;  %381 = vmatpush.bf16.msra.mxu3 %v303_v7 }
  0x21   :  { %154 = vmatmul.bf16.vlgmr.msra.gmra.mxu0 %v295_v8  ;;  %164 = vmatmul.bf16.vlgmr.msra.gmra.mxu1 %v297_v9 }
  0x22   :  { %174 = vmatmul.bf16.vlgmr.msra.gmra.mxu2 %v299_v10  ;;  %184 = vmatmul.bf16.vlgmr.msra.gmra.mxu3 %v301_v11 }
  0x31   :  { %159 = vmatmul.bf16.gmra.mxu0 %v296_v12  ;;  %169 = vmatmul.bf16.gmra.mxu1 %v298_v13 }
  0x32   :  { %179 = vmatmul.bf16.gmra.mxu2 %v300_v14  ;;  %189 = vmatmul.bf16.gmra.mxu3 %v302_v15 }
  0x9e   :  { %v155_v16 = vpop.f32.mrf.mxu0  ;;  %v165_v17 = vpop.f32.mrf.mxu1 }
  0x9f   :  { %v156_v23 = vadd.f32 %v382_v18, %v155_v16  ;;  %v166_v24 = vadd.f32 %v382_v18, %v165_v17 }
  0xa5   :  { %v175_v19 = vpop.f32.mrf.mxu2  ;;  %v185_v20 = vpop.f32.mrf.mxu3 }
  0xa6   :  { %v157_v21 = vpop.f32.mrf.mxu0  ;;  %v167_v22 = vpop.f32.mrf.mxu1  ;;  %v176_v31 = vadd.f32 %v382_v18, %v175_v19  ;;  %v186_v32 = vadd.f32 %v382_v18, %v185_v20 }
  0xa7   :  { %v158_v25 = vadd.f32 %v382_v18, %v157_v21  ;;  %v168_v26 = vadd.f32 %v382_v18, %v167_v22 }
  0xa9   :  { %v314_v27 = vpack.c.bf16 %v158_v25, %v156_v23  ;;  %v324_v28 = vpack.c.bf16 %v168_v26, %v166_v24 }
  0xab   :  { %315 = vst [vmem:[%s481_s3] sm:$0xff] %v314_v27  }
  0xac   :  { %352 = vst [vmem:[%s481_s3 + $0x10] sm:$0xff] %v324_v28  }
  0xad   :  { %v177_v29 = vpop.f32.mrf.mxu2  ;;  %v187_v30 = vpop.f32.mrf.mxu3 }
  0xae   :  { %v178_v33 = vadd.f32 %v382_v18, %v177_v29  ;;  %v188_v34 = vadd.f32 %v382_v18, %v187_v30  ;;  %v160_v35 = vpop.f32.mrf.mxu0  ;;  %v170_v36 = vpop.f32.mrf.mxu1 }
  0xaf   :  { %v161_v43 = vadd.f32 %v382_v18, %v160_v35  ;;  %v171_v44 = vadd.f32 %v382_v18, %v170_v36 }
  0xb0   :  { %v334_v37 = vpack.c.bf16 %v178_v33, %v176_v31  ;;  %v344_v38 = vpack.c.bf16 %v188_v34, %v186_v32 }
  0xb2   :  { %354 = vst [vmem:[%s481_s3 + $0x20] sm:$0xff] %v334_v37  }
  0xb3   :  { %356 = vst [vmem:[%s481_s3 + $0x30] sm:$0xff] %v344_v38  }
  0xb5   :  { %v180_v39 = vpop.f32.mrf.mxu2  ;;  %v190_v40 = vpop.f32.mrf.mxu3 }
  0xb6   :  { %v162_v41 = vpop.f32.mrf.mxu0  ;;  %v172_v42 = vpop.f32.mrf.mxu1  ;;  %v181_v51 = vadd.f32 %v382_v18, %v180_v39  ;;  %v191_v52 = vadd.f32 %v382_v18, %v190_v40 }
  0xb7   :  { %v163_v45 = vadd.f32 %v382_v18, %v162_v41  ;;  %v173_v46 = vadd.f32 %v382_v18, %v172_v42 }
  0xb9   :  { %v319_v47 = vpack.c.bf16 %v163_v45, %v161_v43  ;;  %v329_v48 = vpack.c.bf16 %v173_v46, %v171_v44 }
  0xbb   :  { %351 = vst [vmem:[%s481_s3 + $0x8] sm:$0xff] %v319_v47  }
  0xbc   :  { %353 = vst [vmem:[%s481_s3 + $0x18] sm:$0xff] %v329_v48  }
  0xbd   :  { %v182_v49 = vpop.f32.mrf.mxu2  ;;  %v192_v50 = vpop.f32.mrf.mxu3 }
  0xbe   :  { %v183_v53 = vadd.f32 %v382_v18, %v182_v49  ;;  %v193_v54 = vadd.f32 %v382_v18, %v192_v50 }
  0xc0   :  { %v339_v55 = vpack.c.bf16 %v183_v53, %v181_v51  ;;  %v349_v56 = vpack.c.bf16 %v193_v54, %v191_v52 }
  0xc2   :  { %355 = vst [vmem:[%s481_s3 + $0x28] sm:$0xff] %v339_v55  }
  0xc3   :  { %357 = vst [vmem:[%s481_s3 + $0x38] sm:$0xff] %v349_v56  }

// kernel: resnet_stage_forward.11
= control target key start
LH: loop header
LB: loop body
LE: loop exit
PB: predicated region body
PF: predicated region fallthrough
CT: control target
= control target key end

     0   :  { %s494_s1 = inlined_call_operand.vmem [shape: bf16[128,128], index: 1, kind: input, shape index: {}]   ;;  %s495_s2 = inlined_call_operand.vmem [shape: f32[1,128], index: 2, kind: input, shape index: {}]   ;;  %s496_s0 = inlined_call_operand.vmem [shape: bf16[128,128], index: 0, kind: input, shape index: {}]   ;;  %s497_s3 = inlined_call_operand.vmem [shape: bf16[128,128], index: 3, kind: output, shape index: {}]  }
   0x1   :  { %v326_v0 = vld [vmem:[%s494_s1 + $0x38] sm:$0xff]  ;;  %v325_v1 = vld [vmem:[%s494_s1 + $0x30] sm:$0xff]  ;;  %v324_v2 = vld [vmem:[%s494_s1 + $0x28] sm:$0xff] }
   0x2   :  { %146 = vmatpush.bf16.msra.mxu0 %v326_v0  ;;  %374 = vmatpush.bf16.msra.mxu1 %v326_v0  ;;  %v323_v3 = vld [vmem:[%s494_s1 + $0x20] sm:$0xff]  ;;  %v322_v4 = vld [vmem:[%s494_s1 + $0x18] sm:$0xff]  ;;  %v321_v5 = vld [vmem:[%s494_s1 + $0x10] sm:$0xff] }
   0x3   :  { %375 = vmatpush.bf16.msra.mxu2 %v326_v0  ;;  %376 = vmatpush.bf16.msra.mxu3 %v326_v0  ;;  %v320_v6 = vld [vmem:[%s494_s1 + $0x8] sm:$0xff]  ;;  %v319_v7 = vld [vmem:[%s494_s1] sm:$0xff]  ;;  %v313_v9 = vld [vmem:[%s496_s0 + $0x10] sm:$0xff] }
   0x4   :  { %v311_v8 = vld [vmem:[%s496_s0] sm:$0xff]  ;;  %v317_v11 = vld [vmem:[%s496_s0 + $0x30] sm:$0xff]  ;;  %v312_v12 = vld [vmem:[%s496_s0 + $0x8] sm:$0xff] }
   0x5   :  { %v315_v10 = vld [vmem:[%s496_s0 + $0x20] sm:$0xff]  ;;  %v314_v13 = vld [vmem:[%s496_s0 + $0x18] sm:$0xff]  ;;  %v316_v14 = vld [vmem:[%s496_s0 + $0x28] sm:$0xff] }
   0x6   :  { %147 = vmatpush.bf16.msra.mxu0 %v325_v1  ;;  %377 = vmatpush.bf16.msra.mxu1 %v325_v1  ;;  %v318_v15 = vld [vmem:[%s496_s0 + $0x38] sm:$0xff]  ;;  %v398_v18 = vld [vmem:[%s495_s2] ss:$0 sm:$0xff] }
   0x7   :  { %378 = vmatpush.bf16.msra.mxu2 %v325_v1  ;;  %379 = vmatpush.bf16.msra.mxu3 %v325_v1 }
   0xa   :  { %148 = vmatpush.bf16.msra.mxu0 %v324_v2  ;;  %380 = vmatpush.bf16.msra.mxu1 %v324_v2 }
   0xb   :  { %381 = vmatpush.bf16.msra.mxu2 %v324_v2  ;;  %382 = vmatpush.bf16.msra.mxu3 %v324_v2 }
   0xe   :  { %149 = vmatpush.bf16.msra.mxu0 %v323_v3  ;;  %383 = vmatpush.bf16.msra.mxu1 %v323_v3 }
   0xf   :  { %384 = vmatpush.bf16.msra.mxu2 %v323_v3  ;;  %385 = vmatpush.bf16.msra.mxu3 %v323_v3 }
  0x12   :  { %150 = vmatpush.bf16.msra.mxu0 %v322_v4  ;;  %386 = vmatpush.bf16.msra.mxu1 %v322_v4 }
  0x13   :  { %387 = vmatpush.bf16.msra.mxu2 %v322_v4  ;;  %388 = vmatpush.bf16.msra.mxu3 %v322_v4 }
  0x16   :  { %151 = vmatpush.bf16.msra.mxu0 %v321_v5  ;;  %389 = vmatpush.bf16.msra.mxu1 %v321_v5 }
  0x17   :  { %390 = vmatpush.bf16.msra.mxu2 %v321_v5  ;;  %391 = vmatpush.bf16.msra.mxu3 %v321_v5 }
  0x1a   :  { %152 = vmatpush.bf16.msra.mxu0 %v320_v6  ;;  %392 = vmatpush.bf16.msra.mxu1 %v320_v6 }
  0x1b   :  { %393 = vmatpush.bf16.msra.mxu2 %v320_v6  ;;  %394 = vmatpush.bf16.msra.mxu3 %v320_v6 }
  0x1e   :  { %153 = vmatpush.bf16.msra.mxu0 %v319_v7  ;;  %395 = vmatpush.bf16.msra.mxu1 %v319_v7 }
  0x1f   :  { %396 = vmatpush.bf16.msra.mxu2 %v319_v7  ;;  %397 = vmatpush.bf16.msra.mxu3 %v319_v7 }
  0x21   :  { %154 = vmatmul.bf16.vlgmr.msra.gmra.mxu0 %v311_v8  ;;  %164 = vmatmul.bf16.vlgmr.msra.gmra.mxu1 %v313_v9 }
  0x22   :  { %174 = vmatmul.bf16.vlgmr.msra.gmra.mxu2 %v315_v10  ;;  %184 = vmatmul.bf16.vlgmr.msra.gmra.mxu3 %v317_v11 }
  0x31   :  { %159 = vmatmul.bf16.gmra.mxu0 %v312_v12  ;;  %169 = vmatmul.bf16.gmra.mxu1 %v314_v13 }
  0x32   :  { %179 = vmatmul.bf16.gmra.mxu2 %v316_v14  ;;  %189 = vmatmul.bf16.gmra.mxu3 %v318_v15 }
  0x9e   :  { %v155_v16 = vpop.f32.mrf.mxu0  ;;  %v165_v17 = vpop.f32.mrf.mxu1 }
  0x9f   :  { %v156_v19 = vadd.f32 %v398_v18, %v155_v16  ;;  %v166_v20 = vadd.f32 %v398_v18, %v165_v17 }
  0xa1   :  { %v195_v27 = vmax.f32 %v156_v19, 0.0  ;;  %v199_v28 = vmax.f32 %v166_v20, 0.0 }
  0xa5   :  { %v175_v21 = vpop.f32.mrf.mxu2  ;;  %v185_v22 = vpop.f32.mrf.mxu3 }
  0xa6   :  { %v157_v23 = vpop.f32.mrf.mxu0  ;;  %v167_v24 = vpop.f32.mrf.mxu1  ;;  %v176_v33 = vadd.f32 %v398_v18, %v175_v21  ;;  %v186_v34 = vadd.f32 %v398_v18, %v185_v22 }
  0xa7   :  { %v158_v25 = vadd.f32 %v398_v18, %v157_v23  ;;  %v168_v26 = vadd.f32 %v398_v18, %v167_v24 }
  0xa8   :  { %v203_v41 = vmax.f32 %v176_v33, 0.0  ;;  %v207_v42 = vmax.f32 %v186_v34, 0.0 }
  0xa9   :  { %v196_v29 = vmax.f32 %v158_v25, 0.0  ;;  %v200_v30 = vmax.f32 %v168_v26, 0.0 }
  0xab   :  { %v330_v31 = vpack.c.bf16 %v196_v29, %v195_v27  ;;  %v340_v32 = vpack.c.bf16 %v200_v30, %v199_v28 }
  0xad   :  { %331 = vst [vmem:[%s497_s3] sm:$0xff] %v330_v31   ;;  %v177_v35 = vpop.f32.mrf.mxu2  ;;  %v187_v36 = vpop.f32.mrf.mxu3 }
  0xae   :  { %368 = vst [vmem:[%s497_s3 + $0x10] sm:$0xff] %v340_v32   ;;  %v178_v37 = vadd.f32 %v398_v18, %v177_v35  ;;  %v188_v38 = vadd.f32 %v398_v18, %v187_v36  ;;  %v160_v39 = vpop.f32.mrf.mxu0  ;;  %v170_v40 = vpop.f32.mrf.mxu1 }
  0xaf   :  { %v161_v47 = vadd.f32 %v398_v18, %v160_v39  ;;  %v171_v48 = vadd.f32 %v398_v18, %v170_v40 }
  0xb0   :  { %v204_v43 = vmax.f32 %v178_v37, 0.0  ;;  %v208_v44 = vmax.f32 %v188_v38, 0.0 }
  0xb1   :  { %v197_v55 = vmax.f32 %v161_v47, 0.0  ;;  %v201_v56 = vmax.f32 %v171_v48, 0.0 }
  0xb2   :  { %v350_v45 = vpack.c.bf16 %v204_v43, %v203_v41  ;;  %v360_v46 = vpack.c.bf16 %v208_v44, %v207_v42 }
  0xb4   :  { %370 = vst [vmem:[%s497_s3 + $0x20] sm:$0xff] %v350_v45  }
  0xb5   :  { %372 = vst [vmem:[%s497_s3 + $0x30] sm:$0xff] %v360_v46   ;;  %v180_v49 = vpop.f32.mrf.mxu2  ;;  %v190_v50 = vpop.f32.mrf.mxu3 }
  0xb6   :  { %v162_v51 = vpop.f32.mrf.mxu0  ;;  %v172_v52 = vpop.f32.mrf.mxu1  ;;  %v181_v61 = vadd.f32 %v398_v18, %v180_v49  ;;  %v191_v62 = vadd.f32 %v398_v18, %v190_v50 }
  0xb7   :  { %v163_v53 = vadd.f32 %v398_v18, %v162_v51  ;;  %v173_v54 = vadd.f32 %v398_v18, %v172_v52 }
  0xb8   :  { %v205_v3 = vmax.f32 %v181_v61, 0.0  ;;  %v209_v4 = vmax.f32 %v191_v62, 0.0 }
  0xb9   :  { %v198_v57 = vmax.f32 %v163_v53, 0.0  ;;  %v202_v58 = vmax.f32 %v173_v54, 0.0 }
  0xbb   :  { %v335_v59 = vpack.c.bf16 %v198_v57, %v197_v55  ;;  %v345_v60 = vpack.c.bf16 %v202_v58, %v201_v56 }
  0xbd   :  { %367 = vst [vmem:[%s497_s3 + $0x8] sm:$0xff] %v335_v59   ;;  %v182_v63 = vpop.f32.mrf.mxu2  ;;  %v192_v0 = vpop.f32.mrf.mxu3 }
  0xbe   :  { %369 = vst [vmem:[%s497_s3 + $0x18] sm:$0xff] %v345_v60   ;;  %v183_v1 = vadd.f32 %v398_v18, %v182_v63  ;;  %v193_v2 = vadd.f32 %v398_v18, %v192_v0 }
  0xc0   :  { %v206_v5 = vmax.f32 %v183_v1, 0.0  ;;  %v210_v6 = vmax.f32 %v193_v2, 0.0 }
  0xc2   :  { %v355_v7 = vpack.c.bf16 %v206_v5, %v205_v3  ;;  %v365_v8 = vpack.c.bf16 %v210_v6, %v209_v4 }
  0xc4   :  { %371 = vst [vmem:[%s497_s3 + $0x28] sm:$0xff] %v355_v7  }
  0xc5   :  { %373 = vst [vmem:[%s497_s3 + $0x38] sm:$0xff] %v365_v8  }

// kernel: resnet_stage_forward.10
= control target key start
LH: loop header
LB: loop body
LE: loop exit
PB: predicated region body
PF: predicated region fallthrough
CT: control target
= control target key end

     0   :  { %s631_s1 = inlined_call_operand.vmem [shape: bf16[128,128], index: 1, kind: input, shape index: {}]   ;;  %s632_s2 = inlined_call_operand.vmem [shape: f32[1,128], index: 2, kind: input, shape index: {}]   ;;  %s633_s0 = inlined_call_operand.vmem [shape: bf16[128,128], index: 0, kind: input, shape index: {}]   ;;  %s634_s3 = inlined_call_operand.vmem [shape: bf16[128,128], index: 3, kind: input, shape index: {}]   ;;  %s635_s4 = inlined_call_operand.vmem [shape: bf16[128,128], index: 4, kind: output, shape index: {}]  }
   0x1   :  { %v377_v0 = vld [vmem:[%s631_s1 + $0x38] sm:$0xff]  ;;  %v376_v1 = vld [vmem:[%s631_s1 + $0x30] sm:$0xff]  ;;  %v375_v2 = vld [vmem:[%s631_s1 + $0x28] sm:$0xff] }
   0x2   :  { %149 = vmatpush.bf16.msra.mxu0 %v377_v0  ;;  %464 = vmatpush.bf16.msra.mxu1 %v377_v0  ;;  %v374_v3 = vld [vmem:[%s631_s1 + $0x20] sm:$0xff]  ;;  %v373_v4 = vld [vmem:[%s631_s1 + $0x18] sm:$0xff]  ;;  %v372_v5 = vld [vmem:[%s631_s1 + $0x10] sm:$0xff] }
   0x3   :  { %465 = vmatpush.bf16.msra.mxu2 %v377_v0  ;;  %466 = vmatpush.bf16.msra.mxu3 %v377_v0  ;;  %v371_v6 = vld [vmem:[%s631_s1 + $0x8] sm:$0xff]  ;;  %v370_v7 = vld [vmem:[%s631_s1] sm:$0xff]  ;;  %v364_v9 = vld [vmem:[%s633_s0 + $0x10] sm:$0xff] }
   0x4   :  { %v362_v8 = vld [vmem:[%s633_s0] sm:$0xff]  ;;  %v368_v11 = vld [vmem:[%s633_s0 + $0x30] sm:$0xff]  ;;  %v363_v12 = vld [vmem:[%s633_s0 + $0x8] sm:$0xff] }
   0x5   :  { %v366_v10 = vld [vmem:[%s633_s0 + $0x20] sm:$0xff]  ;;  %v365_v13 = vld [vmem:[%s633_s0 + $0x18] sm:$0xff]  ;;  %v367_v14 = vld [vmem:[%s633_s0 + $0x28] sm:$0xff] }
   0x6   :  { %150 = vmatpush.bf16.msra.mxu0 %v376_v1  ;;  %467 = vmatpush.bf16.msra.mxu1 %v376_v1  ;;  %v369_v15 = vld [vmem:[%s633_s0 + $0x38] sm:$0xff]  ;;  %v565_v18 = vld [vmem:[%s632_s2] ss:$0 sm:$0xff]  ;;  %v451_v20 = vld [vmem:[%s634_s3 + $0x10] sm:$0xff]  }
   0x7   :  { %468 = vmatpush.bf16.msra.mxu2 %v376_v1  ;;  %469 = vmatpush.bf16.msra.mxu3 %v376_v1  ;;  %v379_v19 = vld [vmem:[%s634_s3] sm:$0xff]   ;;  %v388_v24 = vunpack.c.l.bf16 %v451_v20  ;;  %v389_v28 = vunpack.c.h.bf16 %v451_v20  ;;  %v455_v34 = vld [vmem:[%s634_s3 + $0x30] sm:$0xff]   ;;  %v450_v61 = vld [vmem:[%s634_s3 + $0x8] sm:$0xff]  }
   0x8   :  { %v380_v22 = vunpack.c.l.bf16 %v379_v19  ;;  %v381_v27 = vunpack.c.h.bf16 %v379_v19  ;;  %v453_v33 = vld [vmem:[%s634_s3 + $0x20] sm:$0xff]   ;;  %v404_v42 = vunpack.c.l.bf16 %v455_v34  ;;  %v405_v48 = vunpack.c.h.bf16 %v455_v34  ;;  %v452_v62 = vld [vmem:[%s634_s3 + $0x18] sm:$0xff]  }
   0x9   :  { %v396_v40 = vunpack.c.l.bf16 %v453_v33  ;;  %v397_v47 = vunpack.c.h.bf16 %v453_v33  ;;  %v456_v19 = vld [vmem:[%s634_s3 + $0x38] sm:$0xff]  }
   0xa   :  { %151 = vmatpush.bf16.msra.mxu0 %v375_v2  ;;  %470 = vmatpush.bf16.msra.mxu1 %v375_v2  ;;  %v409_v33 = vunpack.c.h.bf16 %v456_v19 }
   0xb   :  { %471 = vmatpush.bf16.msra.mxu2 %v375_v2  ;;  %472 = vmatpush.bf16.msra.mxu3 %v375_v2 }
   0xe   :  { %152 = vmatpush.bf16.msra.mxu0 %v374_v3  ;;  %473 = vmatpush.bf16.msra.mxu1 %v374_v3 }
   0xf   :  { %474 = vmatpush.bf16.msra.mxu2 %v374_v3  ;;  %475 = vmatpush.bf16.msra.mxu3 %v374_v3 }
  0x12   :  { %153 = vmatpush.bf16.msra.mxu0 %v373_v4  ;;  %476 = vmatpush.bf16.msra.mxu1 %v373_v4 }
  0x13   :  { %477 = vmatpush.bf16.msra.mxu2 %v373_v4  ;;  %478 = vmatpush.bf16.msra.mxu3 %v373_v4  ;;  %v384_v4 = vunpack.c.l.bf16 %v450_v61 }
  0x16   :  { %154 = vmatpush.bf16.msra.mxu0 %v372_v5  ;;  %479 = vmatpush.bf16.msra.mxu1 %v372_v5 }
  0x17   :  { %480 = vmatpush.bf16.msra.mxu2 %v372_v5  ;;  %481 = vmatpush.bf16.msra.mxu3 %v372_v5 }
  0x1a   :  { %155 = vmatpush.bf16.msra.mxu0 %v371_v6  ;;  %482 = vmatpush.bf16.msra.mxu1 %v371_v6 }
  0x1b   :  { %483 = vmatpush.bf16.msra.mxu2 %v371_v6  ;;  %484 = vmatpush.bf16.msra.mxu3 %v371_v6  ;;  %v392_v6 = vunpack.c.l.bf16 %v452_v62 }
  0x1e   :  { %156 = vmatpush.bf16.msra.mxu0 %v370_v7  ;;  %485 = vmatpush.bf16.msra.mxu1 %v370_v7 }
  0x1f   :  { %486 = vmatpush.bf16.msra.mxu2 %v370_v7  ;;  %487 = vmatpush.bf16.msra.mxu3 %v370_v7 }
  0x21   :  { %157 = vmatmul.bf16.vlgmr.msra.gmra.mxu0 %v362_v8  ;;  %167 = vmatmul.bf16.vlgmr.msra.gmra.mxu1 %v364_v9 }
  0x22   :  { %177 = vmatmul.bf16.vlgmr.msra.gmra.mxu2 %v366_v10  ;;  %187 = vmatmul.bf16.vlgmr.msra.gmra.mxu3 %v368_v11  ;;  %v385_v11 = vunpack.c.h.bf16 %v450_v61 }
  0x31   :  { %162 = vmatmul.bf16.gmra.mxu0 %v363_v12  ;;  %172 = vmatmul.bf16.gmra.mxu1 %v365_v13  ;;  %v393_v12 = vunpack.c.h.bf16 %v452_v62 }
  0x32   :  { %182 = vmatmul.bf16.gmra.mxu2 %v367_v14  ;;  %192 = vmatmul.bf16.gmra.mxu3 %v369_v15 }
  0x9e   :  { %v158_v16 = vpop.f32.mrf.mxu0  ;;  %v168_v17 = vpop.f32.mrf.mxu1 }
  0x9f   :  { %v159_v21 = vadd.f32 %v565_v18, %v158_v16  ;;  %v169_v23 = vadd.f32 %v565_v18, %v168_v17  ;;  %v454_v17 = vld [vmem:[%s634_s3 + $0x28] sm:$0xff]  }
  0xa1   :  { %v230_v31 = vadd.f32 %v380_v22, %v159_v21  ;;  %v234_v32 = vadd.f32 %v388_v24, %v169_v23 }
  0xa3   :  { %v246_v43 = vmax.f32 %v230_v31, 0.0  ;;  %v250_v44 = vmax.f32 %v234_v32, 0.0  ;;  %v401_v32 = vunpack.c.h.bf16 %v454_v17 }
  0xa5   :  { %v178_v25 = vpop.f32.mrf.mxu2  ;;  %v188_v26 = vpop.f32.mrf.mxu3 }
  0xa6   :  { %v160_v29 = vpop.f32.mrf.mxu0  ;;  %v170_v30 = vpop.f32.mrf.mxu1  ;;  %v179_v39 = vadd.f32 %v565_v18, %v178_v25  ;;  %v189_v41 = vadd.f32 %v565_v18, %v188_v26  ;;  %v400_v25 = vunpack.c.l.bf16 %v454_v17 }
  0xa7   :  { %v161_v35 = vadd.f32 %v565_v18, %v160_v29  ;;  %v171_v36 = vadd.f32 %v565_v18, %v170_v30 }
  0xa8   :  { %v238_v53 = vadd.f32 %v396_v40, %v179_v39  ;;  %v242_v54 = vadd.f32 %v404_v42, %v189_v41 }
  0xa9   :  { %v231_v37 = vadd.f32 %v381_v27, %v161_v35  ;;  %v235_v38 = vadd.f32 %v389_v28, %v171_v36  ;;  %v408_v27 = vunpack.c.l.bf16 %v456_v19 }
  0xaa   :  { %v254_v63 = vmax.f32 %v238_v53, 0.0  ;;  %v258_v0 = vmax.f32 %v242_v54, 0.0 }
  0xab   :  { %v247_v45 = vmax.f32 %v231_v37, 0.0  ;;  %v251_v46 = vmax.f32 %v235_v38, 0.0 }
  0xad   :  { %v413_v49 = vpack.c.bf16 %v247_v45, %v246_v43  ;;  %v423_v50 = vpack.c.bf16 %v251_v46, %v250_v44  ;;  %v180_v51 = vpop.f32.mrf.mxu2  ;;  %v190_v52 = vpop.f32.mrf.mxu3 }
  0xae   :  { %v181_v55 = vadd.f32 %v565_v18, %v180_v51  ;;  %v191_v56 = vadd.f32 %v565_v18, %v190_v52  ;;  %v163_v57 = vpop.f32.mrf.mxu0  ;;  %v173_v58 = vpop.f32.mrf.mxu1 }
  0xaf   :  { %414 = vst [vmem:[%s635_s4] sm:$0xff] %v413_v49   ;;  %v164_v3 = vadd.f32 %v565_v18, %v163_v57  ;;  %v174_v5 = vadd.f32 %v565_v18, %v173_v58 }
  0xb0   :  { %458 = vst [vmem:[%s635_s4 + $0x10] sm:$0xff] %v423_v50   ;;  %v239_v59 = vadd.f32 %v397_v47, %v181_v55  ;;  %v243_v60 = vadd.f32 %v405_v48, %v191_v56 }
  0xb1   :  { %v232_v15 = vadd.f32 %v384_v4, %v164_v3  ;;  %v236_v16 = vadd.f32 %v392_v6, %v174_v5 }
  0xb2   :  { %v255_v1 = vmax.f32 %v239_v59, 0.0  ;;  %v259_v2 = vmax.f32 %v243_v60, 0.0 }
  0xb3   :  { %v248_v28 = vmax.f32 %v232_v15, 0.0  ;;  %v252_v29 = vmax.f32 %v236_v16, 0.0 }
  0xb4   :  { %v433_v7 = vpack.c.bf16 %v255_v1, %v254_v63  ;;  %v443_v8 = vpack.c.bf16 %v259_v2, %v258_v0 }
  0xb5   :  { %v183_v9 = vpop.f32.mrf.mxu2  ;;  %v193_v10 = vpop.f32.mrf.mxu3 }
  0xb6   :  { %460 = vst [vmem:[%s635_s4 + $0x20] sm:$0xff] %v433_v7   ;;  %v165_v13 = vpop.f32.mrf.mxu0  ;;  %v175_v14 = vpop.f32.mrf.mxu1  ;;  %v184_v24 = vadd.f32 %v565_v18, %v183_v9  ;;  %v194_v26 = vadd.f32 %v565_v18, %v193_v10 }
  0xb7   :  { %462 = vst [vmem:[%s635_s4 + $0x30] sm:$0xff] %v443_v8   ;;  %v166_v20 = vadd.f32 %v565_v18, %v165_v13  ;;  %v176_v21 = vadd.f32 %v565_v18, %v175_v14 }
  0xb8   :  { %v240_v38 = vadd.f32 %v400_v25, %v184_v24  ;;  %v244_v39 = vadd.f32 %v408_v27, %v194_v26 }
  0xb9   :  { %v233_v22 = vadd.f32 %v385_v11, %v166_v20  ;;  %v237_v23 = vadd.f32 %v393_v12, %v176_v21 }
  0xba   :  { %v256_v44 = vmax.f32 %v240_v38, 0.0  ;;  %v260_v45 = vmax.f32 %v244_v39, 0.0 }
  0xbb   :  { %v249_v30 = vmax.f32 %v233_v22, 0.0  ;;  %v253_v31 = vmax.f32 %v237_v23, 0.0 }
  0xbd   :  { %v418_v34 = vpack.c.bf16 %v249_v30, %v248_v28  ;;  %v428_v35 = vpack.c.bf16 %v253_v31, %v252_v29  ;;  %v185_v36 = vpop.f32.mrf.mxu2  ;;  %v195_v37 = vpop.f32.mrf.mxu3 }
  0xbe   :  { %v186_v40 = vadd.f32 %v565_v18, %v185_v36  ;;  %v196_v41 = vadd.f32 %v565_v18, %v195_v37 }
  0xbf   :  { %457 = vst [vmem:[%s635_s4 + $0x8] sm:$0xff] %v418_v34  }
  0xc0   :  { %459 = vst [vmem:[%s635_s4 + $0x18] sm:$0xff] %v428_v35   ;;  %v241_v42 = vadd.f32 %v401_v32, %v186_v40  ;;  %v245_v43 = vadd.f32 %v409_v33, %v196_v41 }
  0xc2   :  { %v257_v46 = vmax.f32 %v241_v42, 0.0  ;;  %v261_v47 = vmax.f32 %v245_v43, 0.0 }
  0xc4   :  { %v438_v48 = vpack.c.bf16 %v257_v46, %v256_v44  ;;  %v448_v49 = vpack.c.bf16 %v261_v47, %v260_v45 }
  0xc6   :  { %461 = vst [vmem:[%s635_s4 + $0x28] sm:$0xff] %v438_v48  }
  0xc7   :  { %463 = vst [vmem:[%s635_s4 + $0x38] sm:$0xff] %v448_v49  }

// kernel: resnet_stage_forward.13
= control target key start
LH: loop header
LB: loop body
LE: loop exit
PB: predicated region body
PF: predicated region fallthrough
CT: control target
= control target key end

     0   :  { %s592_s1 = inlined_call_operand.vmem [shape: bf16[128,128], index: 1, kind: input, shape index: {}]   ;;  %s593_s2 = inlined_call_operand.vmem [shape: f32[1,128], index: 2, kind: input, shape index: {}]   ;;  %s594_s0 = inlined_call_operand.vmem [shape: bf16[128,128], index: 0, kind: input, shape index: {}]   ;;  %s595_s3 = inlined_call_operand.vmem [shape: bf16[128,128], index: 3, kind: input, shape index: {}]   ;;  %s596_s4 = inlined_call_operand.vmem [shape: f32[128,128], index: 4, kind: output, shape index: {}]  }
   0x1   :  { %v361_v0 = vld [vmem:[%s592_s1 + $0x38] sm:$0xff]  ;;  %v360_v1 = vld [vmem:[%s592_s1 + $0x30] sm:$0xff]  ;;  %v359_v2 = vld [vmem:[%s592_s1 + $0x28] sm:$0xff] }
   0x2   :  { %149 = vmatpush.bf16.msra.mxu0 %v361_v0  ;;  %401 = vmatpush.bf16.msra.mxu1 %v361_v0  ;;  %v358_v3 = vld [vmem:[%s592_s1 + $0x20] sm:$0xff]  ;;  %v357_v4 = vld [vmem:[%s592_s1 + $0x18] sm:$0xff]  ;;  %v356_v5 = vld [vmem:[%s592_s1 + $0x10] sm:$0xff] }
   0x3   :  { %402 = vmatpush.bf16.msra.mxu2 %v361_v0  ;;  %403 = vmatpush.bf16.msra.mxu3 %v361_v0  ;;  %v355_v6 = vld [vmem:[%s592_s1 + $0x8] sm:$0xff]  ;;  %v354_v7 = vld [vmem:[%s592_s1] sm:$0xff]  ;;  %v348_v9 = vld [vmem:[%s594_s0 + $0x10] sm:$0xff] }
   0x4   :  { %v346_v8 = vld [vmem:[%s594_s0] sm:$0xff]  ;;  %v352_v11 = vld [vmem:[%s594_s0 + $0x30] sm:$0xff]  ;;  %v347_v12 = vld [vmem:[%s594_s0 + $0x8] sm:$0xff] }
   0x5   :  { %v350_v10 = vld [vmem:[%s594_s0 + $0x20] sm:$0xff]  ;;  %v349_v13 = vld [vmem:[%s594_s0 + $0x18] sm:$0xff]  ;;  %v351_v14 = vld [vmem:[%s594_s0 + $0x28] sm:$0xff] }
   0x6   :  { %150 = vmatpush.bf16.msra.mxu0 %v360_v1  ;;  %404 = vmatpush.bf16.msra.mxu1 %v360_v1  ;;  %v353_v15 = vld [vmem:[%s594_s0 + $0x38] sm:$0xff]  ;;  %v363_v16 = vld [vmem:[%s595_s3] sm:$0xff]   ;;  %v395_v17 = vld [vmem:[%s595_s3 + $0x10] sm:$0xff]  }
   0x7   :  { %405 = vmatpush.bf16.msra.mxu2 %v360_v1  ;;  %406 = vmatpush.bf16.msra.mxu3 %v360_v1  ;;  %v508_v18 = vld [vmem:[%s593_s2] ss:$0 sm:$0xff]  ;;  %v364_v19 = vunpack.c.l.bf16 %v363_v16  ;;  %v372_v20 = vunpack.c.l.bf16 %v395_v17  ;;  %v399_v28 = vld [vmem:[%s595_s3 + $0x30] sm:$0xff]   ;;  %v365_v35 = vunpack.c.h.bf16 %v363_v16  ;;  %v373_v36 = vunpack.c.h.bf16 %v395_v17  ;;  %v394_v49 = vld [vmem:[%s595_s3 + $0x8] sm:$0xff]  }
   0x8   :  { %v397_v27 = vld [vmem:[%s595_s3 + $0x20] sm:$0xff]   ;;  %v388_v32 = vunpack.c.l.bf16 %v399_v28  ;;  %v396_v50 = vld [vmem:[%s595_s3 + $0x18] sm:$0xff]   ;;  %v389_v54 = vunpack.c.h.bf16 %v399_v28  ;;  %v368_v57 = vunpack.c.l.bf16 %v394_v49 }
   0x9   :  { %v380_v31 = vunpack.c.l.bf16 %v397_v27  ;;  %v381_v53 = vunpack.c.h.bf16 %v397_v27  ;;  %v376_v58 = vunpack.c.l.bf16 %v396_v50  ;;  %v377_v16 = vunpack.c.h.bf16 %v396_v50 }
   0xa   :  { %151 = vmatpush.bf16.msra.mxu0 %v359_v2  ;;  %407 = vmatpush.bf16.msra.mxu1 %v359_v2 }
   0xb   :  { %408 = vmatpush.bf16.msra.mxu2 %v359_v2  ;;  %409 = vmatpush.bf16.msra.mxu3 %v359_v2 }
   0xe   :  { %152 = vmatpush.bf16.msra.mxu0 %v358_v3  ;;  %410 = vmatpush.bf16.msra.mxu1 %v358_v3 }
   0xf   :  { %411 = vmatpush.bf16.msra.mxu2 %v358_v3  ;;  %412 = vmatpush.bf16.msra.mxu3 %v358_v3 }
  0x12   :  { %153 = vmatpush.bf16.msra.mxu0 %v357_v4  ;;  %413 = vmatpush.bf16.msra.mxu1 %v357_v4 }
  0x13   :  { %414 = vmatpush.bf16.msra.mxu2 %v357_v4  ;;  %415 = vmatpush.bf16.msra.mxu3 %v357_v4 }
  0x16   :  { %154 = vmatpush.bf16.msra.mxu0 %v356_v5  ;;  %416 = vmatpush.bf16.msra.mxu1 %v356_v5 }
  0x17   :  { %417 = vmatpush.bf16.msra.mxu2 %v356_v5  ;;  %418 = vmatpush.bf16.msra.mxu3 %v356_v5  ;;  %v398_v5 = vld [vmem:[%s595_s3 + $0x28] sm:$0xff]  }
  0x1a   :  { %155 = vmatpush.bf16.msra.mxu0 %v355_v6  ;;  %419 = vmatpush.bf16.msra.mxu1 %v355_v6 }
  0x1b   :  { %420 = vmatpush.bf16.msra.mxu2 %v355_v6  ;;  %421 = vmatpush.bf16.msra.mxu3 %v355_v6  ;;  %v400_v6 = vld [vmem:[%s595_s3 + $0x38] sm:$0xff]  }
  0x1e   :  { %156 = vmatpush.bf16.msra.mxu0 %v354_v7  ;;  %422 = vmatpush.bf16.msra.mxu1 %v354_v7 }
  0x1f   :  { %423 = vmatpush.bf16.msra.mxu2 %v354_v7  ;;  %424 = vmatpush.bf16.msra.mxu3 %v354_v7 }
  0x21   :  { %157 = vmatmul.bf16.vlgmr.msra.gmra.mxu0 %v346_v8  ;;  %167 = vmatmul.bf16.vlgmr.msra.gmra.mxu1 %v348_v9 }
  0x22   :  { %177 = vmatmul.bf16.vlgmr.msra.gmra.mxu2 %v350_v10  ;;  %187 = vmatmul.bf16.vlgmr.msra.gmra.mxu3 %v352_v11  ;;  %v384_v11 = vunpack.c.l.bf16 %v398_v5 }
  0x31   :  { %162 = vmatmul.bf16.gmra.mxu0 %v347_v12  ;;  %172 = vmatmul.bf16.gmra.mxu1 %v349_v13  ;;  %v392_v12 = vunpack.c.l.bf16 %v400_v6 }
  0x32   :  { %182 = vmatmul.bf16.gmra.mxu2 %v351_v14  ;;  %192 = vmatmul.bf16.gmra.mxu3 %v353_v15  ;;  %v369_v15 = vunpack.c.h.bf16 %v394_v49 }
  0x9e   :  { %v158_v21 = vpop.f32.mrf.mxu0  ;;  %v168_v22 = vpop.f32.mrf.mxu1 }
  0x9f   :  { %v159_v23 = vadd.f32 %v508_v18, %v158_v21  ;;  %v169_v24 = vadd.f32 %v508_v18, %v168_v22 }
  0xa1   :  { %v230_v25 = vadd.f32 %v364_v19, %v159_v23  ;;  %v234_v26 = vadd.f32 %v372_v20, %v169_v24 }
  0xa3   :  { %v246_v29 = vmax.f32 %v230_v25, 0.0  ;;  %v250_v30 = vmax.f32 %v234_v26, 0.0 }
  0xa5   :  { %262 = vst [vmem:[%s596_s4] sm:$0xff] %v246_v29  ;;  %v178_v33 = vpop.f32.mrf.mxu2  ;;  %v188_v34 = vpop.f32.mrf.mxu3 }
  0xa6   :  { %266 = vst [vmem:[%s596_s4 + $0x20] sm:$0xff] %v250_v30  ;;  %v179_v37 = vadd.f32 %v508_v18, %v178_v33  ;;  %v189_v38 = vadd.f32 %v508_v18, %v188_v34  ;;  %v160_v39 = vpop.f32.mrf.mxu0  ;;  %v170_v40 = vpop.f32.mrf.mxu1  ;;  %v393_v33 = vunpack.c.h.bf16 %v400_v6 }
  0xa7   :  { %v161_v41 = vadd.f32 %v508_v18, %v160_v39  ;;  %v171_v42 = vadd.f32 %v508_v18, %v170_v40 }
  0xa8   :  { %v238_v43 = vadd.f32 %v380_v31, %v179_v37  ;;  %v242_v44 = vadd.f32 %v388_v32, %v189_v38  ;;  %v385_v32 = vunpack.c.h.bf16 %v398_v5 }
  0xa9   :  { %v231_v45 = vadd.f32 %v365_v35, %v161_v41  ;;  %v235_v46 = vadd.f32 %v373_v36, %v171_v42 }
  0xaa   :  { %v254_v47 = vmax.f32 %v238_v43, 0.0  ;;  %v258_v48 = vmax.f32 %v242_v44, 0.0 }
  0xab   :  { %v247_v51 = vmax.f32 %v231_v45, 0.0  ;;  %v251_v52 = vmax.f32 %v235_v46, 0.0 }
  0xac   :  { %270 = vst [vmem:[%s596_s4 + $0x40] sm:$0xff] %v254_v47 }
  0xad   :  { %274 = vst [vmem:[%s596_s4 + $0x60] sm:$0xff] %v258_v48  ;;  %v180_v55 = vpop.f32.mrf.mxu2  ;;  %v190_v56 = vpop.f32.mrf.mxu3 }
  0xae   :  { %263 = vst [vmem:[%s596_s4 + $0x8] sm:$0xff] %v247_v51  ;;  %v181_v59 = vadd.f32 %v508_v18, %v180_v55  ;;  %v191_v60 = vadd.f32 %v508_v18, %v190_v56  ;;  %v163_v61 = vpop.f32.mrf.mxu0  ;;  %v173_v62 = vpop.f32.mrf.mxu1 }
  0xaf   :  { %267 = vst [vmem:[%s596_s4 + $0x28] sm:$0xff] %v251_v52  ;;  %v164_v63 = vadd.f32 %v508_v18, %v163_v61  ;;  %v174_v0 = vadd.f32 %v508_v18, %v173_v62 }
  0xb0   :  { %v239_v1 = vadd.f32 %v381_v53, %v181_v59  ;;  %v243_v2 = vadd.f32 %v389_v54, %v191_v60 }
  0xb1   :  { %v232_v3 = vadd.f32 %v368_v57, %v164_v63  ;;  %v236_v4 = vadd.f32 %v376_v58, %v174_v0 }
  0xb2   :  { %v255_v7 = vmax.f32 %v239_v1, 0.0  ;;  %v259_v8 = vmax.f32 %v243_v2, 0.0 }
  0xb3   :  { %v248_v9 = vmax.f32 %v232_v3, 0.0  ;;  %v252_v10 = vmax.f32 %v236_v4, 0.0 }
  0xb4   :  { %271 = vst [vmem:[%s596_s4 + $0x48] sm:$0xff] %v255_v7 }
  0xb5   :  { %275 = vst [vmem:[%s596_s4 + $0x68] sm:$0xff] %v259_v8  ;;  %v183_v13 = vpop.f32.mrf.mxu2  ;;  %v193_v14 = vpop.f32.mrf.mxu3 }
  0xb6   :  { %264 = vst [vmem:[%s596_s4 + $0x10] sm:$0xff] %v248_v9  ;;  %v184_v17 = vadd.f32 %v508_v18, %v183_v13  ;;  %v194_v19 = vadd.f32 %v508_v18, %v193_v14  ;;  %v165_v20 = vpop.f32.mrf.mxu0  ;;  %v175_v21 = vpop.f32.mrf.mxu1 }
  0xb7   :  { %268 = vst [vmem:[%s596_s4 + $0x30] sm:$0xff] %v252_v10  ;;  %v166_v22 = vadd.f32 %v508_v18, %v165_v20  ;;  %v176_v23 = vadd.f32 %v508_v18, %v175_v21 }
  0xb8   :  { %v240_v24 = vadd.f32 %v384_v11, %v184_v17  ;;  %v244_v25 = vadd.f32 %v392_v12, %v194_v19 }
  0xb9   :  { %v233_v26 = vadd.f32 %v369_v15, %v166_v22  ;;  %v237_v27 = vadd.f32 %v377_v16, %v176_v23 }
  0xba   :  { %v256_v28 = vmax.f32 %v240_v24, 0.0  ;;  %v260_v29 = vmax.f32 %v244_v25, 0.0 }
  0xbb   :  { %v249_v30 = vmax.f32 %v233_v26, 0.0  ;;  %v253_v31 = vmax.f32 %v237_v27, 0.0 }
  0xbc   :  { %272 = vst [vmem:[%s596_s4 + $0x50] sm:$0xff] %v256_v28 }
  0xbd   :  { %276 = vst [vmem:[%s596_s4 + $0x70] sm:$0xff] %v260_v29  ;;  %v185_v34 = vpop.f32.mrf.mxu2  ;;  %v195_v35 = vpop.f32.mrf.mxu3 }
  0xbe   :  { %265 = vst [vmem:[%s596_s4 + $0x18] sm:$0xff] %v249_v30  ;;  %v186_v36 = vadd.f32 %v508_v18, %v185_v34  ;;  %v196_v37 = vadd.f32 %v508_v18, %v195_v35 }
  0xbf   :  { %269 = vst [vmem:[%s596_s4 + $0x38] sm:$0xff] %v253_v31 }
  0xc0   :  { %v241_v38 = vadd.f32 %v385_v32, %v186_v36  ;;  %v245_v39 = vadd.f32 %v393_v33, %v196_v37 }
  0xc2   :  { %v257_v40 = vmax.f32 %v241_v38, 0.0  ;;  %v261_v41 = vmax.f32 %v245_v39, 0.0 }
  0xc4   :  { %273 = vst [vmem:[%s596_s4 + $0x58] sm:$0xff] %v257_v40 }
  0xc5   :  { %277 = vst [vmem:[%s596_s4 + $0x78] sm:$0xff] %v261_v41 }

// kernel: resnet_stage_forward.12
= control target key start
LH: loop header
LB: loop body
LE: loop exit
PB: predicated region body
PF: predicated region fallthrough
CT: control target
= control target key end

     0   :  { %s2964_s12 = smov 0   ;;  %s2966_s13 = smov 0   ;;  %s3525_s0 = inlined_call_operand.vmem [shape: bf16[2,10,10,128], index: 0, kind: input, shape index: {}]   ;;  %s3526_s1 = inlined_call_operand.vmem [shape: bf16[1152,128], index: 1, kind: input, shape index: {}]   ;;  %s3527_s2 = inlined_call_operand.vmem [shape: f32[1,128], index: 2, kind: input, shape index: {}]   ;;  %s3528_s3 = inlined_call_operand.vmem [shape: bf16[2,8,8,128], index: 3, kind: output, shape index: {}]  }
   0x1   :  { %s2968_s14 = smov 0  }
   0x2 LB: > { %s32_s15 = sadd.s32 1, %s2938_s13  ;;  %p2204_p0 = scmp.ge.s32.totalorder %s2942_s14, 1  ;;  %s2942_s14 = sphi %s2968_s14, %s13_s14   ;;  %s2938_s13 = sphi %s2966_s13, %s3534_s13   ;;  %s2934_s12 = sphi %s2964_s12, %s3533_s12  }
   0x3   : > { %p34_p1 = scmp.ge.s32.totalorder %s32_s15, 2  ;;  %p177_p2 = scmp.lt.s32.totalorder %s2942_s14, 3 }
   0x5   : > { %s3536_s15 = smov (%p34_p1, %s32_s15), 0  ;;  %p178_p3 = pnand %p2204_p0, %p177_p2 }
   0x6   : > { %p215_p4 = scmp.lt.s32.totalorder (!%p178_p3), %s2934_s12, 1 }
   0x7   : > { %181 = sbr.rel (%p178_p3) target bundleno = 335 (0x14f), region = 32 }
   0xc   : > { %v2790_v0 = vld [vmem:[%s3526_s1 + $0x38] sm:$0xff]  ;;  %v2789_v2 = vld [vmem:[%s3526_s1 + $0x30] sm:$0xff]  ;;  %s3538_s12 = smov (!%p215_p4, %s2934_s12), 1  ;;  %v2788_v6 = vld [vmem:[%s3526_s1 + $0x28] sm:$0xff]  ;;  %vm439_vm0 = vcmask 1042432   ;;  %vm440_vm1 = vcmask 1046532  }
   0xd   : > { %v2806_v1 = vld [vmem:[%s3526_s1 + $0xb8] sm:$0xff]  ;;  %2878 = vmatpush.bf16.msra.mxu1 %v2790_v0  ;;  %1782 = vmatpush.bf16.msra.mxu0 %v2790_v0  ;;  %v2805_v3 = vld [vmem:[%s3526_s1 + $0xb0] sm:$0xff]  ;;  %s2894_s26 = smul.u32 80, %s3538_s12  ;;  %v2804_v7 = vld [vmem:[%s3526_s1 + $0xa8] sm:$0xff]  ;;  %vm276_vm3 = vsmask.f32 3328 }
   0xe   : > { %1840 = vmatpush.bf16.msra.mxu2 %v2806_v1  ;;  %v2814_v4 = vld [vmem:[%s3526_s1 + $0xf8] sm:$0xff]  ;;  %v2813_v5 = vld [vmem:[%s3526_s1 + $0xf0] sm:$0xff]  ;;  %v2787_v12 = vld [vmem:[%s3526_s1 + $0x20] sm:$0xff]  ;;  %vm277_vm4 = vsmask.f32 7440  ;;  %s2746_s5 = sshll.u32 %s3538_s12, 5 }
   0xf   : > { %1869 = vmatpush.bf16.msra.mxu3 %v2814_v4  ;;  %s3009_s6 = scalar_lea.vmem %s3525_s0, %s2894_s26  ;;  %v2803_v13 = vld [vmem:[%s3526_s1 + $0xa0] sm:$0xff]  ;;  %v2812_v14 = vld [vmem:[%s3526_s1 + $0xe8] sm:$0xff]  ;;  %vm3033_vm2 = vmor %vm439_vm0, %vm440_vm1  ;;  %s3500_s9 = scalar_lea.vmem %s3528_s3, %s2746_s5 }
  0x10   : > { %v248_v8 = vld [vmem:[%s3009_s6 + $0x20] sm:$0xf]  ;;  %v249_v9 = vld [vmem:[%s3009_s6 + $0x28] sm:$0xf]  ;;  %v408_v16 = vld [vmem:[%s3009_s6 + $0x4] sm:$0x1] }
  0x11   : > { %2879 = vmatpush.bf16.msra.mxu1 %v2789_v2  ;;  %1783 = vmatpush.bf16.msra.mxu0 %v2789_v2  ;;  %256 = vst [vmem:[#allocation2 + $0x90] sm:$0xf] %v248_v8  ;;  %v244_v10 = vld [vmem:[%s3009_s6] sm:$0xf]  ;;  %v245_v11 = vld [vmem:[%s3009_s6 + $0x8] sm:$0xf]  ;;  %vm3129_vm5 = vmor %vm276_vm3, %vm277_vm4 }
  0x12   : > { %1841 = vmatpush.bf16.msra.mxu2 %v2805_v3  ;;  %257 = vst [vmem:[#allocation2 + $0xb4] sm:$0xf] %v249_v9  ;;  %v407_v15 = vld [vmem:[%s3009_s6] sm:$0xe]  ;;  %v409_v17 = vld [vmem:[%s3009_s6 + $0x8] sm:$0xe] }
  0x13   : > { %1870 = vmatpush.bf16.msra.mxu3 %v2813_v5  ;;  %252 = vst [vmem:[#allocation2] sm:$0xf] %v244_v10  ;;  %v410_v18 = vld [vmem:[%s3009_s6 + $0xc] sm:$0x1]  ;;  %v2208_v20 = vrot.slane %v407_v15, 9  ;;  %v444_v21 = vrot.slane %v408_v16, 5 }
  0x14   : > { %253 = vst [vmem:[#allocation2 + $0x24] sm:$0xf] %v245_v11  ;;  %v2209_v22 = vrot.slane %v409_v17, 9  ;;  %v448_v23 = vrot.slane %v410_v18, 5  ;;  %v2811_v24 = vld [vmem:[%s3526_s1 + $0xe0] sm:$0xff]  ;;  %v2786_v25 = vld [vmem:[%s3526_s1 + $0x18] sm:$0xff] }
  0x15   : > { %2880 = vmatpush.bf16.msra.mxu1 %v2788_v6  ;;  %1784 = vmatpush.bf16.msra.mxu0 %v2788_v6  ;;  %v445_v26 = vsel %vm3033_vm2, %v2208_v20, %v444_v21  ;;  %v250_v28 = vld [vmem:[%s3009_s6 + $0x30] sm:$0xf]  ;;  %v2802_v29 = vld [vmem:[%s3526_s1 + $0x98] sm:$0xff]  ;;  %v2216_v36 = vld [vmem:[%s3009_s6 + $0x8] sm:$0xf] }
  0x16   : > { %1842 = vmatpush.bf16.msra.mxu2 %v2804_v7  ;;  %v449_v27 = vsel %vm3033_vm2, %v2209_v22, %v448_v23  ;;  %482 = vst [vmem:[#allocation2 + $0x8] sm:$0xf] %v445_v26  ;;  %v251_v30 = vld [vmem:[%s3009_s6 + $0x38] sm:$0xf]  ;;  %v246_v31 = vld [vmem:[%s3009_s6 + $0x10] sm:$0xf] }
  0x17   : > { %1871 = vmatpush.bf16.msra.mxu3 %v2812_v14  ;;  %483 = vst [vmem:[#allocation2 + $0x2c] sm:$0xf] %v449_v27  ;;  %v2810_v32 = vld [vmem:[%s3526_s1 + $0xd8] sm:$0xff]  ;;  %v2785_v34 = vld [vmem:[%s3526_s1 + $0x10] sm:$0xff]  ;;  %v2784_v42 = vld [vmem:[%s3526_s1 + $0x8] sm:$0xff] }
  0x18   : > { %258 = vst [vmem:[#allocation2 + $0xd8] sm:$0xf] %v250_v28  ;;  %v247_v33 = vld [vmem:[%s3009_s6 + $0x18] sm:$0xf]  ;;  %v2801_v35 = vld [vmem:[%s3526_s1 + $0x90] sm:$0xff]  ;;  %v2800_v44 = vld [vmem:[%s3526_s1 + $0x88] sm:$0xff] }
  0x19   : > { %2881 = vmatpush.bf16.msra.mxu1 %v2787_v12  ;;  %1785 = vmatpush.bf16.msra.mxu0 %v2787_v12  ;;  %259 = vst [vmem:[#allocation2 + $0xfc] sm:$0xf] %v251_v30  ;;  %v2217_v37 = vld [vmem:[%s3009_s6 + $0x10] sm:$0xf]  ;;  %v412_v40 = vld [vmem:[%s3009_s6 + $0x14] sm:$0x1] }
  0x1a   : > { %1843 = vmatpush.bf16.msra.mxu2 %v2803_v13  ;;  %254 = vst [vmem:[#allocation2 + $0x48] sm:$0xf] %v246_v31  ;;  %v2809_v38 = vld [vmem:[%s3526_s1 + $0xd0] sm:$0xff]  ;;  %v413_v41 = vld [vmem:[%s3009_s6 + $0x18] sm:$0xe]  ;;  %v452_v46 = vrot.slane %v412_v40, 5 }
  0x1b   : > { %1872 = vmatpush.bf16.msra.mxu3 %v2811_v24  ;;  %255 = vst [vmem:[#allocation2 + $0x6c] sm:$0xf] %v247_v33  ;;  %v411_v39 = vld [vmem:[%s3009_s6 + $0x10] sm:$0xe]  ;;  %v414_v43 = vld [vmem:[%s3009_s6 + $0x1c] sm:$0x1] }
  0x1c   : > { %502 = vst [vmem:[#allocation2 + $0xc] sm:$0xf] %v2216_v36  ;;  %v2210_v45 = vrot.slane %v411_v39, 9  ;;  %v2211_v47 = vrot.slane %v413_v41, 9  ;;  %v456_v48 = vrot.slane %v414_v43, 5  ;;  %v2783_v49 = vld [vmem:[%s3526_s1] sm:$0xff] }
  0x1d   : > { %2882 = vmatpush.bf16.msra.mxu1 %v2786_v25  ;;  %1786 = vmatpush.bf16.msra.mxu0 %v2786_v25  ;;  %503 = vst [vmem:[#allocation2 + $0x30] sm:$0xf] %v2217_v37  ;;  %v2386_v50 = vld [vmem:[#allocation2 + $0x90] sm:$0xf]  ;;  %v2769_v51 = vld [vmem:[#allocation2 + $0xb0] sm:$0xf0] }
  0x1e   : > { %1844 = vmatpush.bf16.msra.mxu2 %v2802_v29  ;;  %v2808_v52 = vld [vmem:[%s3526_s1 + $0xc8] sm:$0xff]  ;;  %v2798_v53 = vld [vmem:[%s3526_s1 + $0x78] sm:$0xff]  ;;  %v2799_v54 = vld [vmem:[%s3526_s1 + $0x80] sm:$0xff]  ;;  %v453_v58 = vsel %vm3033_vm2, %v2210_v45, %v452_v46  ;;  %v457_v59 = vsel %vm3033_vm2, %v2211_v47, %v456_v48  ;;  %v2387_v1 = vor.u32 %v2769_v51, %v2386_v50 }
  0x1f   : > { %1873 = vmatpush.bf16.msra.mxu3 %v2810_v32  ;;  %v2314_v55 = vld [vmem:[#allocation2] sm:$0xf]  ;;  %v2751_v56 = vld [vmem:[#allocation2 + $0x20] sm:$0xf0]  ;;  %v2322_v57 = vld [vmem:[#allocation2 + $0x8] sm:$0xf] }
  0x20   : > { %v2822_v60 = vld [vmem:[%s3526_s1 + $0x138] sm:$0xff]  ;;  %v2752_v61 = vld [vmem:[#allocation2 + $0x28] sm:$0xf0]  ;;  %484 = vst [vmem:[#allocation2 + $0x50] sm:$0xf] %v453_v58  ;;  %v2797_v5 = vld [vmem:[%s3526_s1 + $0x70] sm:$0xff]  ;;  %v2315_v6 = vor.u32 %v2751_v56, %v2314_v55 }
  0x21   : > { %2883 = vmatpush.bf16.msra.mxu1 %v2785_v34  ;;  %1787 = vmatpush.bf16.msra.mxu0 %v2785_v34  ;;  %v2838_v62 = vld [vmem:[%s3526_s1 + $0x1b8] sm:$0xff]  ;;  %v260_v63 = vld [vmem:[%s3009_s6] sm:$0xf]  ;;  %485 = vst [vmem:[#allocation2 + $0x74] sm:$0xf] %v457_v59  ;;  %v2323_v10 = vor.u32 %v2752_v61, %v2322_v57  ;;  %v2821_v22 = vld [vmem:[%s3526_s1 + $0x130] sm:$0xff] }
  0x22   : > { %1845 = vmatpush.bf16.msra.mxu2 %v2801_v35  ;;  %v261_v0 = vld [vmem:[%s3009_s6 + $0x4] sm:$0x1]  ;;  %v262_v3 = vld [vmem:[%s3009_s6 + $0x8] sm:$0xf]  ;;  %v263_v4 = vld [vmem:[%s3009_s6 + $0xc] sm:$0x1] }
  0x23   : > { %1874 = vmatpush.bf16.msra.mxu3 %v2809_v38  ;;  %v2748_v2 = vld [vmem:[#allocation2 + $0xc] sm:$0xf]  ;;  %v280_v8 = vshrl.u32 %v260_v63, 16  ;;  %v283_v9 = vshll.u32 %v260_v63, 16  ;;  %v2807_v11 = vld [vmem:[%s3526_s1 + $0xc0] sm:$0xff]  ;;  %v289_v12 = vshll.u32 %v261_v0, 16 }
  0x24   : > { %v2324_v7 = vld [vmem:[#allocation2 + $0x2c] sm:$0xf0]  ;;  %v294_v13 = vshrl.u32 %v262_v3, 16  ;;  %v297_v14 = vshll.u32 %v262_v3, 16  ;;  %v2218_v15 = vld [vmem:[%s3009_s6 + $0x18] sm:$0xf] }
  0x25   : > { %2884 = vmatpush.bf16.msra.mxu1 %v2784_v42  ;;  %1788 = vmatpush.bf16.msra.mxu0 %v2784_v42  ;;  %v2846_v16 = vld [vmem:[%s3526_s1 + $0x1f8] sm:$0xff]  ;;  %v282_v17 = vrot.slane %v280_v8, 4  ;;  %v285_v18 = vrot.slane %v283_v9, 5  ;;  %v303_v20 = vshll.u32 %v263_v4, 16  ;;  %v2219_v21 = vld [vmem:[%s3009_s6 + $0x20] sm:$0xf]  ;;  %v2327_v27 = vor.u32 %v2748_v2, %v2324_v7 }
  0x26   : > { %1846 = vmatpush.bf16.msra.mxu2 %v2800_v44  ;;  %v2837_v23 = vld [vmem:[%s3526_s1 + $0x1b0] sm:$0xff]  ;;  %v296_v24 = vrot.slane %v294_v13, 4  ;;  %v299_v25 = vrot.slane %v297_v14, 5  ;;  %504 = vst [vmem:[#allocation2 + $0x54] sm:$0xf] %v2218_v15  ;;  %v2796_v26 = vld [vmem:[%s3526_s1 + $0x68] sm:$0xff] }
  0x27   : > { %1875 = vmatpush.bf16.msra.mxu3 %v2808_v52  ;;  %v286_v28 = vor.u32 %v285_v18, %v282_v17  ;;  %v291_v29 = vrot.slane %v289_v12, 5  ;;  %v2820_v30 = vld [vmem:[%s3526_s1 + $0x128] sm:$0xff]  ;;  %v305_v33 = vrot.slane %v303_v20, 5  ;;  %505 = vst [vmem:[#allocation2 + $0x78] sm:$0xf] %v2219_v21  ;;  %v2845_v38 = vld [vmem:[%s3526_s1 + $0x1f0] sm:$0xff] }
  0x28   : > { %v300_v32 = vor.u32 %v299_v25, %v296_v24  ;;  %v2836_v34 = vld [vmem:[%s3526_s1 + $0x1a8] sm:$0xff]  ;;  %v2226_v40 = vld [vmem:[%s3009_s6 + $0x10] sm:$0xf]  ;;  %v2227_v41 = vld [vmem:[%s3009_s6 + $0x14] sm:$0x1] }
  0x29   : > { %2885 = vmatpush.bf16.msra.mxu1 %v2783_v49  ;;  %1789 = vmatpush.bf16.msra.mxu0 %v2783_v49  ;;  %v287_v35 = vrot.slane %v286_v28, 4  ;;  %v2224_v36 = vld [vmem:[%s3009_s6 + $0x8] sm:$0xf]  ;;  %v2225_v37 = vld [vmem:[%s3009_s6 + $0xc] sm:$0x1]  ;;  %v2795_v43 = vld [vmem:[%s3526_s1 + $0x60] sm:$0xff] }
  0x2a   : > { %1847 = vmatpush.bf16.msra.mxu2 %v2799_v54  ;;  %v301_v39 = vrot.slane %v300_v32, 4  ;;  %v527_v42 = vshrl.u32 %v2224_v36, 16  ;;  %v530_v45 = vshll.u32 %v2224_v36, 16  ;;  %v536_v46 = vshll.u32 %v2225_v37, 16  ;;  %v415_v48 = vld [vmem:[%s3009_s6 + $0x20] sm:$0xe] }
  0x2b   : > { %1876 = vmatpush.bf16.msra.mxu3 %v2807_v11  ;;  %v292_v44 = vsel %vm3129_vm5, %v287_v35, %v291_v29  ;;  %v541_v47 = vshrl.u32 %v2226_v40, 16  ;;  %v3149_v49 = vld [vmem:[#allocation2 + $0xd8] sm:$0xf]  ;;  %v3151_v50 = vld [vmem:[#allocation2 + $0xf8] sm:$0xf0]  ;;  %v2819_v51 = vld [vmem:[%s3526_s1 + $0x120] sm:$0xff] }
  0x2c   : > { %1800 = vmatmul.bf16.vlgmr.msra.gmra.mxu1 %v2387_v1  ;;  %1790 = vmatmul.bf16.vlgmr.msra.gmra.mxu0 %v2315_v6  ;;  %v3156_v52 = vld [vmem:[#allocation2 + $0x48] sm:$0xf]  ;;  %399 = vst [vmem:[#allocation2 + $0x4] sm:$0xf] %v292_v44  ;;  %v529_v54 = vrot.slane %v527_v42, 4  ;;  %v544_v55 = vshll.u32 %v2226_v40, 16  ;;  %v2423_v13 = vor.u32 %v3151_v50, %v3149_v49 }
  0x2d   : > { %1811 = vmatpush.bf16.msrb.mxu1 %v2798_v53  ;;  %1898 = vmatpush.bf16.msrb.mxu0 %v2822_v60  ;;  %v306_v53 = vsel %vm3129_vm5, %v301_v39, %v305_v33  ;;  %v550_v56 = vshll.u32 %v2227_v41, 16  ;;  %v3160_v57 = vld [vmem:[#allocation2 + $0x68] sm:$0xf0]  ;;  %v532_v58 = vrot.slane %v530_v45, 5  ;;  %v543_v60 = vrot.slane %v541_v47, 4  ;;  %v2835_v0 = vld [vmem:[%s3526_s1 + $0x1a0] sm:$0xff] }
  0x2e   : > { %1956 = vmatpush.bf16.msrb.mxu2 %v2838_v62  ;;  %1877 = vmatmul.bf16.vlgmr.msra.gmra.mxu3 %v2327_v27  ;;  %400 = vst [vmem:[#allocation2 + $0x28] sm:$0xf] %v306_v53  ;;  %v2844_v59 = vld [vmem:[%s3526_s1 + $0x1e8] sm:$0xff]  ;;  %v546_v61 = vrot.slane %v544_v55, 5  ;;  %v416_v62 = vld [vmem:[%s3009_s6 + $0x24] sm:$0x1]  ;;  %v2351_v14 = vor.u32 %v3160_v57, %v3156_v52 }
  0x2f   : > { %1848 = vmatmul.bf16.vlgmr.msra.gmra.mxu2 %v2323_v10  ;;  %1985 = vmatpush.bf16.msrb.mxu3 %v2846_v16  ;;  %v2212_v63 = vrot.slane %v415_v48, 9  ;;  %v2794_v1 = vld [vmem:[%s3526_s1 + $0x58] sm:$0xff]  ;;  %v2358_v2 = vld [vmem:[#allocation2 + $0x50] sm:$0xf]  ;;  %v533_v3 = vor.u32 %v532_v58, %v529_v54  ;;  %v538_v4 = vrot.slane %v536_v46, 5  ;;  %v460_v9 = vrot.slane %v416_v62, 5 }
  0x30   : > { %v417_v6 = vld [vmem:[%s3009_s6 + $0x28] sm:$0xe]  ;;  %v418_v7 = vld [vmem:[%s3009_s6 + $0x2c] sm:$0x1]  ;;  %v547_v8 = vor.u32 %v546_v61, %v543_v60  ;;  %v264_v11 = vld [vmem:[%s3009_s6 + $0x10] sm:$0xf] }
  0x31   : > { %1812 = vmatpush.bf16.msrb.mxu1 %v2797_v5  ;;  %1899 = vmatpush.bf16.msrb.mxu0 %v2821_v22  ;;  %v552_v5 = vrot.slane %v550_v56, 5  ;;  %v2213_v10 = vrot.slane %v417_v6, 9  ;;  %v265_v12 = vld [vmem:[%s3009_s6 + $0x14] sm:$0x1]  ;;  %v534_v16 = vrot.slane %v533_v3, 4  ;;  %v464_v17 = vrot.slane %v418_v7, 5 }
  0x32   : > { %1957 = vmatpush.bf16.msrb.mxu2 %v2837_v23  ;;  %v2761_v15 = vld [vmem:[#allocation2 + $0x70] sm:$0xf0]  ;;  %v266_v18 = vld [vmem:[%s3009_s6 + $0x18] sm:$0xf]  ;;  %v548_v23 = vrot.slane %v547_v8, 4  ;;  %v461_v24 = vsel %vm3033_vm2, %v2212_v63, %v460_v9  ;;  %v308_v25 = vshrl.u32 %v264_v11, 16 }
  0x33   : > { %1986 = vmatpush.bf16.msrb.mxu3 %v2845_v38  ;;  %v2818_v20 = vld [vmem:[%s3526_s1 + $0x118] sm:$0xff]  ;;  %v2757_v21 = vld [vmem:[#allocation2 + $0x54] sm:$0xf]  ;;  %v539_v27 = vsel %vm3129_vm5, %v534_v16, %v538_v4  ;;  %v465_v28 = vsel %vm3033_vm2, %v2213_v10, %v464_v17  ;;  %486 = vst [vmem:[#allocation2 + $0x98] sm:$0xf] %v461_v24  ;;  %v322_v32 = vshrl.u32 %v266_v18, 16  ;;  %v2359_v33 = vor.u32 %v2761_v15, %v2358_v2 }
  0x34   : > { %v2360_v22 = vld [vmem:[#allocation2 + $0x74] sm:$0xf0]  ;;  %v267_v29 = vld [vmem:[%s3009_s6 + $0x1c] sm:$0x1]  ;;  %646 = vst [vmem:[#allocation2 + $0x10] sm:$0xf] %v539_v27 }
  0x35   : > { %1813 = vmatpush.bf16.msrb.mxu1 %v2796_v26  ;;  %1900 = vmatpush.bf16.msrb.mxu0 %v2820_v30  ;;  %v311_v26 = vshll.u32 %v264_v11, 16  ;;  %v317_v30 = vshll.u32 %v265_v12, 16  ;;  %v310_v35 = vrot.slane %v308_v25, 4  ;;  %v2220_v37 = vld [vmem:[%s3009_s6 + $0x28] sm:$0xf]  ;;  %v2793_v38 = vld [vmem:[%s3526_s1 + $0x50] sm:$0xff]  ;;  %v2363_v46 = vor.u32 %v2757_v21, %v2360_v22 }
  0x36   : > { %1958 = vmatpush.bf16.msrb.mxu2 %v2836_v34  ;;  %v553_v34 = vsel %vm3129_vm5, %v548_v23, %v552_v5  ;;  %v2817_v39 = vld [vmem:[%s3526_s1 + $0x110] sm:$0xff]  ;;  %v324_v40 = vrot.slane %v322_v32, 4  ;;  %v325_v41 = vshll.u32 %v266_v18, 16  ;;  %487 = vst [vmem:[#allocation2 + $0xbc] sm:$0xf] %v465_v28  ;;  %v331_v44 = vshll.u32 %v267_v29, 16 }
  0x37   : > { %1987 = vmatpush.bf16.msrb.mxu3 %v2844_v59  ;;  %v313_v36 = vrot.slane %v311_v26, 5  ;;  %647 = vst [vmem:[#allocation2 + $0x34] sm:$0xf] %v553_v34  ;;  %v2221_v45 = vld [vmem:[%s3009_s6 + $0x30] sm:$0xf]  ;;  %v2834_v48 = vld [vmem:[%s3526_s1 + $0x198] sm:$0xff] }
  0x38   : > { %v327_v47 = vrot.slane %v325_v41, 5  ;;  %506 = vst [vmem:[#allocation2 + $0x9c] sm:$0xf] %v2220_v37  ;;  %v2843_v49 = vld [vmem:[%s3526_s1 + $0x1e0] sm:$0xff]  ;;  %v2792_v52 = vld [vmem:[%s3526_s1 + $0x48] sm:$0xff]  ;;  %v333_v54 = vrot.slane %v331_v44, 5 }
  0x39   : > { %1814 = vmatpush.bf16.msrb.mxu1 %v2795_v43  ;;  %1901 = vmatpush.bf16.msrb.mxu0 %v2819_v51  ;;  %v314_v42 = vor.u32 %v313_v36, %v310_v35  ;;  %v319_v43 = vrot.slane %v317_v30, 5  ;;  %507 = vst [vmem:[#allocation2 + $0xc0] sm:$0xf] %v2221_v45  ;;  %v2228_v51 = vld [vmem:[%s3009_s6 + $0x18] sm:$0xf]  ;;  %v2816_v57 = vld [vmem:[%s3526_s1 + $0x108] sm:$0xff] }
  0x3a   : > { %1959 = vmatpush.bf16.msrb.mxu2 %v2835_v0  ;;  %v328_v53 = vor.u32 %v327_v47, %v324_v40  ;;  %v2229_v55 = vld [vmem:[%s3009_s6 + $0x1c] sm:$0x1]  ;;  %v2230_v56 = vld [vmem:[%s3009_s6 + $0x20] sm:$0xf]  ;;  %v2231_v59 = vld [vmem:[%s3009_s6 + $0x24] sm:$0x1] }
  0x3b   : > { %v315_v50 = vrot.slane %v314_v42, 4  ;;  %v555_v60 = vshrl.u32 %v2228_v51, 16  ;;  %v558_v61 = vshll.u32 %v2228_v51, 16  ;;  %v564_v62 = vshll.u32 %v2229_v55, 16  ;;  %1988 = vmatpush.bf16.msrb.mxu3 %v2843_v49  ;;  %v2791_v4 = vld [vmem:[%s3526_s1 + $0x40] sm:$0xff]  ;;  %v2830_v5 = vld [vmem:[%s3526_s1 + $0x178] sm:$0xff] }
  0x3c   : > { %1805 = vmatmul.bf16.gmra.mxu1 %v2423_v13  ;;  %1795 = vmatmul.bf16.gmra.mxu0 %v2351_v14  ;;  %v329_v63 = vrot.slane %v328_v53, 4  ;;  %v569_v0 = vshrl.u32 %v2230_v56, 16  ;;  %v572_v3 = vshll.u32 %v2230_v56, 16  ;;  %v578_v8 = vshll.u32 %v2231_v59, 16  ;;  %v419_v9 = vld [vmem:[%s3009_s6 + $0x30] sm:$0xe] }
  0x3d   : > { %1815 = vmatpush.bf16.msrb.mxu1 %v2794_v1  ;;  %1902 = vmatpush.bf16.msrb.mxu0 %v2818_v20  ;;  %v320_v58 = vsel %vm3129_vm5, %v315_v50, %v319_v43  ;;  %v557_v1 = vrot.slane %v555_v60, 4  ;;  %v560_v2 = vrot.slane %v558_v61, 5  ;;  %v2747_v10 = vld [vmem:[#allocation2 + $0x4] sm:$0xf]  ;;  %v2316_v11 = vld [vmem:[#allocation2 + $0x24] sm:$0xf0] }
  0x3e   : > { %1960 = vmatpush.bf16.msrb.mxu2 %v2834_v48  ;;  %1882 = vmatmul.bf16.gmra.mxu3 %v2363_v46  ;;  %401 = vst [vmem:[#allocation2 + $0x4c] sm:$0xf] %v320_v58  ;;  %v334_v6 = vsel %vm3129_vm5, %v329_v63, %v333_v54  ;;  %v571_v7 = vrot.slane %v569_v0, 4  ;;  %v2815_v12 = vld [vmem:[%s3526_s1 + $0x100] sm:$0xff]  ;;  %v2330_v13 = vld [vmem:[#allocation2 + $0x10] sm:$0xf]  ;;  %v2319_v43 = vor.u32 %v2747_v10, %v2316_v11 }
  0x3f   : > { %1853 = vmatmul.bf16.gmra.mxu2 %v2359_v33  ;;  %402 = vst [vmem:[#allocation2 + $0x70] sm:$0xf] %v334_v6  ;;  %v561_v14 = vor.u32 %v560_v2, %v557_v1  ;;  %v566_v15 = vrot.slane %v564_v62, 5  ;;  %v574_v16 = vrot.slane %v572_v3, 5  ;;  %v2214_v17 = vrot.slane %v419_v9, 9  ;;  %v3234_v22 = vld [vmem:[%s3526_s1 + $0x238] sm:$0xff] }
  0x40   : > { %v2753_v18 = vld [vmem:[#allocation2 + $0x30] sm:$0xf0]  ;;  %v2394_v20 = vld [vmem:[#allocation2 + $0x98] sm:$0xf]  ;;  %v580_v21 = vrot.slane %v578_v8, 5  ;;  %v2828_v53 = vld [vmem:[%s3526_s1 + $0x168] sm:$0xff] }
  0x41   : > { %1816 = vmatpush.bf16.msrb.mxu1 %v2793_v38  ;;  %1903 = vmatpush.bf16.msrb.mxu0 %v2817_v39  ;;  %v420_v23 = vld [vmem:[%s3009_s6 + $0x34] sm:$0x1]  ;;  %v562_v25 = vrot.slane %v561_v14, 4  ;;  %v575_v26 = vor.u32 %v574_v16, %v571_v7  ;;  %v421_v27 = vld [vmem:[%s3009_s6 + $0x38] sm:$0xe]  ;;  %v2331_v44 = vor.u32 %v2753_v18, %v2330_v13  ;;  %v2832_v59 = vld [vmem:[%s3526_s1 + $0x188] sm:$0xff] }
  0x42   : > { %v2829_v24 = vld [vmem:[%s3526_s1 + $0x170] sm:$0xff]  ;;  %v422_v28 = vld [vmem:[%s3009_s6 + $0x3c] sm:$0x1]  ;;  %v468_v29 = vrot.slane %v420_v23, 5  ;;  %v2215_v32 = vrot.slane %v421_v27, 9  ;;  %v2831_v6 = vld [vmem:[%s3526_s1 + $0x180] sm:$0xff] }
  0x43   : > { %v2770_v30 = vld [vmem:[#allocation2 + $0xb8] sm:$0xf0]  ;;  %v472_v33 = vrot.slane %v422_v28, 5  ;;  %v2833_v34 = vld [vmem:[%s3526_s1 + $0x190] sm:$0xff]  ;;  %v2396_v37 = vld [vmem:[#allocation2 + $0xbc] sm:$0xf0]  ;;  %v567_v38 = vsel %vm3129_vm5, %v562_v25, %v566_v15 }
  0x44   : > { %v2842_v35 = vld [vmem:[%s3526_s1 + $0x1d8] sm:$0xff]  ;;  %v576_v39 = vrot.slane %v575_v26, 4  ;;  %v469_v40 = vsel %vm3033_vm2, %v2214_v17, %v468_v29  ;;  %v3255_v41 = vld [vmem:[%s3526_s1 + $0x230] sm:$0xff]  ;;  %v268_v42 = vld [vmem:[%s3009_s6 + $0x20] sm:$0xf]  ;;  %1961 = vmatpush.bf16.msrb.mxu2 %v2833_v34  ;;  %v2395_v48 = vor.u32 %v2770_v30, %v2394_v20 }
  0x45   : > { %1817 = vmatpush.bf16.msrb.mxu1 %v2792_v52  ;;  %1904 = vmatpush.bf16.msrb.mxu0 %v2816_v57  ;;  %v2766_v36 = vld [vmem:[#allocation2 + $0x9c] sm:$0xf]  ;;  %648 = vst [vmem:[#allocation2 + $0x58] sm:$0xf] %v567_v38  ;;  %v473_v45 = vsel %vm3033_vm2, %v2215_v32, %v472_v33  ;;  %v269_v46 = vld [vmem:[%s3009_s6 + $0x24] sm:$0x1] }
  0x46   : > { %v270_v47 = vld [vmem:[%s3009_s6 + $0x28] sm:$0xf]  ;;  %v581_v49 = vsel %vm3129_vm5, %v576_v39, %v580_v21  ;;  %488 = vst [vmem:[#allocation2 + $0xe0] sm:$0xf] %v469_v40  ;;  %1989 = vmatpush.bf16.msrb.mxu3 %v2842_v35  ;;  %v271_v50 = vld [vmem:[%s3009_s6 + $0x2c] sm:$0x1]  ;;  %v2399_v60 = vor.u32 %v2766_v36, %v2396_v37 }
  0x47   : > { %v336_v51 = vshrl.u32 %v268_v42, 16  ;;  %v339_v52 = vshll.u32 %v268_v42, 16  ;;  %649 = vst [vmem:[#allocation2 + $0x7c] sm:$0xf] %v581_v49  ;;  %v345_v54 = vshll.u32 %v269_v46, 16  ;;  %v350_v55 = vshrl.u32 %v270_v47, 16 }
  0x48   : > { %489 = vst [vmem:[#allocation2 + $0x104] sm:$0xf] %v473_v45  ;;  %v353_v58 = vshll.u32 %v270_v47, 16  ;;  %v359_v63 = vshll.u32 %v271_v50, 16  ;;  %v2841_v0 = vld [vmem:[%s3526_s1 + $0x1d0] sm:$0xff]  ;;  %1962 = vmatpush.bf16.msrb.mxu2 %v2832_v59  ;;  %v2827_v8 = vld [vmem:[%s3526_s1 + $0x160] sm:$0xff] }
  0x49   : > { %1818 = vmatpush.bf16.msrb.mxu1 %v2791_v4  ;;  %1905 = vmatpush.bf16.msrb.mxu0 %v2815_v12  ;;  %v338_v56 = vrot.slane %v336_v51, 4  ;;  %v341_v57 = vrot.slane %v339_v52, 5  ;;  %v347_v61 = vrot.slane %v345_v54, 5  ;;  %v352_v62 = vrot.slane %v350_v55, 4  ;;  %v2222_v3 = vld [vmem:[%s3009_s6 + $0x38] sm:$0xf] }
  0x4a   : > { %v355_v2 = vrot.slane %v353_v58, 5  ;;  %v2223_v4 = vld [vmem:[%s3009_s6 + $0x40] sm:$0xf]  ;;  %508 = vst [vmem:[#allocation2 + $0xe4] sm:$0xf] %v2222_v3  ;;  %1990 = vmatpush.bf16.msrb.mxu3 %v2841_v0  ;;  %v361_v11 = vrot.slane %v359_v63, 5 }
  0x4b   : > { %v342_v1 = vor.u32 %v341_v57, %v338_v56  ;;  %v2232_v7 = vld [vmem:[%s3009_s6 + $0x28] sm:$0xf]  ;;  %509 = vst [vmem:[#allocation2 + $0x108] sm:$0xf] %v2223_v4  ;;  %v2233_v13 = vld [vmem:[%s3009_s6 + $0x2c] sm:$0x1] }
  0x4c   : > { %1819 = vmatmul.bf16.vlgmr.msrb.gmra.mxu1 %v2319_v43  ;;  %1906 = vmatmul.bf16.vlgmr.msrb.gmra.mxu0 %v2331_v44  ;;  %v356_v10 = vor.u32 %v355_v2, %v352_v62  ;;  %v583_v12 = vshrl.u32 %v2232_v7, 16  ;;  %v2234_v14 = vld [vmem:[%s3009_s6 + $0x30] sm:$0xf]  ;;  %v3292_v15 = vld [vmem:[#allocation2 + $0x4c] sm:$0xf]  ;;  %v2826_v20 = vld [vmem:[%s3526_s1 + $0x158] sm:$0xff] }
  0x4d   : > { %1927 = vmatpush.bf16.msra.mxu1 %v2830_v5  ;;  %2014 = vmatpush.bf16.msra.mxu0 %v3234_v22  ;;  %v3281_v5 = vld [vmem:[%s3526_s1 + $0x228] sm:$0xff]  ;;  %v343_v9 = vrot.slane %v342_v1, 4  ;;  %v3294_v16 = vld [vmem:[#allocation2 + $0x6c] sm:$0xf0]  ;;  %v2235_v21 = vld [vmem:[%s3009_s6 + $0x34] sm:$0x1] }
  0x4e   : > { %1887 = vmatmul.bf16.gmra.mxu3 %v2399_v60  ;;  %v357_v18 = vrot.slane %v356_v10, 4  ;;  %v585_v23 = vrot.slane %v583_v12, 4  ;;  %v2762_v25 = vld [vmem:[#allocation2 + $0x78] sm:$0xf0]  ;;  %v3303_v26 = vld [vmem:[#allocation2 + $0xe0] sm:$0xf]  ;;  %1963 = vmatpush.bf16.msrb.mxu2 %v2831_v6  ;;  %v2355_v42 = vor.u32 %v3292_v15, %v3294_v16 }
  0x4f   : > { %1858 = vmatmul.bf16.gmra.mxu2 %v2395_v48  ;;  %v348_v17 = vsel %vm3129_vm5, %v343_v9, %v347_v61  ;;  %v3305_v27 = vld [vmem:[#allocation2 + $0x100] sm:$0xf0]  ;;  %v586_v28 = vshll.u32 %v2232_v7, 16  ;;  %v592_v29 = vshll.u32 %v2233_v13, 16  ;;  %v597_v32 = vshrl.u32 %v2234_v14, 16  ;;  %v2840_v38 = vld [vmem:[%s3526_s1 + $0x1c8] sm:$0xff] }
  0x50   : > { %403 = vst [vmem:[#allocation2 + $0x94] sm:$0xf] %v348_v17  ;;  %v362_v30 = vsel %vm3129_vm5, %v357_v18, %v361_v11  ;;  %v600_v33 = vshll.u32 %v2234_v14, 16  ;;  %v2264_v34 = vld [vmem:[%s3009_s6 + $0x10] sm:$0xf]  ;;  %v606_v37 = vshll.u32 %v2235_v21, 16  ;;  %1991 = vmatpush.bf16.msrb.mxu3 %v2840_v38  ;;  %v2431_v48 = vor.u32 %v3305_v27, %v3303_v26 }
  0x51   : > { %1928 = vmatpush.bf16.msra.mxu1 %v2829_v24  ;;  %2015 = vmatpush.bf16.msra.mxu0 %v3255_v41  ;;  %v2366_v24 = vld [vmem:[#allocation2 + $0x58] sm:$0xf]  ;;  %404 = vst [vmem:[#allocation2 + $0xb8] sm:$0xf] %v362_v30  ;;  %v588_v36 = vrot.slane %v586_v28, 5  ;;  %v599_v39 = vrot.slane %v597_v32, 4 }
  0x52   : > { %v2265_v35 = vld [vmem:[%s3009_s6 + $0x18] sm:$0xf]  ;;  %2886 = vmatpush.bf16.msra.mxu2 %v3234_v22  ;;  %v602_v40 = vrot.slane %v600_v33, 5  ;;  %746 = vst [vmem:[#allocation2 + $0x18] sm:$0xf] %v2264_v34  ;;  %v594_v44 = vrot.slane %v592_v29, 5  ;;  %v2367_v47 = vor.u32 %v2762_v25, %v2366_v24 }
  0x53   : > { %v589_v43 = vor.u32 %v588_v36, %v585_v23  ;;  %v608_v45 = vrot.slane %v606_v37, 5  ;;  %v2825_v22 = vld [vmem:[%s3526_s1 + $0x150] sm:$0xff]  ;;  %747 = vst [vmem:[#allocation2 + $0x3c] sm:$0xf] %v2265_v35  ;;  %v2851_v46 = vld [vmem:[%s3526_s1 + $0x220] sm:$0xff]  ;;  %v2824_v10 = vld [vmem:[%s3526_s1 + $0x148] sm:$0xff] }
  0x54   : > { %v2775_v49 = vld [vmem:[#allocation2 + $0xe4] sm:$0xf]  ;;  %v603_v50 = vor.u32 %v602_v40, %v599_v39  ;;  %v272_v51 = vld [vmem:[%s3009_s6 + $0x30] sm:$0xf]  ;;  %v273_v52 = vld [vmem:[%s3009_s6 + $0x34] sm:$0x1] }
  0x55   : > { %1929 = vmatpush.bf16.msra.mxu1 %v2828_v53  ;;  %2016 = vmatpush.bf16.msra.mxu0 %v3281_v5  ;;  %v274_v53 = vld [vmem:[%s3009_s6 + $0x38] sm:$0xf]  ;;  %v590_v54 = vrot.slane %v589_v43, 4  ;;  %v275_v55 = vld [vmem:[%s3009_s6 + $0x3c] sm:$0x1]  ;;  %v364_v56 = vshrl.u32 %v272_v51, 16 }
  0x56   : > { %2887 = vmatpush.bf16.msra.mxu2 %v3255_v41  ;;  %v367_v57 = vshll.u32 %v272_v51, 16  ;;  %v373_v58 = vshll.u32 %v273_v52, 16  ;;  %v2432_v59 = vld [vmem:[#allocation2 + $0x104] sm:$0xf0]  ;;  %v604_v60 = vrot.slane %v603_v50, 4  ;;  %v378_v61 = vshrl.u32 %v274_v53, 16 }
  0x57   : > { %v381_v62 = vshll.u32 %v274_v53, 16  ;;  %v387_v63 = vshll.u32 %v275_v55, 16  ;;  %v595_v0 = vsel %vm3129_vm5, %v590_v54, %v594_v44  ;;  %v366_v1 = vrot.slane %v364_v56, 4  ;;  %v2236_v3 = vld [vmem:[%s3009_s6 + $0x38] sm:$0xf]  ;;  %v2839_v13 = vld [vmem:[%s3526_s1 + $0x1c0] sm:$0xff] }
  0x58   : > { %v369_v2 = vrot.slane %v367_v57, 5  ;;  %v609_v41 = vsel %vm3129_vm5, %v604_v60, %v608_v45  ;;  %650 = vst [vmem:[#allocation2 + $0xa0] sm:$0xf] %v595_v0  ;;  %v380_v4 = vrot.slane %v378_v61, 4  ;;  %v2435_v7 = vor.u32 %v2775_v49, %v2432_v59  ;;  %v2237_v14 = vld [vmem:[%s3009_s6 + $0x3c] sm:$0x1]  ;;  %1992 = vmatpush.bf16.msrb.mxu3 %v2839_v13 }
  0x59   : > { %1930 = vmatpush.bf16.msra.mxu1 %v2827_v8  ;;  %2017 = vmatpush.bf16.msra.mxu0 %v2851_v46  ;;  %v383_v6 = vrot.slane %v381_v62, 5  ;;  %651 = vst [vmem:[#allocation2 + $0xc4] sm:$0xf] %v609_v41  ;;  %v375_v9 = vrot.slane %v373_v58, 5  ;;  %v389_v12 = vrot.slane %v387_v63, 5  ;;  %v614_v18 = vshll.u32 %v2236_v3, 16 }
  0x5a   : > { %2888 = vmatpush.bf16.msra.mxu2 %v3281_v5  ;;  %v370_v8 = vor.u32 %v369_v2, %v366_v1  ;;  %v611_v5 = vshrl.u32 %v2236_v3, 16  ;;  %v2238_v16 = vld [vmem:[%s3009_s6 + $0x40] sm:$0xf]  ;;  %v2239_v17 = vld [vmem:[%s3009_s6 + $0x44] sm:$0x1]  ;;  %v620_v23 = vshll.u32 %v2237_v14, 16 }
  0x5b   : > { %v384_v11 = vor.u32 %v383_v6, %v380_v4  ;;  %v625_v24 = vshrl.u32 %v2238_v16, 16  ;;  %v616_v26 = vrot.slane %v614_v18, 5  ;;  %v628_v27 = vshll.u32 %v2238_v16, 16  ;;  %v2272_v29 = vld [vmem:[%s3009_s6 + $0x10] sm:$0xf]  ;;  %v2850_v30 = vld [vmem:[%s3526_s1 + $0x218] sm:$0xff] }
  0x5c   : > { %1824 = vmatmul.bf16.gmra.mxu1 %v2355_v42  ;;  %1911 = vmatmul.bf16.gmra.mxu0 %v2367_v47  ;;  %v371_v15 = vrot.slane %v370_v8, 4  ;;  %v613_v21 = vrot.slane %v611_v5, 4  ;;  %v634_v28 = vshll.u32 %v2239_v17, 16  ;;  %v622_v33 = vrot.slane %v620_v23, 5  ;;  %v2273_v35 = vld [vmem:[%s3009_s6 + $0x14] sm:$0x1] }
  0x5d   : > { %1931 = vmatpush.bf16.msra.mxu1 %v2826_v20  ;;  %v385_v20 = vrot.slane %v384_v11, 4  ;;  %v627_v34 = vrot.slane %v625_v24, 4  ;;  %v2765_v36 = vld [vmem:[#allocation2 + $0x94] sm:$0xf]  ;;  %v2388_v37 = vld [vmem:[#allocation2 + $0xb4] sm:$0xf0]  ;;  %2018 = vmatpush.bf16.msra.mxu0 %v2850_v30 }
  0x5e   : > { %1892 = vmatmul.bf16.gmra.mxu3 %v2435_v7  ;;  %v376_v25 = vsel %vm3129_vm5, %v371_v15, %v375_v9  ;;  %2889 = vmatpush.bf16.msra.mxu2 %v2851_v46  ;;  %v617_v38 = vor.u32 %v616_v26, %v613_v21  ;;  %v630_v39 = vrot.slane %v628_v27, 5  ;;  %v636_v40 = vrot.slane %v634_v28, 5  ;;  %v2274_v42 = vld [vmem:[%s3009_s6 + $0x18] sm:$0xf]  ;;  %v2275_v46 = vld [vmem:[%s3009_s6 + $0x1c] sm:$0x1] }
  0x5f   : > { %1863 = vmatmul.bf16.gmra.mxu2 %v2431_v48  ;;  %v390_v32 = vsel %vm3129_vm5, %v385_v20, %v389_v12  ;;  %405 = vst [vmem:[#allocation2 + $0xdc] sm:$0xf] %v376_v25  ;;  %v2402_v43 = vld [vmem:[#allocation2 + $0xa0] sm:$0xf]  ;;  %v2338_v45 = vld [vmem:[#allocation2 + $0x18] sm:$0xf]  ;;  %v2391_v1 = vor.u32 %v2765_v36, %v2388_v37 }
  0x60   : > { %406 = vst [vmem:[#allocation2 + $0x100] sm:$0xf] %v390_v32  ;;  %v2771_v44 = vld [vmem:[#allocation2 + $0xc0] sm:$0xf0]  ;;  %v771_v47 = vshrl.u32 %v2272_v29, 16  ;;  %v774_v48 = vshll.u32 %v2272_v29, 16  ;;  %v631_v50 = vor.u32 %v630_v39, %v627_v34 }
  0x61   : > { %1932 = vmatpush.bf16.msra.mxu1 %v2825_v22  ;;  %v2754_v22 = vld [vmem:[#allocation2 + $0x38] sm:$0xf0]  ;;  %v618_v49 = vrot.slane %v617_v38, 4  ;;  %v780_v51 = vshll.u32 %v2273_v35, 16  ;;  %v2823_v52 = vld [vmem:[%s3526_s1 + $0x140] sm:$0xff]  ;;  %v2849_v54 = vld [vmem:[%s3526_s1 + $0x210] sm:$0xff]  ;;  %v2403_v6 = vor.u32 %v2771_v44, %v2402_v43 }
  0x62   : > { %v2266_v53 = vld [vmem:[%s3009_s6 + $0x20] sm:$0xf]  ;;  %2890 = vmatpush.bf16.msra.mxu2 %v2850_v30  ;;  %v773_v55 = vrot.slane %v771_v47, 4  ;;  %v776_v56 = vrot.slane %v774_v48, 5  ;;  %v785_v57 = vshrl.u32 %v2274_v42, 16  ;;  %v788_v58 = vshll.u32 %v2274_v42, 16  ;;  %2019 = vmatpush.bf16.msra.mxu0 %v2849_v54 }
  0x63   : > { %v2267_v59 = vld [vmem:[%s3009_s6 + $0x28] sm:$0xf]  ;;  %v623_v60 = vsel %vm3129_vm5, %v618_v49, %v622_v33  ;;  %v632_v61 = vrot.slane %v631_v50, 4  ;;  %v782_v62 = vrot.slane %v780_v51, 5  ;;  %v794_v63 = vshll.u32 %v2275_v46, 16  ;;  %v2847_v23 = vld [vmem:[%s3526_s1 + $0x200] sm:$0xff] }
  0x64   : > { %748 = vst [vmem:[#allocation2 + $0x60] sm:$0xf] %v2266_v53  ;;  %v2848_v0 = vld [vmem:[%s3526_s1 + $0x208] sm:$0xff]  ;;  %v777_v2 = vor.u32 %v776_v56, %v773_v55  ;;  %v787_v3 = vrot.slane %v785_v57, 4  ;;  %v790_v41 = vrot.slane %v788_v58, 5  ;;  %v2339_v7 = vor.u32 %v2754_v22, %v2338_v45 }
  0x65   : > { %1933 = vmatpush.bf16.msra.mxu1 %v2824_v10  ;;  %652 = vst [vmem:[#allocation2 + $0xe8] sm:$0xf] %v623_v60  ;;  %v2240_v4 = vld [vmem:[%s3009_s6 + $0x8] sm:$0xe]  ;;  %v637_v8 = vsel %vm3129_vm5, %v632_v61, %v636_v40  ;;  %v796_v11 = vrot.slane %v794_v63, 5 }
  0x66   : > { %749 = vst [vmem:[#allocation2 + $0x84] sm:$0xf] %v2267_v59  ;;  %2891 = vmatpush.bf16.msra.mxu2 %v2849_v54  ;;  %v778_v9 = vrot.slane %v777_v2, 4  ;;  %v791_v10 = vor.u32 %v790_v41, %v787_v3  ;;  %v2256_v12 = vrot.slane %v2240_v4, 9  ;;  %2020 = vmatpush.bf16.msra.mxu0 %v2848_v0  ;;  %v2241_v13 = vld [vmem:[%s3009_s6 + $0xc] sm:$0x1] }
  0x67   : > { %653 = vst [vmem:[#allocation2 + $0x10c] sm:$0xf] %v637_v8  ;;  %v2242_v14 = vld [vmem:[%s3009_s6 + $0x10] sm:$0xe]  ;;  %v2243_v5 = vld [vmem:[%s3009_s6 + $0x14] sm:$0x1] }
  0x68   : > { %v783_v15 = vsel %vm3129_vm5, %v778_v9, %v782_v62  ;;  %v792_v16 = vrot.slane %v791_v10, 4  ;;  %v688_v17 = vrot.slane %v2241_v13, 5  ;;  %v2257_v18 = vrot.slane %v2242_v14, 9  ;;  %v2276_v20 = vld [vmem:[%s3009_s6 + $0x20] sm:$0xf] }
  0x69   : > { %1934 = vmatpush.bf16.msra.mxu1 %v2823_v52  ;;  %890 = vst [vmem:[#allocation2 + $0x1c] sm:$0xf] %v783_v15  ;;  %v692_v21 = vrot.slane %v2243_v5, 5  ;;  %v2277_v24 = vld [vmem:[%s3009_s6 + $0x24] sm:$0x1]  ;;  %v799_v29 = vshrl.u32 %v2276_v20, 16 }
  0x6a   : > { %v797_v25 = vsel %vm3129_vm5, %v792_v16, %v796_v11  ;;  %v689_v26 = vsel %vm3033_vm2, %v2256_v12, %v688_v17  ;;  %v2278_v27 = vld [vmem:[%s3009_s6 + $0x28] sm:$0xf]  ;;  %2021 = vmatpush.bf16.msra.mxu0 %v2847_v23  ;;  %v802_v30 = vshll.u32 %v2276_v20, 16  ;;  %2892 = vmatpush.bf16.msra.mxu2 %v2848_v0  ;;  %v2279_v32 = vld [vmem:[%s3009_s6 + $0x2c] sm:$0x1]  ;;  %v808_v33 = vshll.u32 %v2277_v24, 16 }
  0x6b   : > { %891 = vst [vmem:[#allocation2 + $0x40] sm:$0xf] %v797_v25  ;;  %v693_v28 = vsel %vm3033_vm2, %v2257_v18, %v692_v21  ;;  %v813_v34 = vshrl.u32 %v2278_v27, 16  ;;  %v801_v35 = vrot.slane %v799_v29, 4  ;;  %v816_v39 = vshll.u32 %v2278_v27, 16 }
  0x6c   : > { %1829 = vmatmul.bf16.gmra.mxu1 %v2391_v1  ;;  %1916 = vmatmul.bf16.gmra.mxu0 %v2403_v6  ;;  %726 = vst [vmem:[#allocation2 + $0x14] sm:$0xf] %v689_v26  ;;  %v804_v36 = vrot.slane %v802_v30, 5  ;;  %v810_v37 = vrot.slane %v808_v33, 5  ;;  %v2288_v40 = vld [vmem:[%s3009_s6 + $0x10] sm:$0xe] }
  0x6d   : > { %727 = vst [vmem:[#allocation2 + $0x38] sm:$0xf] %v693_v28  ;;  %v815_v38 = vrot.slane %v813_v34, 4  ;;  %v822_v43 = vshll.u32 %v2279_v32, 16  ;;  %v2289_v44 = vld [vmem:[%s3009_s6 + $0x14] sm:$0x1] }
  0x6e   : > { %v805_v42 = vor.u32 %v804_v36, %v801_v35  ;;  %v2290_v45 = vld [vmem:[%s3009_s6 + $0x18] sm:$0xe]  ;;  %v2304_v22 = vrot.slane %v2288_v40, 9  ;;  %2893 = vmatpush.bf16.msra.mxu2 %v2847_v23  ;;  %v2774_v46 = vld [vmem:[#allocation2 + $0xdc] sm:$0xf]  ;;  %v818_v51 = vrot.slane %v816_v39, 5 }
  0x6f   : > { %1964 = vmatmul.bf16.vlgmr.msrb.gmra.mxu2 %v2339_v7  ;;  %v2424_v47 = vld [vmem:[#allocation2 + $0xfc] sm:$0xf0]  ;;  %v2438_v48 = vld [vmem:[#allocation2 + $0xe8] sm:$0xf]  ;;  %v2780_v49 = vld [vmem:[#allocation2 + $0x108] sm:$0xf0] }
  0x70   : > { %v2750_v50 = vld [vmem:[#allocation2 + $0x1c] sm:$0xf]  ;;  %v932_v53 = vrot.slane %v2289_v44, 5  ;;  %v2374_v54 = vld [vmem:[#allocation2 + $0x60] sm:$0xf]  ;;  %v806_v56 = vrot.slane %v805_v42, 4  ;;  %v819_v61 = vor.u32 %v818_v51, %v815_v38  ;;  %v2427_v7 = vor.u32 %v2774_v46, %v2424_v47 }
  0x71   : > { %v2291_v52 = vld [vmem:[%s3009_s6 + $0x1c] sm:$0x1]  ;;  %v2763_v55 = vld [vmem:[#allocation2 + $0x80] sm:$0xf0]  ;;  %v2305_v57 = vrot.slane %v2290_v45, 9  ;;  %v824_v62 = vrot.slane %v822_v43, 5  ;;  %v2439_v8 = vor.u32 %v2780_v49, %v2438_v48 }
  0x72   : > { %v936_v58 = vrot.slane %v2291_v52, 5  ;;  %v2268_v59 = vld [vmem:[%s3009_s6 + $0x30] sm:$0xf]  ;;  %v2340_v60 = vld [vmem:[#allocation2 + $0x3c] sm:$0xf0]  ;;  %v933_v63 = vsel %vm3033_vm2, %v2304_v22, %v932_v53  ;;  %v811_v1 = vsel %vm3129_vm5, %v806_v56, %v810_v37  ;;  %v820_v4 = vrot.slane %v819_v61, 4 }
  0x73   : > { %750 = vst [vmem:[#allocation2 + $0xa8] sm:$0xf] %v2268_v59  ;;  %v2343_v0 = vor.u32 %v2750_v50, %v2340_v60  ;;  %v2269_v3 = vld [vmem:[%s3009_s6 + $0x38] sm:$0xf]  ;;  %v2245_v9 = vld [vmem:[%s3009_s6 + $0x1c] sm:$0x1]  ;;  %v2375_v11 = vor.u32 %v2763_v55, %v2374_v54 }
  0x74   : > { %v937_v2 = vsel %vm3033_vm2, %v2305_v57, %v936_v58  ;;  %970 = vst [vmem:[#allocation2 + $0x20] sm:$0xf] %v933_v63  ;;  %v2244_v41 = vld [vmem:[%s3009_s6 + $0x18] sm:$0xe]  ;;  %v2246_v10 = vld [vmem:[%s3009_s6 + $0x20] sm:$0xe]  ;;  %v825_v12 = vsel %vm3129_vm5, %v820_v4, %v824_v62 }
  0x75   : > { %892 = vst [vmem:[#allocation2 + $0x64] sm:$0xf] %v811_v1  ;;  %v2258_v6 = vrot.slane %v2244_v41, 9  ;;  %1993 = vmatmul.bf16.vlgmr.msrb.gmra.mxu3 %v2343_v0  ;;  %v2247_v13 = vld [vmem:[%s3009_s6 + $0x24] sm:$0x1]  ;;  %v696_v14 = vrot.slane %v2245_v9, 5 }
  0x76   : > { %971 = vst [vmem:[#allocation2 + $0x44] sm:$0xf] %v937_v2  ;;  %v2259_v5 = vrot.slane %v2246_v10, 9  ;;  %v700_v15 = vrot.slane %v2247_v13, 5  ;;  %v2280_v16 = vld [vmem:[%s3009_s6 + $0x30] sm:$0xf] }
  0x77   : > { %751 = vst [vmem:[#allocation2 + $0xcc] sm:$0xf] %v2269_v3  ;;  %v697_v17 = vsel %vm3033_vm2, %v2258_v6, %v696_v14  ;;  %v2281_v18 = vld [vmem:[%s3009_s6 + $0x34] sm:$0x1]  ;;  %v2282_v20 = vld [vmem:[%s3009_s6 + $0x38] sm:$0xf] }
  0x78   : > { %893 = vst [vmem:[#allocation2 + $0x88] sm:$0xf] %v825_v12  ;;  %v2283_v21 = vld [vmem:[%s3009_s6 + $0x3c] sm:$0x1]  ;;  %v701_v23 = vsel %vm3033_vm2, %v2259_v5, %v700_v15  ;;  %v827_v24 = vshrl.u32 %v2280_v16, 16  ;;  %v830_v25 = vshll.u32 %v2280_v16, 16 }
  0x79   : > { %728 = vst [vmem:[#allocation2 + $0x5c] sm:$0xf] %v697_v17  ;;  %v836_v26 = vshll.u32 %v2281_v18, 16  ;;  %v841_v27 = vshrl.u32 %v2282_v20, 16  ;;  %v844_v30 = vshll.u32 %v2282_v20, 16  ;;  %v850_v32 = vshll.u32 %v2283_v21, 16 }
  0x7a   : > { %729 = vst [vmem:[#allocation2 + $0x80] sm:$0xf] %v701_v23  ;;  %v829_v28 = vrot.slane %v827_v24, 4  ;;  %v832_v29 = vrot.slane %v830_v25, 5  ;;  %v2292_v34 = vld [vmem:[%s3009_s6 + $0x20] sm:$0xe] }
  0x7b   : > { %v843_v33 = vrot.slane %v841_v27, 4  ;;  %v838_v37 = vrot.slane %v836_v26, 5  ;;  %v846_v38 = vrot.slane %v844_v30, 5  ;;  %v2293_v39 = vld [vmem:[%s3009_s6 + $0x24] sm:$0x1]  ;;  %v852_v48 = vrot.slane %v850_v32, 5 }
  0x7c   : > { %1834 = vmatmul.bf16.gmra.mxu1 %v2427_v7  ;;  %1921 = vmatmul.bf16.gmra.mxu0 %v2439_v8  ;;  %v2759_v35 = vld [vmem:[#allocation2 + $0x64] sm:$0xf]  ;;  %v833_v36 = vor.u32 %v832_v29, %v829_v28  ;;  %v2294_v42 = vld [vmem:[%s3009_s6 + $0x28] sm:$0xe]  ;;  %v2295_v43 = vld [vmem:[%s3009_s6 + $0x2c] sm:$0x1] }
  0x7d   : > { %v2749_v44 = vld [vmem:[#allocation2 + $0x14] sm:$0xf]  ;;  %v2332_v45 = vld [vmem:[#allocation2 + $0x34] sm:$0xf0]  ;;  %v2346_v22 = vld [vmem:[#allocation2 + $0x20] sm:$0xf]  ;;  %v847_v47 = vor.u32 %v846_v38, %v843_v33 }
  0x7e   : > { %v834_v46 = vrot.slane %v833_v36, 4  ;;  %v2306_v49 = vrot.slane %v2292_v34, 9  ;;  %v2270_v50 = vld [vmem:[%s3009_s6 + $0x40] sm:$0xf]  ;;  %v2755_v51 = vld [vmem:[#allocation2 + $0x40] sm:$0xf0]  ;;  %v2335_v2 = vor.u32 %v2749_v44, %v2332_v45 }
  0x7f   : > { %1969 = vmatmul.bf16.gmra.mxu2 %v2375_v11  ;;  %v2376_v40 = vld [vmem:[#allocation2 + $0x84] sm:$0xf0]  ;;  %v940_v52 = vrot.slane %v2293_v39, 5  ;;  %v2307_v53 = vrot.slane %v2294_v42, 9  ;;  %v944_v54 = vrot.slane %v2295_v43, 5  ;;  %v848_v59 = vrot.slane %v847_v47, 4 }
  0x80   : > { %v2379_v55 = vor.u32 %v2759_v35, %v2376_v40  ;;  %v2410_v56 = vld [vmem:[#allocation2 + $0xa8] sm:$0xf]  ;;  %v2772_v57 = vld [vmem:[#allocation2 + $0xc8] sm:$0xf0]  ;;  %v839_v58 = vsel %vm3129_vm5, %v834_v46, %v838_v37  ;;  %752 = vst [vmem:[#allocation2 + $0xf0] sm:$0xf] %v2270_v50  ;;  %v2347_v3 = vor.u32 %v2755_v51, %v2346_v22 }
  0x81   : > { %894 = vst [vmem:[#allocation2 + $0xac] sm:$0xf] %v839_v58  ;;  %v941_v60 = vsel %vm3033_vm2, %v2306_v49, %v940_v52  ;;  %v945_v61 = vsel %vm3033_vm2, %v2307_v53, %v944_v54  ;;  %v2271_v62 = vld [vmem:[%s3009_s6 + $0x48] sm:$0xf]  ;;  %v853_v63 = vsel %vm3129_vm5, %v848_v59, %v852_v48  ;;  %v2249_v1 = vld [vmem:[%s3009_s6 + $0x2c] sm:$0x1]  ;;  %v2411_v10 = vor.u32 %v2772_v57, %v2410_v56 }
  0x82   : > { %972 = vst [vmem:[#allocation2 + $0x68] sm:$0xf] %v941_v60  ;;  %v2248_v0 = vld [vmem:[%s3009_s6 + $0x28] sm:$0xe]  ;;  %v2250_v41 = vld [vmem:[%s3009_s6 + $0x30] sm:$0xe] }
  0x83   : > { %895 = vst [vmem:[#allocation2 + $0xd0] sm:$0xf] %v853_v63  ;;  %v2251_v4 = vld [vmem:[%s3009_s6 + $0x34] sm:$0x1]  ;;  %v2260_v6 = vrot.slane %v2248_v0, 9  ;;  %v704_v7 = vrot.slane %v2249_v1, 5 }
  0x84   : > { %973 = vst [vmem:[#allocation2 + $0x8c] sm:$0xf] %v945_v61  ;;  %v2261_v8 = vrot.slane %v2250_v41, 9  ;;  %v708_v9 = vrot.slane %v2251_v4, 5  ;;  %v2284_v11 = vld [vmem:[%s3009_s6 + $0x40] sm:$0xf] }
  0x85   : > { %1998 = vmatmul.bf16.gmra.mxu3 %v2379_v55  ;;  %753 = vst [vmem:[#allocation2 + $0x114] sm:$0xf] %v2271_v62  ;;  %v2285_v12 = vld [vmem:[%s3009_s6 + $0x44] sm:$0x1]  ;;  %v705_v13 = vsel %vm3033_vm2, %v2260_v6, %v704_v7  ;;  %v2286_v5 = vld [vmem:[%s3009_s6 + $0x48] sm:$0xf] }
  0x86   : > { %v709_v14 = vsel %vm3033_vm2, %v2261_v8, %v708_v9  ;;  %v2287_v15 = vld [vmem:[%s3009_s6 + $0x4c] sm:$0x1]  ;;  %v855_v16 = vshrl.u32 %v2284_v11, 16  ;;  %v858_v17 = vshll.u32 %v2284_v11, 16  ;;  %730 = vst [vmem:[#allocation2 + $0xa4] sm:$0xf] %v705_v13 }
  0x87   : > { %v864_v18 = vshll.u32 %v2285_v12, 16  ;;  %v869_v20 = vshrl.u32 %v2286_v5, 16  ;;  %731 = vst [vmem:[#allocation2 + $0xc8] sm:$0xf] %v709_v14  ;;  %v872_v25 = vshll.u32 %v2286_v5, 16  ;;  %v878_v26 = vshll.u32 %v2287_v15, 16 }
  0x88   : > { %v857_v21 = vrot.slane %v855_v16, 4  ;;  %v860_v23 = vrot.slane %v858_v17, 5  ;;  %v2296_v29 = vld [vmem:[%s3009_s6 + $0x30] sm:$0xe]  ;;  %v2297_v30 = vld [vmem:[%s3009_s6 + $0x34] sm:$0x1] }
  0x89   : > { %v871_v24 = vrot.slane %v869_v20, 4  ;;  %v866_v28 = vrot.slane %v864_v18, 5  ;;  %v2768_v32 = vld [vmem:[#allocation2 + $0xac] sm:$0xf]  ;;  %v874_v34 = vrot.slane %v872_v25, 5  ;;  %v880_v37 = vrot.slane %v878_v26, 5 }
  0x8a   : > { %v861_v27 = vor.u32 %v860_v23, %v857_v21  ;;  %v2412_v33 = vld [vmem:[#allocation2 + $0xcc] sm:$0xf0]  ;;  %v2298_v35 = vld [vmem:[%s3009_s6 + $0x38] sm:$0xe]  ;;  %v2299_v38 = vld [vmem:[%s3009_s6 + $0x3c] sm:$0x1] }
  0x8b   : > { %v2308_v39 = vrot.slane %v2296_v29, 9  ;;  %v875_v40 = vor.u32 %v874_v34, %v871_v24  ;;  %v948_v42 = vrot.slane %v2297_v30, 5  ;;  %v2309_v43 = vrot.slane %v2298_v35, 9  ;;  %v2300_v44 = vld [vmem:[%s3009_s6 + $0x40] sm:$0xe] }
  0x8c   : > { %1935 = vmatmul.bf16.vlgmr.msra.gmra.mxu1 %v2335_v2  ;;  %2022 = vmatmul.bf16.vlgmr.msra.gmra.mxu0 %v2347_v3  ;;  %v862_v36 = vrot.slane %v861_v27, 4  ;;  %v2301_v45 = vld [vmem:[%s3009_s6 + $0x44] sm:$0x1]  ;;  %v952_v46 = vrot.slane %v2299_v38, 5  ;;  %v2302_v47 = vld [vmem:[%s3009_s6 + $0x48] sm:$0xe]  ;;  %v2415_v56 = vor.u32 %v2768_v32, %v2412_v33 }
  0x8d   : > { %v2310_v48 = vrot.slane %v2300_v44, 9  ;;  %v2758_v49 = vld [vmem:[#allocation2 + $0x5c] sm:$0xf]  ;;  %v2368_v50 = vld [vmem:[#allocation2 + $0x7c] sm:$0xf0]  ;;  %v876_v53 = vrot.slane %v875_v40, 4  ;;  %v949_v54 = vsel %vm3033_vm2, %v2308_v39, %v948_v42 }
  0x8e   : > { %v867_v22 = vsel %vm3129_vm5, %v862_v36, %v866_v28  ;;  %v2382_v51 = vld [vmem:[#allocation2 + $0x68] sm:$0xf]  ;;  %v2764_v52 = vld [vmem:[#allocation2 + $0x88] sm:$0xf0]  ;;  %v956_v55 = vrot.slane %v2301_v45, 5  ;;  %v953_v59 = vsel %vm3033_vm2, %v2309_v43, %v952_v46  ;;  %v2311_v61 = vrot.slane %v2302_v47, 9 }
  0x8f   : > { %1974 = vmatmul.bf16.gmra.mxu2 %v2411_v10  ;;  %896 = vst [vmem:[#allocation2 + $0xf4] sm:$0xf] %v867_v22  ;;  %v2446_v57 = vld [vmem:[#allocation2 + $0xf0] sm:$0xf]  ;;  %v2781_v58 = vld [vmem:[#allocation2 + $0x110] sm:$0xf0]  ;;  %v881_v62 = vsel %vm3129_vm5, %v876_v53, %v880_v37  ;;  %v2371_v8 = vor.u32 %v2758_v49, %v2368_v50  ;;  %v2383_v31 = vor.u32 %v2764_v52, %v2382_v51 }
  0x90   : > { %974 = vst [vmem:[#allocation2 + $0xb0] sm:$0xf] %v949_v54  ;;  %v2303_v60 = vld [vmem:[%s3009_s6 + $0x4c] sm:$0x1]  ;;  %v957_v63 = vsel %vm3033_vm2, %v2310_v48, %v956_v55  ;;  %v2252_v1 = vld [vmem:[%s3009_s6 + $0x38] sm:$0xe]  ;;  %v2447_v11 = vor.u32 %v2781_v58, %v2446_v57 }
  0x91   : > { %975 = vst [vmem:[#allocation2 + $0xd4] sm:$0xf] %v953_v59  ;;  %v960_v0 = vrot.slane %v2303_v60, 5  ;;  %v2253_v2 = vld [vmem:[%s3009_s6 + $0x3c] sm:$0x1]  ;;  %v2262_v6 = vrot.slane %v2252_v1, 9 }
  0x92   : > { %897 = vst [vmem:[#allocation2 + $0x118] sm:$0xf] %v881_v62  ;;  %v2254_v3 = vld [vmem:[%s3009_s6 + $0x40] sm:$0xe]  ;;  %v2255_v4 = vld [vmem:[%s3009_s6 + $0x44] sm:$0x1] }
  0x93   : > { %v961_v41 = vsel %vm3033_vm2, %v2311_v61, %v960_v0  ;;  %976 = vst [vmem:[#allocation2 + $0xf8] sm:$0xf] %v957_v63  ;;  %v712_v7 = vrot.slane %v2253_v2, 5  ;;  %v2263_v9 = vrot.slane %v2254_v3, 9  ;;  %v716_v10 = vrot.slane %v2255_v4, 5 }
  0x94   : > { %977 = vst [vmem:[#allocation2 + $0x11c] sm:$0xf] %v961_v41  ;;  %v2767_v15 = vld [vmem:[#allocation2 + $0xa4] sm:$0xf]  ;;  %v2404_v17 = vld [vmem:[#allocation2 + $0xc4] sm:$0xf0] }
  0x95   : > { %2003 = vmatmul.bf16.gmra.mxu3 %v2415_v56  ;;  %v713_v12 = vsel %vm3033_vm2, %v2262_v6, %v712_v7  ;;  %v717_v13 = vsel %vm3033_vm2, %v2263_v9, %v716_v10  ;;  %v2407_v24 = vor.u32 %v2767_v15, %v2404_v17  ;;  %v2919_v45 = vld [vmem:[%s3527_s2] ss:$0 sm:$0xff] }
  0x96   : > { %732 = vst [vmem:[#allocation2 + $0xec] sm:$0xf] %v713_v12  ;;  %v2777_v14 = vld [vmem:[#allocation2 + $0xf4] sm:$0xf] }
  0x97   : > { %733 = vst [vmem:[#allocation2 + $0x110] sm:$0xf] %v717_v13  ;;  %v2418_v18 = vld [vmem:[#allocation2 + $0xb0] sm:$0xf] }
  0x98   : > { %v2773_v20 = vld [vmem:[#allocation2 + $0xd0] sm:$0xf0] }
  0x99   : > { %v2448_v5 = vld [vmem:[#allocation2 + $0x114] sm:$0xf0]  ;;  %v2419_v25 = vor.u32 %v2773_v20, %v2418_v18 }
  0x9a   : > { %v2451_v16 = vor.u32 %v2777_v14, %v2448_v5  ;;  %v2454_v21 = vld [vmem:[#allocation2 + $0xf8] sm:$0xf] }
  0x9b   : > { %v2782_v23 = vld [vmem:[#allocation2 + $0x118] sm:$0xf0] }
  0x9c   : > { %1940 = vmatmul.bf16.gmra.mxu1 %v2371_v8  ;;  %2027 = vmatmul.bf16.gmra.mxu0 %v2383_v31  ;;  %v2455_v27 = vor.u32 %v2782_v23, %v2454_v21 }
  0x9d   : > { %v2776_v33 = vld [vmem:[#allocation2 + $0xec] sm:$0xf] }
  0x9e   : > { %v2440_v34 = vld [vmem:[#allocation2 + $0x10c] sm:$0xf0] }
  0x9f   : > { %1979 = vmatmul.bf16.gmra.mxu2 %v2447_v11  ;;  %v2443_v35 = vor.u32 %v2776_v33, %v2440_v34 }
  0xa5   : > { %2008 = vmatmul.bf16.gmra.mxu3 %v2451_v16 }
  0xa9   : > { %v1801_v26 = vpop.f32.mrf.mxu1  ;;  %v1791_v19 = vpop.f32.mrf.mxu0 }
  0xaa   : > { %v1792_v22 = vadd.f32 %v2919_v45, %v1791_v19  ;;  %v1802_v11 = vadd.f32 %v2919_v45, %v1801_v26 }
  0xac   : > { %1945 = vmatmul.bf16.gmra.mxu1 %v2407_v24  ;;  %2032 = vmatmul.bf16.gmra.mxu0 %v2419_v25 }
  0xaf   : > { %2037 = vmatmul.bf16.vlgmr.msra.gmra.mxu2 %v2455_v27 }
  0xb1   : > { %v1803_v29 = vpop.f32.mrf.mxu1  ;;  %v1793_v30 = vpop.f32.mrf.mxu0 }
  0xb2   : > { %v1849_v28 = vpop.f32.mrf.mxu2  ;;  %v1878_v32 = vpop.f32.mrf.mxu3  ;;  %v1794_v53 = vadd.f32 %v2919_v45, %v1793_v30  ;;  %v1804_v18 = vadd.f32 %v2919_v45, %v1803_v29 }
  0xb9   : > { %v1806_v37 = vpop.f32.mrf.mxu1  ;;  %v1796_v38 = vpop.f32.mrf.mxu0 }
  0xba   : > { %v1851_v36 = vpop.f32.mrf.mxu2  ;;  %v3470_v39 = vpop.f32.mrf.mxu3  ;;  %v1797_v61 = vadd.f32 %v2919_v45, %v1796_v38  ;;  %v1807_v26 = vadd.f32 %v2919_v45, %v1806_v37 }
  0xbc   : > { %1950 = vmatmul.bf16.gmra.mxu1 %v2443_v35 }
  0xc1   : > { %v1808_v42 = vpop.f32.mrf.mxu1  ;;  %v1798_v43 = vpop.f32.mrf.mxu0 }
  0xc2   : > { %v1854_v40 = vpop.f32.mrf.mxu2  ;;  %v1883_v44 = vpop.f32.mrf.mxu3  ;;  %v1799_v41 = vadd.f32 %v2919_v45, %v1798_v43  ;;  %v1809_v29 = vadd.f32 %v2919_v45, %v1808_v42 }
  0xc9   : > { %v1820_v47 = vpop.f32.mrf.mxu1  ;;  %v1907_v48 = vpop.f32.mrf.mxu0 }
  0xca   : > { %v1856_v46 = vpop.f32.mrf.mxu2  ;;  %v1821_v49 = vadd.f32 %v1820_v47, %v1792_v22  ;;  %v3475_v51 = vpop.f32.mrf.mxu3 }
  0xcc   : > { %v1850_v50 = vadd.f32 %v1849_v28, %v1821_v49 }
  0xce   : > { %v1879_v52 = vadd.f32 %v1878_v32, %v1850_v50 }
  0xd0   : > { %v1908_v54 = vadd.f32 %v1907_v48, %v1879_v52 }
  0xd1   : > { %v1822_v56 = vpop.f32.mrf.mxu1  ;;  %v1909_v57 = vpop.f32.mrf.mxu0 }
  0xd2   : > { %v1859_v55 = vpop.f32.mrf.mxu2  ;;  %v1823_v58 = vadd.f32 %v1822_v56, %v1794_v53  ;;  %v1888_v60 = vpop.f32.mrf.mxu3 }
  0xd4   : > { %v1852_v59 = vadd.f32 %v1851_v36, %v1823_v58 }
  0xd6   : > { %v1881_v52 = vadd.f32 %v3470_v39, %v1852_v59 }
  0xd9   : > { %v1825_v63 = vpop.f32.mrf.mxu1  ;;  %v1912_v0 = vpop.f32.mrf.mxu0 }
  0xda   : > { %v1861_v62 = vpop.f32.mrf.mxu2  ;;  %v1826_v1 = vadd.f32 %v1825_v63, %v1797_v61  ;;  %v3477_v7 = vpop.f32.mrf.mxu3 }
  0xdc   : > { %v1855_v2 = vadd.f32 %v1854_v40, %v1826_v1 }
  0xde   : > { %v1884_v3 = vadd.f32 %v1883_v44, %v1855_v2 }
  0xe0   : > { %v1913_v4 = vadd.f32 %v1912_v0, %v1884_v3 }
  0xe1   : > { %v1827_v8 = vpop.f32.mrf.mxu1  ;;  %v3479_v31 = vpop.f32.mrf.mxu0 }
  0xe2   : > { %v1864_v6 = vpop.f32.mrf.mxu2  ;;  %v1828_v9 = vadd.f32 %v1827_v8, %v1799_v41  ;;  %v1893_v15 = vpop.f32.mrf.mxu3 }
  0xe4   : > { %v1857_v10 = vadd.f32 %v1856_v46, %v1828_v9 }
  0xe6   : > { %v1886_v39 = vadd.f32 %v3475_v51, %v1857_v10 }
  0xe9   : > { %v1830_v13 = vpop.f32.mrf.mxu1  ;;  %v1917_v14 = vpop.f32.mrf.mxu0 }
  0xea   : > { %v1866_v12 = vpop.f32.mrf.mxu2  ;;  %v1831_v5 = vadd.f32 %v1830_v13, %v1802_v11  ;;  %v3487_v27 = vpop.f32.mrf.mxu3  ;;  %v1915_v11 = vadd.f32 %v3479_v31, %v1886_v39 }
  0xec   : > { %v1860_v16 = vadd.f32 %v1859_v55, %v1831_v5  ;;  %v1910_v55 = vadd.f32 %v1909_v57, %v1881_v52 }
  0xee   : > { %v1889_v17 = vadd.f32 %v1888_v60, %v1860_v16 }
  0xf0   : > { %v3481_v20 = vadd.f32 %v1917_v14, %v1889_v17 }
  0xf1   : > { %v1832_v23 = vpop.f32.mrf.mxu1  ;;  %v3483_v24 = vpop.f32.mrf.mxu0 }
  0xf2   : > { %v1965_v21 = vpop.f32.mrf.mxu2  ;;  %v1833_v25 = vadd.f32 %v1832_v23, %v1804_v18 }
  0xf4   : > { %v3485_v19 = vadd.f32 %v1861_v62, %v1833_v25 }
  0xf6   : > { %v1891_v31 = vadd.f32 %v3477_v7, %v3485_v19 }
  0xf8   : > { %v1994_v36 = vpop.f32.mrf.mxu3 }
  0xf9   : > { %v1835_v30 = vpop.f32.mrf.mxu1  ;;  %v1922_v32 = vpop.f32.mrf.mxu0 }
  0xfa   : > { %v1967_v28 = vpop.f32.mrf.mxu2  ;;  %v1836_v33 = vadd.f32 %v1835_v30, %v1807_v26 }
  0xfc   : > { %v1865_v34 = vadd.f32 %v1864_v6, %v1836_v33 }
  0xfe   : > { %v1894_v35 = vadd.f32 %v1893_v15, %v1865_v34 }
 0x100   : > { %v3489_v38 = vadd.f32 %v1922_v32, %v1894_v35  ;;  %v1996_v47 = vpop.f32.mrf.mxu3  ;;  %v1920_v32 = vadd.f32 %v3483_v24, %v1891_v31 }
 0x101   : > { %v1837_v43 = vpop.f32.mrf.mxu1  ;;  %v3491_v44 = vpop.f32.mrf.mxu0 }
 0x102   : > { %v1970_v40 = vpop.f32.mrf.mxu2  ;;  %v1838_v22 = vadd.f32 %v1837_v43, %v1809_v29 }
 0x104   : > { %v3493_v46 = vadd.f32 %v1866_v12, %v1838_v22 }
 0x106   : > { %v1896_v24 = vadd.f32 %v3487_v27, %v3493_v46 }
 0x108   : > { %v1999_v60 = vpop.f32.mrf.mxu3 }
 0x109   : > { %v1936_v48 = vpop.f32.mrf.mxu1  ;;  %v2023_v37 = vpop.f32.mrf.mxu0 }
 0x10a   : > { %v1937_v49 = vadd.f32 %v1936_v48, %v1908_v54  ;;  %v1972_v50 = vpop.f32.mrf.mxu2 }
 0x10c   : > { %v1966_v53 = vadd.f32 %v1965_v21, %v1937_v49 }
 0x10e   : > { %v1995_v56 = vadd.f32 %v1994_v36, %v1966_v53 }
 0x110   : > { %v2024_v63 = vadd.f32 %v2023_v37, %v1995_v56  ;;  %v2001_v59 = vpop.f32.mrf.mxu3 }
 0x111   : > { %v1938_v42 = vpop.f32.mrf.mxu1  ;;  %v2025_v45 = vpop.f32.mrf.mxu0 }
 0x112   : > { %v1939_v58 = vadd.f32 %v1938_v42, %v1910_v55  ;;  %v1975_v62 = vpop.f32.mrf.mxu2  ;;  %v2043_v41 = vmax.f32 %v2024_v63, 0.0  ;;  %v1925_v55 = vadd.f32 %v3491_v44, %v1896_v24 }
 0x114   : > { %v1968_v61 = vadd.f32 %v1967_v28, %v1939_v58 }
 0x116   : > { %v1997_v0 = vadd.f32 %v1996_v47, %v1968_v61 }
 0x118   : > { %v2026_v1 = vadd.f32 %v2025_v45, %v1997_v0  ;;  %v2004_v17 = vpop.f32.mrf.mxu3 }
 0x119   : > { %v1941_v2 = vpop.f32.mrf.mxu1  ;;  %v2028_v3 = vpop.f32.mrf.mxu0 }
 0x11a   : > { %v2044_v54 = vmax.f32 %v2026_v1, 0.0  ;;  %v1942_v6 = vadd.f32 %v1941_v2, %v1913_v4  ;;  %v1977_v9 = vpop.f32.mrf.mxu2 }
 0x11c   : > { %v2858_v57 = vpack.c.bf16 %v2044_v54, %v2043_v41  ;;  %v1971_v8 = vadd.f32 %v1970_v40, %v1942_v6 }
 0x11e   : > { %2859 = vst [vmem:[%s3500_s9] sm:$0xff] %v2858_v57   ;;  %v2000_v14 = vadd.f32 %v1999_v60, %v1971_v8 }
 0x120   : > { %v2029_v15 = vadd.f32 %v2028_v3, %v2000_v14  ;;  %v2006_v33 = vpop.f32.mrf.mxu3 }
 0x121   : > { %v1943_v12 = vpop.f32.mrf.mxu1  ;;  %v2030_v13 = vpop.f32.mrf.mxu0 }
 0x122   : > { %v1944_v4 = vadd.f32 %v1943_v12, %v1915_v11  ;;  %v1980_v21 = vpop.f32.mrf.mxu2  ;;  %v2045_v51 = vmax.f32 %v2029_v15, 0.0 }
 0x124   : > { %v1973_v5 = vadd.f32 %v1972_v50, %v1944_v4 }
 0x126   : > { %v2002_v16 = vadd.f32 %v2001_v59, %v1973_v5 }
 0x128   : > { %v2031_v18 = vadd.f32 %v2030_v13, %v2002_v16  ;;  %v2009_v19 = vpop.f32.mrf.mxu3 }
 0x129   : > { %v1946_v23 = vpop.f32.mrf.mxu1  ;;  %v2033_v26 = vpop.f32.mrf.mxu0 }
 0x12a   : > { %v2046_v10 = vmax.f32 %v2031_v18, 0.0  ;;  %v1947_v25 = vadd.f32 %v1946_v23, %v3481_v20  ;;  %v1982_v29 = vpop.f32.mrf.mxu2 }
 0x12c   : > { %v2863_v28 = vpack.c.bf16 %v2046_v10, %v2045_v51  ;;  %v1976_v30 = vadd.f32 %v1975_v62, %v1947_v25 }
 0x12e   : > { %2875 = vst [vmem:[%s3500_s9 + $0x8] sm:$0xff] %v2863_v28   ;;  %v2005_v35 = vadd.f32 %v2004_v17, %v1976_v30 }
 0x130   : > { %v2034_v22 = vadd.f32 %v2033_v26, %v2005_v35  ;;  %v2011_v60 = vpop.f32.mrf.mxu3 }
 0x131   : > { %v1948_v34 = vpop.f32.mrf.mxu1  ;;  %v2035_v43 = vpop.f32.mrf.mxu0 }
 0x132   : > { %v1949_v36 = vadd.f32 %v1948_v34, %v1920_v32  ;;  %v2047_v37 = vmax.f32 %v2034_v22, 0.0  ;;  %v2038_v52 = vpop.f32.mrf.mxu2 }
 0x134   : > { %v1978_v40 = vadd.f32 %v1977_v9, %v1949_v36 }
 0x136   : > { %v2007_v47 = vadd.f32 %v2006_v33, %v1978_v40 }
 0x138   : > { %v2036_v20 = vadd.f32 %v2035_v43, %v2007_v47 }
 0x139   : > { %v1951_v48 = vpop.f32.mrf.mxu1 }
 0x13a   : > { %v2048_v49 = vmax.f32 %v2036_v20, 0.0  ;;  %v1952_v7 = vadd.f32 %v1951_v48, %v3489_v38  ;;  %v2040_v63 = vpop.f32.mrf.mxu2 }
 0x13c   : > { %v2868_v50 = vpack.c.bf16 %v2048_v49, %v2047_v37  ;;  %v1981_v53 = vadd.f32 %v1980_v21, %v1952_v7 }
 0x13e   : > { %2876 = vst [vmem:[%s3500_s9 + $0x10] sm:$0xff] %v2868_v50   ;;  %v2010_v45 = vadd.f32 %v2009_v19, %v1981_v53 }
 0x140   : > { %v2039_v61 = vadd.f32 %v2038_v52, %v2010_v45 }
 0x141   : > { %v1953_v42 = vpop.f32.mrf.mxu1 }
 0x142   : > { %v1954_v56 = vadd.f32 %v1953_v42, %v1925_v55  ;;  %v2049_v0 = vmax.f32 %v2039_v61, 0.0 }
 0x144   : > { %v1983_v58 = vadd.f32 %v1982_v29, %v1954_v56 }
 0x146   : > { %v2012_v62 = vadd.f32 %v2011_v60, %v1983_v58 }
 0x148   : > { %v2041_v38 = vadd.f32 %v2040_v63, %v2012_v62 }
 0x14a   : > { %v2050_v1 = vmax.f32 %v2041_v38, 0.0 }
 0x14c   : > { %v2873_v2 = vpack.c.bf16 %v2050_v1, %v2049_v0 }
 0x14e   : > { %2877 = vst [vmem:[%s3500_s9 + $0x18] sm:$0xff] %v2873_v2  }
 0x14f PF: > { %s13_s14 = sadd.s32 1, %s2942_s14   ;;  %s3533_s12 = smov %s2938_s13 }
 0x150   : > { %p10_p5 = scmp.ge.s32.totalorder %s13_s14, 4   ;;  %s3534_s13 = smov %s3536_s15 }
 0x152   :  { %12 = sbr.rel (!%p10_p5) target bundleno = 2 (0x2), region = 71 }

</bundles_post_ra>
